<compile_context>
chip_gen: v6e
topology: v6e:2x2x1
jax: 0.10.0
libtpu: 0.0.40
codegen_flags: <defaults>
</compile_context>

<pallas_src>
import functools
import math

import jax
import jax.numpy as jnp
from jax.experimental import pallas as pl
from jax.experimental.pallas import tpu as pltpu

EPS = 1e-6


# ------------------------------ in-kernel helpers ------------------------------

def _layer_norm(x, a, b):
    # x: [S, D] f32, a/b: [1, D] f32.  torch .std() is unbiased (ddof=1).
    d = x.shape[-1]
    mean = jnp.mean(x, axis=-1, keepdims=True)
    var = jnp.sum((x - mean) ** 2, axis=-1, keepdims=True) * (1.0 / (d - 1))
    inv = 1.0 / (jnp.sqrt(var) + EPS)     # exact: LN error must not compound
    return a * (x - mean) * inv + b


# ------------------------------ fused encoder kernel ------------------------------

def encoder_kernel(x_ref, mask_ref,
                   ln1a_ref, ln1b_ref,
                   wq_ref, bq_ref, wk_ref, bk_ref, wv_ref, bv_ref,
                   wo_ref, bo_ref,
                   ln2a_ref, ln2b_ref,
                   w1_ref, b1_ref, w2_ref, b2_ref,
                   na_ref, nb_ref,
                   o_ref, ctx_ref, *, num_heads):
    layer = pl.program_id(1)
    n_layers = pl.num_programs(1)
    tb, s_len, d_model = o_ref.shape
    dk = d_model // num_heads
    scale = 1.0 / math.sqrt(dk)

    # Bring the input activation into the resident output block on layer 0.
    @pl.when(layer == 0)
    def _():
        o_ref[...] = x_ref[...]

    # Per-layer parameter views (weights are bf16; biases / LN params f32).
    wq = wq_ref[0]; wk = wk_ref[0]; wv = wv_ref[0]; wo = wo_ref[0]
    w1 = w1_ref[0]; w2 = w2_ref[0]
    bq = bq_ref[0]; bk = bk_ref[0]; bv = bv_ref[0]; bo = bo_ref[0]
    b1 = b1_ref[0]; b2 = b2_ref[0]
    ln1a = ln1a_ref[0]; ln1b = ln1b_ref[0]
    ln2a = ln2a_ref[0]; ln2b = ln2b_ref[0]

    # TODO(synk): for large batch blocks, replace the static unroll over rows
    # with lax.fori_loop to bound live ranges / code size.
    for b in range(tb):
        x = o_ref[b]                                      # [S, D] f32, resident
        # Hoisted mask handling: additive bias computed once per row,
        # reused by every head.
        bias = jnp.where(mask_ref[b] == 0.0, -1e9, 0.0)   # [1, S] f32

        # ---- sublayer 1: pre-LN multi-head self-attention + residual ----
        xn = _layer_norm(x, ln1a, ln1b)
        xn_bf = xn.astype(jnp.bfloat16)
        # Full-width projections: contraction depth D, bf16 x bf16 -> f32 acc.
        q = jnp.dot(xn_bf, wq, preferred_element_type=jnp.float32) + bq
        k = jnp.dot(xn_bf, wk, preferred_element_type=jnp.float32) + bk
        v = jnp.dot(xn_bf, wv, preferred_element_type=jnp.float32) + bv
        q_bf = q.astype(jnp.bfloat16)
        v_bf = v.astype(jnp.bfloat16)
        kt_bf = k.astype(jnp.bfloat16).T      # ONE transpose per layer/row

        # TODO(synk): at dk < 128 the per-head matmuls under-fill the MXU
        # contraction; for production shapes batch >=2 heads per dot_general.
        for h in range(num_heads):
            lo = h * dk
            s_h = jnp.dot(q_bf[:, lo:lo + dk], kt_bf[lo:lo + dk, :],
                          preferred_element_type=jnp.float32) * scale
            s_h = s_h + bias                               # broadcast over rows
            s_h = s_h - jnp.max(s_h, axis=-1, keepdims=True)   # f32 stats
            p_h = jnp.exp(s_h)
            p_h = p_h * pl.reciprocal(jnp.sum(p_h, axis=-1, keepdims=True),
                                      approx=True)         # EUP slot
            # Write the head's context into a lane slice of the persistent
            # scratch (no jnp.concatenate relayout chain).
            ctx_ref[:, lo:lo + dk] = jnp.dot(p_h.astype(jnp.bfloat16),
                                             v_bf[:, lo:lo + dk],
                                             preferred_element_type=jnp.float32)

        attn = jnp.dot(ctx_ref[...].astype(jnp.bfloat16), wo,
                       preferred_element_type=jnp.float32) + bo
        x = x + attn

        # ---- sublayer 2: pre-LN position-wise FFN + residual ----
        xn2 = _layer_norm(x, ln2a, ln2b)
        h1 = jnp.maximum(
            jnp.dot(xn2.astype(jnp.bfloat16), w1,
                    preferred_element_type=jnp.float32) + b1, 0.0)
        ff = jnp.dot(h1.astype(jnp.bfloat16), w2,
                     preferred_element_type=jnp.float32) + b2
        x = x + ff

        # Write back; fold the final LayerNorm into the last layer step.
        @pl.when(layer < n_layers - 1)
        def _():
            o_ref[b] = x

        @pl.when(layer == n_layers - 1)
        def _():
            o_ref[b] = _layer_norm(x, na_ref[...], nb_ref[...])


# ------------------------------ wrapper ------------------------------

def _vmem_budget(tb, s, d, dff):
    """Compute a vmem_limit_bytes from the actual block sizes (2x headroom)."""
    bf16, f32 = 2, 4
    # Per-layer weight blocks (bf16) + biases/LN params (f32), double-buffered
    # along the layer axis.
    w_layer = (4 * d * d + 2 * d * dff) * bf16 + (5 * d + dff + 4 * d) * f32
    weights = 2 * w_layer
    # Activation blocks: x input block + revisited output block (+ buffers),
    # mask block, (S, D) context scratch.
    acts = 4 * tb * s * d * f32 + 2 * tb * s * f32 + s * d * f32
    # Per-row live intermediates (q, k, v, kT, xn, attn, h1, scores, ...).
    inter = (10 * s * d + 2 * s * dff + 2 * s * s) * f32
    est = weights + acts + inter
    # Floor 32 MiB, cap 96 MiB.  NOTE(v7x): cap at ~56 MiB (64 MiB VMEM / TC).
    return int(min(max(2 * est, 32 << 20), 96 << 20))


def encoder_forward(x, mask, params, num_heads, batch_block=None):
    bsz, s_len, d_model = x.shape
    layers = params["layers"]
    n_layers = len(layers)
    d_ff = layers[0]["w1"].shape[1]

    # Batch rows processed per grid step: amortizes per-layer weight DMA
    # across the batch (weights fetched n_layers times total, not B*L).
    # NOTE(v7x): pick batch_block so that bsz // batch_block >= 2 to feed
    # both TensorCores.
    if batch_block is None:
        batch_block = 1
        for tb in range(min(bsz, 8), 0, -1):
            if bsz % tb == 0:
                batch_block = tb
                break
    tb = batch_block
    n_batch_blocks = bsz // tb

    bf16, f32 = jnp.bfloat16, jnp.float32

    def stack(name, shape, dtype):
        return jnp.stack([lp[name].reshape(shape).astype(dtype)
                          for lp in layers], axis=0)

    # Weights in bf16 (MXU-native, halves DMA/VMEM); biases + LN params in f32.
    ln1a = stack("ln1_a", (1, d_model), f32); ln1b = stack("ln1_b", (1, d_model), f32)
    wq = stack("wq", (d_model, d_model), bf16); bq = stack("bq", (1, d_model), f32)
    wk = stack("wk", (d_model, d_model), bf16); bk = stack("bk", (1, d_model), f32)
    wv = stack("wv", (d_model, d_model), bf16); bv = stack("bv", (1, d_model), f32)
    wo = stack("wo", (d_model, d_model), bf16); bo = stack("bo", (1, d_model), f32)
    ln2a = stack("ln2_a", (1, d_model), f32); ln2b = stack("ln2_b", (1, d_model), f32)
    w1 = stack("w1", (d_model, d_ff), bf16);   b1 = stack("b1", (1, d_ff), f32)
    w2 = stack("w2", (d_ff, d_model), bf16);   b2 = stack("b2", (1, d_model), f32)
    na_w = params["norm_a"].reshape(1, d_model).astype(f32)
    nb_w = params["norm_b"].reshape(1, d_model).astype(f32)

    weight_args = [ln1a, ln1b, wq, bq, wk, bk, wv, bv, wo, bo,
                   ln2a, ln2b, w1, b1, w2, b2]

    def layer_spec(arr):
        blk = (1,) + arr.shape[1:]
        nd = len(blk)
        return pl.BlockSpec(blk, lambda i, l, nd=nd: (l,) + (0,) * (nd - 1))

    in_specs = ([pl.BlockSpec((tb, s_len, d_model), lambda i, l: (i, 0, 0)),
                 pl.BlockSpec((tb, 1, s_len), lambda i, l: (i, 0, 0))]
                + [layer_spec(a) for a in weight_args]
                + [pl.BlockSpec((1, d_model), lambda i, l: (0, 0)),
                   pl.BlockSpec((1, d_model), lambda i, l: (0, 0))])

    out_spec = pl.BlockSpec((tb, s_len, d_model), lambda i, l: (i, 0, 0))

    return pl.pallas_call(
        functools.partial(encoder_kernel, num_heads=num_heads),
        out_shape=jax.ShapeDtypeStruct((bsz, s_len, d_model), jnp.float32),
        grid=(n_batch_blocks, n_layers),
        in_specs=in_specs,
        out_specs=out_spec,
        scratch_shapes=[pltpu.VMEM((s_len, d_model), jnp.float32)],
        compiler_params=pltpu.CompilerParams(
            dimension_semantics=("parallel", "arbitrary"),
            vmem_limit_bytes=_vmem_budget(tb, s_len, d_model, d_ff)),
    )(x, mask, *weight_args, na_w, nb_w)


# ------------------------------ pure-JAX reference ------------------------------

def _ref_layer_norm(x, a, b):
    d = x.shape[-1]
    mean = jnp.mean(x, axis=-1, keepdims=True)
    var = jnp.sum((x - mean) ** 2, axis=-1, keepdims=True) / (d - 1)
    return a * (x - mean) / (jnp.sqrt(var) + EPS) + b


def ref_encoder(x, mask, params, num_heads):
    bsz, s_len, d_model = x.shape
    dk = d_model // num_heads
    for p in params["layers"]:
        xn = _ref_layer_norm(x, p["ln1_a"], p["ln1_b"])
        q = xn @ p["wq"] + p["bq"]
        k = xn @ p["wk"] + p["bk"]
        v = xn @ p["wv"] + p["bv"]
        split = lambda t: t.reshape(bsz, s_len, num_heads, dk).transpose(0, 2, 1, 3)
        q, k, v = split(q), split(k), split(v)
        s = jnp.einsum("bhqd,bhkd->bhqk", q, k) / math.sqrt(dk)
        s = jnp.where(mask[:, None, :, :] == 0.0, -1e9, s)
        a = jax.nn.softmax(s, axis=-1)
        o = jnp.einsum("bhqk,bhkd->bhqd", a, v)
        o = o.transpose(0, 2, 1, 3).reshape(bsz, s_len, d_model)
        x = x + (o @ p["wo"] + p["bo"])
        xn2 = _ref_layer_norm(x, p["ln2_a"], p["ln2_b"])
        h1 = jnp.maximum(xn2 @ p["w1"] + p["b1"], 0.0)
        x = x + (h1 @ p["w2"] + p["b2"])
    return _ref_layer_norm(x, params["norm_a"], params["norm_b"])


# ------------------------------ parameter init ------------------------------

def init_params(key, n_layers, d_model, d_ff):
    def w(k, shape, scale=0.02):
        return scale * jax.random.normal(k, shape, jnp.float32)

    layers = []
    for i in range(n_layers):
        ks = jax.random.split(jax.random.fold_in(key, i), 12)
        layers.append(dict(
            ln1_a=jnp.ones((d_model,), jnp.float32),
            ln1_b=jnp.zeros((d_model,), jnp.float32),
            wq=w(ks[0], (d_model, d_model)), bq=w(ks[1], (d_model,), 0.01),
            wk=w(ks[2], (d_model, d_model)), bk=w(ks[3], (d_model,), 0.01),
            wv=w(ks[4], (d_model, d_model)), bv=w(ks[5], (d_model,), 0.01),
            wo=w(ks[6], (d_model, d_model)), bo=w(ks[7], (d_model,), 0.01),
            ln2_a=jnp.ones((d_model,), jnp.float32),
            ln2_b=jnp.zeros((d_model,), jnp.float32),
            w1=w(ks[8], (d_model, d_ff)), b1=w(ks[9], (d_ff,), 0.01),
            w2=w(ks[10], (d_ff, d_model)), b2=w(ks[11], (d_model,), 0.01),
        ))
    return dict(layers=layers,
                norm_a=jnp.ones((d_model,), jnp.float32),
                norm_b=jnp.zeros((d_model,), jnp.float32))


# ------------------------------ main ------------------------------

if __name__ == "__main__":
    # Small test config; D=128 keeps the last dim lane-dense (no masked stores).
    B, S, D, H, D_FF, N_LAYERS = 2, 8, 128, 4, 256, 2

    key = jax.random.PRNGKey(0)
    kx, kp = jax.random.split(key)
    x = jax.random.normal(kx, (B, S, D), jnp.float32)

    # mask: [B, 1, S]; batch 0 sees all 8 positions, batch 1 sees first 5.
    lengths = jnp.array([8, 5], jnp.int32)
    mask = (jnp.arange(S)[None, None, :] < lengths[:, None, None]).astype(jnp.float32)

    params = init_params(kp, N_LAYERS, D, D_FF)

    out = encoder_forward(x, mask, params, H)
    out = jax.block_until_ready(out)

    ref = ref_encoder(x, mask, params, H)
    err = float(jnp.max(jnp.abs(out - ref)))
    assert out.shape == (B, S, D)
    # Tolerance accounts for bf16 matmul operands (f32 accumulation) and the
    # approx softmax reciprocal, accumulated over N layers + final norm.
    assert err < 3e-2, f"mismatch vs reference: max abs err = {err}"

    # TODO(synk): dropout in SublayerConnection/attention/FFN is identity (eval mode).
    print("KERNEL_OK")
</pallas_src>

<mosaic_0001>
module attributes {stable_mosaic.version = 11 : i64} {
  func.func @encoder_kernel(%arg0: i32, %arg1: i32, %arg2: memref<2x8x128xf32, #tpu.memory_space<vmem>>, %arg3: memref<2x1x8xf32, #tpu.memory_space<vmem>>, %arg4: memref<1x1x128xf32, #tpu.memory_space<vmem>>, %arg5: memref<1x1x128xf32, #tpu.memory_space<vmem>>, %arg6: memref<1x128x128xbf16, #tpu.memory_space<vmem>>, %arg7: memref<1x1x128xf32, #tpu.memory_space<vmem>>, %arg8: memref<1x128x128xbf16, #tpu.memory_space<vmem>>, %arg9: memref<1x1x128xf32, #tpu.memory_space<vmem>>, %arg10: memref<1x128x128xbf16, #tpu.memory_space<vmem>>, %arg11: memref<1x1x128xf32, #tpu.memory_space<vmem>>, %arg12: memref<1x128x128xbf16, #tpu.memory_space<vmem>>, %arg13: memref<1x1x128xf32, #tpu.memory_space<vmem>>, %arg14: memref<1x1x128xf32, #tpu.memory_space<vmem>>, %arg15: memref<1x1x128xf32, #tpu.memory_space<vmem>>, %arg16: memref<1x128x256xbf16, #tpu.memory_space<vmem>>, %arg17: memref<1x1x256xf32, #tpu.memory_space<vmem>>, %arg18: memref<1x256x128xbf16, #tpu.memory_space<vmem>>, %arg19: memref<1x1x128xf32, #tpu.memory_space<vmem>>, %arg20: memref<1x128xf32, #tpu.memory_space<vmem>>, %arg21: memref<1x128xf32, #tpu.memory_space<vmem>>, %arg22: memref<2x8x128xf32, #tpu.memory_space<vmem>>, %arg23: memref<8x128xf32, #tpu.memory_space<vmem>>) attributes {dimension_semantics = [#tpu.dimension_semantics<parallel>, #tpu.dimension_semantics<arbitrary>], iteration_bounds = array<i64: 1, 2>, scalar_prefetch = 0 : i64, scratch_operands = 1 : i64, tpu.core_type = #tpu.core_type<tc>, window_params = [{transform_indices = @transform_0, window_bounds = array<i64: 2, 8, 128>}, {transform_indices = @transform_1, window_bounds = array<i64: 2, 1, 8>}, {transform_indices = @transform_2, window_bounds = array<i64: 1, 1, 128>}, {transform_indices = @transform_3, window_bounds = array<i64: 1, 1, 128>}, {transform_indices = @transform_4, window_bounds = array<i64: 1, 128, 128>}, {transform_indices = @transform_5, window_bounds = array<i64: 1, 1, 128>}, {transform_indices = @transform_6, window_bounds = array<i64: 1, 128, 128>}, {transform_indices = @transform_7, window_bounds = array<i64: 1, 1, 128>}, {transform_indices = @transform_8, window_bounds = array<i64: 1, 128, 128>}, {transform_indices = @transform_9, window_bounds = array<i64: 1, 1, 128>}, {transform_indices = @transform_10, window_bounds = array<i64: 1, 128, 128>}, {transform_indices = @transform_11, window_bounds = array<i64: 1, 1, 128>}, {transform_indices = @transform_12, window_bounds = array<i64: 1, 1, 128>}, {transform_indices = @transform_13, window_bounds = array<i64: 1, 1, 128>}, {transform_indices = @transform_14, window_bounds = array<i64: 1, 128, 256>}, {transform_indices = @transform_15, window_bounds = array<i64: 1, 1, 256>}, {transform_indices = @transform_16, window_bounds = array<i64: 1, 256, 128>}, {transform_indices = @transform_17, window_bounds = array<i64: 1, 1, 128>}, {pipeline_mode = #tpu.pipeline_mode<synchronous>, transform_indices = @transform_18, window_bounds = array<i64: 1, 128>}, {pipeline_mode = #tpu.pipeline_mode<synchronous>, transform_indices = @transform_19, window_bounds = array<i64: 1, 128>}, {transform_indices = @transform_20, window_bounds = array<i64: 2, 8, 128>}]} {
    %c0_i32 = arith.constant 0 : i32
    %0 = arith.cmpi eq, %arg1, %c0_i32 : i32
    %1 = arith.extui %0 : i1 to i32
    %c0_i32_0 = arith.constant 0 : i32
    %2 = arith.cmpi ne, %1, %c0_i32_0 : i32
    scf.if %2 {
      %c0_166 = arith.constant 0 : index
      %c0_167 = arith.constant 0 : index
      %c0_168 = arith.constant 0 : index
      %391 = vector.load %arg2[%c0_166, %c0_167, %c0_168] : memref<2x8x128xf32, #tpu.memory_space<vmem>>, vector<2x8x128xf32>
      %c0_169 = arith.constant 0 : index
      %c0_170 = arith.constant 0 : index
      %c0_171 = arith.constant 0 : index
      %392 = vector.load %arg22[%c0_169, %c0_170, %c0_171] : memref<2x8x128xf32, #tpu.memory_space<vmem>>, vector<2x8x128xf32>
      tpu.vector_store %arg22[%c0_169, %c0_170, %c0_171], %391 {strides = array<i32>} : memref<2x8x128xf32, #tpu.memory_space<vmem>>, vector<2x8x128xf32>,
    } else {
    }
    %c0 = arith.constant 0 : index
    %c0_1 = arith.constant 0 : index
    %c0_2 = arith.constant 0 : index
    %3 = vector.load %arg6[%c0, %c0_1, %c0_2] : memref<1x128x128xbf16, #tpu.memory_space<vmem>>, vector<1x128x128xbf16>
    %4 = vector.shape_cast %3 : vector<1x128x128xbf16> to vector<128x128xbf16>
    %c0_3 = arith.constant 0 : index
    %c0_4 = arith.constant 0 : index
    %c0_5 = arith.constant 0 : index
    %5 = vector.load %arg8[%c0_3, %c0_4, %c0_5] : memref<1x128x128xbf16, #tpu.memory_space<vmem>>, vector<1x128x128xbf16>
    %6 = vector.shape_cast %5 : vector<1x128x128xbf16> to vector<128x128xbf16>
    %c0_6 = arith.constant 0 : index
    %c0_7 = arith.constant 0 : index
    %c0_8 = arith.constant 0 : index
    %7 = vector.load %arg10[%c0_6, %c0_7, %c0_8] : memref<1x128x128xbf16, #tpu.memory_space<vmem>>, vector<1x128x128xbf16>
    %8 = vector.shape_cast %7 : vector<1x128x128xbf16> to vector<128x128xbf16>
    %c0_9 = arith.constant 0 : index
    %c0_10 = arith.constant 0 : index
    %c0_11 = arith.constant 0 : index
    %9 = vector.load %arg12[%c0_9, %c0_10, %c0_11] : memref<1x128x128xbf16, #tpu.memory_space<vmem>>, vector<1x128x128xbf16>
    %10 = vector.shape_cast %9 : vector<1x128x128xbf16> to vector<128x128xbf16>
    %c0_12 = arith.constant 0 : index
    %c0_13 = arith.constant 0 : index
    %c0_14 = arith.constant 0 : index
    %11 = vector.load %arg16[%c0_12, %c0_13, %c0_14] : memref<1x128x256xbf16, #tpu.memory_space<vmem>>, vector<1x128x256xbf16>
    %12 = vector.shape_cast %11 : vector<1x128x256xbf16> to vector<128x256xbf16>
    %c0_15 = arith.constant 0 : index
    %c0_16 = arith.constant 0 : index
    %c0_17 = arith.constant 0 : index
    %13 = vector.load %arg18[%c0_15, %c0_16, %c0_17] : memref<1x256x128xbf16, #tpu.memory_space<vmem>>, vector<1x256x128xbf16>
    %14 = vector.shape_cast %13 : vector<1x256x128xbf16> to vector<256x128xbf16>
    %c0_18 = arith.constant 0 : index
    %c0_19 = arith.constant 0 : index
    %c0_20 = arith.constant 0 : index
    %15 = vector.load %arg7[%c0_18, %c0_19, %c0_20] : memref<1x1x128xf32, #tpu.memory_space<vmem>>, vector<1x1x128xf32>
    %16 = vector.shape_cast %15 : vector<1x1x128xf32> to vector<1x128xf32>
    %c0_21 = arith.constant 0 : index
    %c0_22 = arith.constant 0 : index
    %c0_23 = arith.constant 0 : index
    %17 = vector.load %arg9[%c0_21, %c0_22, %c0_23] : memref<1x1x128xf32, #tpu.memory_space<vmem>>, vector<1x1x128xf32>
    %18 = vector.shape_cast %17 : vector<1x1x128xf32> to vector<1x128xf32>
    %c0_24 = arith.constant 0 : index
    %c0_25 = arith.constant 0 : index
    %c0_26 = arith.constant 0 : index
    %19 = vector.load %arg11[%c0_24, %c0_25, %c0_26] : memref<1x1x128xf32, #tpu.memory_space<vmem>>, vector<1x1x128xf32>
    %20 = vector.shape_cast %19 : vector<1x1x128xf32> to vector<1x128xf32>
    %c0_27 = arith.constant 0 : index
    %c0_28 = arith.constant 0 : index
    %c0_29 = arith.constant 0 : index
    %21 = vector.load %arg13[%c0_27, %c0_28, %c0_29] : memref<1x1x128xf32, #tpu.memory_space<vmem>>, vector<1x1x128xf32>
    %22 = vector.shape_cast %21 : vector<1x1x128xf32> to vector<1x128xf32>
    %c0_30 = arith.constant 0 : index
    %c0_31 = arith.constant 0 : index
    %c0_32 = arith.constant 0 : index
    %23 = vector.load %arg17[%c0_30, %c0_31, %c0_32] : memref<1x1x256xf32, #tpu.memory_space<vmem>>, vector<1x1x256xf32>
    %24 = vector.shape_cast %23 : vector<1x1x256xf32> to vector<1x256xf32>
    %c0_33 = arith.constant 0 : index
    %c0_34 = arith.constant 0 : index
    %c0_35 = arith.constant 0 : index
    %25 = vector.load %arg19[%c0_33, %c0_34, %c0_35] : memref<1x1x128xf32, #tpu.memory_space<vmem>>, vector<1x1x128xf32>
    %26 = vector.shape_cast %25 : vector<1x1x128xf32> to vector<1x128xf32>
    %c0_36 = arith.constant 0 : index
    %c0_37 = arith.constant 0 : index
    %c0_38 = arith.constant 0 : index
    %27 = vector.load %arg4[%c0_36, %c0_37, %c0_38] : memref<1x1x128xf32, #tpu.memory_space<vmem>>, vector<1x1x128xf32>
    %28 = vector.shape_cast %27 : vector<1x1x128xf32> to vector<1x128xf32>
    %c0_39 = arith.constant 0 : index
    %c0_40 = arith.constant 0 : index
    %c0_41 = arith.constant 0 : index
    %29 = vector.load %arg5[%c0_39, %c0_40, %c0_41] : memref<1x1x128xf32, #tpu.memory_space<vmem>>, vector<1x1x128xf32>
    %30 = vector.shape_cast %29 : vector<1x1x128xf32> to vector<1x128xf32>
    %c0_42 = arith.constant 0 : index
    %c0_43 = arith.constant 0 : index
    %c0_44 = arith.constant 0 : index
    %31 = vector.load %arg14[%c0_42, %c0_43, %c0_44] : memref<1x1x128xf32, #tpu.memory_space<vmem>>, vector<1x1x128xf32>
    %32 = vector.shape_cast %31 : vector<1x1x128xf32> to vector<1x128xf32>
    %c0_45 = arith.constant 0 : index
    %c0_46 = arith.constant 0 : index
    %c0_47 = arith.constant 0 : index
    %33 = vector.load %arg15[%c0_45, %c0_46, %c0_47] : memref<1x1x128xf32, #tpu.memory_space<vmem>>, vector<1x1x128xf32>
    %34 = vector.shape_cast %33 : vector<1x1x128xf32> to vector<1x128xf32>
    %c0_48 = arith.constant 0 : index
    %c0_49 = arith.constant 0 : index
    %c0_50 = arith.constant 0 : index
    %35 = vector.load %arg22[%c0_48, %c0_49, %c0_50] : memref<2x8x128xf32, #tpu.memory_space<vmem>>, vector<1x8x128xf32>
    %36 = vector.shape_cast %35 : vector<1x8x128xf32> to vector<8x128xf32>
    %c0_51 = arith.constant 0 : index
    %c0_52 = arith.constant 0 : index
    %c0_53 = arith.constant 0 : index
    %37 = vector.load %arg3[%c0_51, %c0_52, %c0_53] : memref<2x1x8xf32, #tpu.memory_space<vmem>>, vector<1x1x8xf32>
    %38 = vector.shape_cast %37 : vector<1x1x8xf32> to vector<1x8xf32>
    %cst = arith.constant 0.000000e+00 : f32
    %39 = vector.broadcast %cst : f32 to vector<1x8xf32>
    %40 = arith.cmpf oeq, %38, %39 : vector<1x8xf32>
    %cst_54 = arith.constant -1.000000e+09 : f32
    %cst_55 = arith.constant 0.000000e+00 : f32
    %41 = vector.broadcast %cst_54 : f32 to vector<1x8xf32>
    %42 = vector.broadcast %cst_55 : f32 to vector<1x8xf32>
    %43 = arith.select %40, %41, %42 : vector<1x8xi1>, vector<1x8xf32>
    %cst_56 = arith.constant dense<0.000000e+00> : vector<8xf32>
    %44 = vector.multi_reduction <add>, %36, %cst_56 [1] : vector<8x128xf32> to vector<8xf32>
    %45 = vector.shape_cast %44 : vector<8xf32> to vector<8x1xf32>
    %cst_57 = arith.constant 1.280000e+02 : f32
    %46 = vector.broadcast %cst_57 : f32 to vector<8x1xf32>
    %47 = arith.divf %45, %46 : vector<8x1xf32>
    %48 = vector.broadcast %47 : vector<8x1xf32> to vector<8x128xf32>
    %49 = arith.subf %36, %48 : vector<8x128xf32>
    %50 = arith.mulf %49, %49 : vector<8x128xf32>
    %cst_58 = arith.constant dense<0.000000e+00> : vector<8xf32>
    %51 = vector.multi_reduction <add>, %50, %cst_58 [1] : vector<8x128xf32> to vector<8xf32>
    %52 = vector.shape_cast %51 : vector<8xf32> to vector<8x1xf32>
    %cst_59 = arith.constant 0.00787401571 : f32
    %53 = vector.broadcast %cst_59 : f32 to vector<8x1xf32>
    %54 = arith.mulf %52, %53 : vector<8x1xf32>
    %55 = math.sqrt %54 : vector<8x1xf32>
    %cst_60 = arith.constant 9.99999997E-7 : f32
    %56 = vector.broadcast %cst_60 : f32 to vector<8x1xf32>
    %57 = arith.addf %55, %56 : vector<8x1xf32>
    %cst_61 = arith.constant 1.000000e+00 : f32
    %58 = vector.broadcast %cst_61 : f32 to vector<8x1xf32>
    %59 = arith.divf %58, %57 : vector<8x1xf32>
    %60 = vector.broadcast %47 : vector<8x1xf32> to vector<8x128xf32>
    %61 = arith.subf %36, %60 : vector<8x128xf32>
    %62 = vector.broadcast %28 : vector<1x128xf32> to vector<8x128xf32>
    %63 = arith.mulf %62, %61 : vector<8x128xf32>
    %64 = vector.broadcast %59 : vector<8x1xf32> to vector<8x128xf32>
    %65 = arith.mulf %63, %64 : vector<8x128xf32>
    %66 = vector.broadcast %30 : vector<1x128xf32> to vector<8x128xf32>
    %67 = arith.addf %65, %66 : vector<8x128xf32>
    %68 = arith.truncf %67 : vector<8x128xf32> to vector<8x128xbf16>
    %cst_62 = arith.constant dense<0.000000e+00> : vector<8x128xf32>
    %69 = tpu.matmul %68, %4, %cst_62 {dimension_numbers = #tpu.dot_dimension_numbers<[1], [0], [0], [1], [0, 0, 1, 1], [], []>} : vector<8x128xbf16>, vector<128x128xbf16>, vector<8x128xf32> -> vector<8x128xf32>
    %70 = vector.broadcast %16 : vector<1x128xf32> to vector<8x128xf32>
    %71 = arith.addf %69, %70 : vector<8x128xf32>
    %cst_63 = arith.constant dense<0.000000e+00> : vector<8x128xf32>
    %72 = tpu.matmul %68, %6, %cst_63 {dimension_numbers = #tpu.dot_dimension_numbers<[1], [0], [0], [1], [0, 0, 1, 1], [], []>} : vector<8x128xbf16>, vector<128x128xbf16>, vector<8x128xf32> -> vector<8x128xf32>
    %73 = vector.broadcast %18 : vector<1x128xf32> to vector<8x128xf32>
    %74 = arith.addf %72, %73 : vector<8x128xf32>
    %cst_64 = arith.constant dense<0.000000e+00> : vector<8x128xf32>
    %75 = tpu.matmul %68, %8, %cst_64 {dimension_numbers = #tpu.dot_dimension_numbers<[1], [0], [0], [1], [0, 0, 1, 1], [], []>} : vector<8x128xbf16>, vector<128x128xbf16>, vector<8x128xf32> -> vector<8x128xf32>
    %76 = vector.broadcast %20 : vector<1x128xf32> to vector<8x128xf32>
    %77 = arith.addf %75, %76 : vector<8x128xf32>
    %78 = arith.truncf %71 : vector<8x128xf32> to vector<8x128xbf16>
    %79 = arith.truncf %77 : vector<8x128xf32> to vector<8x128xbf16>
    %80 = arith.truncf %74 : vector<8x128xf32> to vector<8x128xbf16>
    %81 = tpu.transpose %80, [1, 0] : vector<8x128xbf16> -> vector<128x8xbf16>
    %82 = vector.extract_strided_slice %78 {offsets = [0, 0], sizes = [8, 32], strides = [1, 1]} : vector<8x128xbf16> to vector<8x32xbf16>
    %83 = vector.extract_strided_slice %81 {offsets = [0, 0], sizes = [32, 8], strides = [1, 1]} : vector<128x8xbf16> to vector<32x8xbf16>
    %cst_65 = arith.constant dense<0.000000e+00> : vector<8x8xf32>
    %84 = tpu.matmul %82, %83, %cst_65 {dimension_numbers = #tpu.dot_dimension_numbers<[1], [0], [0], [1], [0, 0, 1, 1], [], []>} : vector<8x32xbf16>, vector<32x8xbf16>, vector<8x8xf32> -> vector<8x8xf32>
    %cst_66 = arith.constant 0.176776692 : f32
    %85 = vector.broadcast %cst_66 : f32 to vector<8x8xf32>
    %86 = arith.mulf %84, %85 : vector<8x8xf32>
    %87 = vector.broadcast %43 : vector<1x8xf32> to vector<8x8xf32>
    %88 = arith.addf %86, %87 : vector<8x8xf32>
    %cst_67 = arith.constant dense<0xFF800000> : vector<8xf32>
    %89 = vector.multi_reduction <maximumf>, %88, %cst_67 [1] : vector<8x8xf32> to vector<8xf32>
    %90 = vector.shape_cast %89 : vector<8xf32> to vector<8x1xf32>
    %91 = vector.broadcast %90 : vector<8x1xf32> to vector<8x8xf32>
    %92 = arith.subf %88, %91 : vector<8x8xf32>
    %93 = math.exp %92 : vector<8x8xf32>
    %cst_68 = arith.constant dense<0.000000e+00> : vector<8xf32>
    %94 = vector.multi_reduction <add>, %93, %cst_68 [1] : vector<8x8xf32> to vector<8xf32>
    %95 = vector.shape_cast %94 : vector<8xf32> to vector<8x1xf32>
    %96 = tpu.reciprocal %95 {approx = true} : vector<8x1xf32> -> vector<8x1xf32>
    %97 = vector.broadcast %96 : vector<8x1xf32> to vector<8x8xf32>
    %98 = arith.mulf %93, %97 : vector<8x8xf32>
    %99 = arith.truncf %98 : vector<8x8xf32> to vector<8x8xbf16>
    %100 = vector.extract_strided_slice %79 {offsets = [0, 0], sizes = [8, 32], strides = [1, 1]} : vector<8x128xbf16> to vector<8x32xbf16>
    %cst_69 = arith.constant dense<0.000000e+00> : vector<8x32xf32>
    %101 = tpu.matmul %99, %100, %cst_69 {dimension_numbers = #tpu.dot_dimension_numbers<[1], [0], [0], [1], [0, 0, 1, 1], [], []>} : vector<8x8xbf16>, vector<8x32xbf16>, vector<8x32xf32> -> vector<8x32xf32>
    %c0_70 = arith.constant 0 : index
    %c0_71 = arith.constant 0 : index
    %102 = vector.load %arg23[%c0_70, %c0_71] : memref<8x128xf32, #tpu.memory_space<vmem>>, vector<8x32xf32>
    tpu.vector_store %arg23[%c0_70, %c0_71], %101 {strides = array<i32>} : memref<8x128xf32, #tpu.memory_space<vmem>>, vector<8x32xf32>,
    %103 = vector.extract_strided_slice %78 {offsets = [0, 32], sizes = [8, 32], strides = [1, 1]} : vector<8x128xbf16> to vector<8x32xbf16>
    %104 = vector.extract_strided_slice %81 {offsets = [32, 0], sizes = [32, 8], strides = [1, 1]} : vector<128x8xbf16> to vector<32x8xbf16>
    %cst_72 = arith.constant dense<0.000000e+00> : vector<8x8xf32>
    %105 = tpu.matmul %103, %104, %cst_72 {dimension_numbers = #tpu.dot_dimension_numbers<[1], [0], [0], [1], [0, 0, 1, 1], [], []>} : vector<8x32xbf16>, vector<32x8xbf16>, vector<8x8xf32> -> vector<8x8xf32>
    %cst_73 = arith.constant 0.176776692 : f32
    %106 = vector.broadcast %cst_73 : f32 to vector<8x8xf32>
    %107 = arith.mulf %105, %106 : vector<8x8xf32>
    %108 = vector.broadcast %43 : vector<1x8xf32> to vector<8x8xf32>
    %109 = arith.addf %107, %108 : vector<8x8xf32>
    %cst_74 = arith.constant dense<0xFF800000> : vector<8xf32>
    %110 = vector.multi_reduction <maximumf>, %109, %cst_74 [1] : vector<8x8xf32> to vector<8xf32>
    %111 = vector.shape_cast %110 : vector<8xf32> to vector<8x1xf32>
    %112 = vector.broadcast %111 : vector<8x1xf32> to vector<8x8xf32>
    %113 = arith.subf %109, %112 : vector<8x8xf32>
    %114 = math.exp %113 : vector<8x8xf32>
    %cst_75 = arith.constant dense<0.000000e+00> : vector<8xf32>
    %115 = vector.multi_reduction <add>, %114, %cst_75 [1] : vector<8x8xf32> to vector<8xf32>
    %116 = vector.shape_cast %115 : vector<8xf32> to vector<8x1xf32>
    %117 = tpu.reciprocal %116 {approx = true} : vector<8x1xf32> -> vector<8x1xf32>
    %118 = vector.broadcast %117 : vector<8x1xf32> to vector<8x8xf32>
    %119 = arith.mulf %114, %118 : vector<8x8xf32>
    %120 = arith.truncf %119 : vector<8x8xf32> to vector<8x8xbf16>
    %121 = vector.extract_strided_slice %79 {offsets = [0, 32], sizes = [8, 32], strides = [1, 1]} : vector<8x128xbf16> to vector<8x32xbf16>
    %cst_76 = arith.constant dense<0.000000e+00> : vector<8x32xf32>
    %122 = tpu.matmul %120, %121, %cst_76 {dimension_numbers = #tpu.dot_dimension_numbers<[1], [0], [0], [1], [0, 0, 1, 1], [], []>} : vector<8x8xbf16>, vector<8x32xbf16>, vector<8x32xf32> -> vector<8x32xf32>
    %c0_77 = arith.constant 0 : index
    %c32 = arith.constant 32 : index
    %123 = vector.load %arg23[%c0_77, %c32] : memref<8x128xf32, #tpu.memory_space<vmem>>, vector<8x32xf32>
    tpu.vector_store %arg23[%c0_77, %c32], %122 {strides = array<i32>} : memref<8x128xf32, #tpu.memory_space<vmem>>, vector<8x32xf32>,
    %124 = vector.extract_strided_slice %78 {offsets = [0, 64], sizes = [8, 32], strides = [1, 1]} : vector<8x128xbf16> to vector<8x32xbf16>
    %125 = vector.extract_strided_slice %81 {offsets = [64, 0], sizes = [32, 8], strides = [1, 1]} : vector<128x8xbf16> to vector<32x8xbf16>
    %cst_78 = arith.constant dense<0.000000e+00> : vector<8x8xf32>
    %126 = tpu.matmul %124, %125, %cst_78 {dimension_numbers = #tpu.dot_dimension_numbers<[1], [0], [0], [1], [0, 0, 1, 1], [], []>} : vector<8x32xbf16>, vector<32x8xbf16>, vector<8x8xf32> -> vector<8x8xf32>
    %cst_79 = arith.constant 0.176776692 : f32
    %127 = vector.broadcast %cst_79 : f32 to vector<8x8xf32>
    %128 = arith.mulf %126, %127 : vector<8x8xf32>
    %129 = vector.broadcast %43 : vector<1x8xf32> to vector<8x8xf32>
    %130 = arith.addf %128, %129 : vector<8x8xf32>
    %cst_80 = arith.constant dense<0xFF800000> : vector<8xf32>
    %131 = vector.multi_reduction <maximumf>, %130, %cst_80 [1] : vector<8x8xf32> to vector<8xf32>
    %132 = vector.shape_cast %131 : vector<8xf32> to vector<8x1xf32>
    %133 = vector.broadcast %132 : vector<8x1xf32> to vector<8x8xf32>
    %134 = arith.subf %130, %133 : vector<8x8xf32>
    %135 = math.exp %134 : vector<8x8xf32>
    %cst_81 = arith.constant dense<0.000000e+00> : vector<8xf32>
    %136 = vector.multi_reduction <add>, %135, %cst_81 [1] : vector<8x8xf32> to vector<8xf32>
    %137 = vector.shape_cast %136 : vector<8xf32> to vector<8x1xf32>
    %138 = tpu.reciprocal %137 {approx = true} : vector<8x1xf32> -> vector<8x1xf32>
    %139 = vector.broadcast %138 : vector<8x1xf32> to vector<8x8xf32>
    %140 = arith.mulf %135, %139 : vector<8x8xf32>
    %141 = arith.truncf %140 : vector<8x8xf32> to vector<8x8xbf16>
    %142 = vector.extract_strided_slice %79 {offsets = [0, 64], sizes = [8, 32], strides = [1, 1]} : vector<8x128xbf16> to vector<8x32xbf16>
    %cst_82 = arith.constant dense<0.000000e+00> : vector<8x32xf32>
    %143 = tpu.matmul %141, %142, %cst_82 {dimension_numbers = #tpu.dot_dimension_numbers<[1], [0], [0], [1], [0, 0, 1, 1], [], []>} : vector<8x8xbf16>, vector<8x32xbf16>, vector<8x32xf32> -> vector<8x32xf32>
    %c0_83 = arith.constant 0 : index
    %c64 = arith.constant 64 : index
    %144 = vector.load %arg23[%c0_83, %c64] : memref<8x128xf32, #tpu.memory_space<vmem>>, vector<8x32xf32>
    tpu.vector_store %arg23[%c0_83, %c64], %143 {strides = array<i32>} : memref<8x128xf32, #tpu.memory_space<vmem>>, vector<8x32xf32>,
    %145 = vector.extract_strided_slice %78 {offsets = [0, 96], sizes = [8, 32], strides = [1, 1]} : vector<8x128xbf16> to vector<8x32xbf16>
    %146 = vector.extract_strided_slice %81 {offsets = [96, 0], sizes = [32, 8], strides = [1, 1]} : vector<128x8xbf16> to vector<32x8xbf16>
    %cst_84 = arith.constant dense<0.000000e+00> : vector<8x8xf32>
    %147 = tpu.matmul %145, %146, %cst_84 {dimension_numbers = #tpu.dot_dimension_numbers<[1], [0], [0], [1], [0, 0, 1, 1], [], []>} : vector<8x32xbf16>, vector<32x8xbf16>, vector<8x8xf32> -> vector<8x8xf32>
    %cst_85 = arith.constant 0.176776692 : f32
    %148 = vector.broadcast %cst_85 : f32 to vector<8x8xf32>
    %149 = arith.mulf %147, %148 : vector<8x8xf32>
    %150 = vector.broadcast %43 : vector<1x8xf32> to vector<8x8xf32>
    %151 = arith.addf %149, %150 : vector<8x8xf32>
    %cst_86 = arith.constant dense<0xFF800000> : vector<8xf32>
    %152 = vector.multi_reduction <maximumf>, %151, %cst_86 [1] : vector<8x8xf32> to vector<8xf32>
    %153 = vector.shape_cast %152 : vector<8xf32> to vector<8x1xf32>
    %154 = vector.broadcast %153 : vector<8x1xf32> to vector<8x8xf32>
    %155 = arith.subf %151, %154 : vector<8x8xf32>
    %156 = math.exp %155 : vector<8x8xf32>
    %cst_87 = arith.constant dense<0.000000e+00> : vector<8xf32>
    %157 = vector.multi_reduction <add>, %156, %cst_87 [1] : vector<8x8xf32> to vector<8xf32>
    %158 = vector.shape_cast %157 : vector<8xf32> to vector<8x1xf32>
    %159 = tpu.reciprocal %158 {approx = true} : vector<8x1xf32> -> vector<8x1xf32>
    %160 = vector.broadcast %159 : vector<8x1xf32> to vector<8x8xf32>
    %161 = arith.mulf %156, %160 : vector<8x8xf32>
    %162 = arith.truncf %161 : vector<8x8xf32> to vector<8x8xbf16>
    %163 = vector.extract_strided_slice %79 {offsets = [0, 96], sizes = [8, 32], strides = [1, 1]} : vector<8x128xbf16> to vector<8x32xbf16>
    %cst_88 = arith.constant dense<0.000000e+00> : vector<8x32xf32>
    %164 = tpu.matmul %162, %163, %cst_88 {dimension_numbers = #tpu.dot_dimension_numbers<[1], [0], [0], [1], [0, 0, 1, 1], [], []>} : vector<8x8xbf16>, vector<8x32xbf16>, vector<8x32xf32> -> vector<8x32xf32>
    %c0_89 = arith.constant 0 : index
    %c96 = arith.constant 96 : index
    %165 = vector.load %arg23[%c0_89, %c96] : memref<8x128xf32, #tpu.memory_space<vmem>>, vector<8x32xf32>
    tpu.vector_store %arg23[%c0_89, %c96], %164 {strides = array<i32>} : memref<8x128xf32, #tpu.memory_space<vmem>>, vector<8x32xf32>,
    %c0_90 = arith.constant 0 : index
    %c0_91 = arith.constant 0 : index
    %166 = vector.load %arg23[%c0_90, %c0_91] : memref<8x128xf32, #tpu.memory_space<vmem>>, vector<8x128xf32>
    %167 = arith.truncf %166 : vector<8x128xf32> to vector<8x128xbf16>
    %cst_92 = arith.constant dense<0.000000e+00> : vector<8x128xf32>
    %168 = tpu.matmul %167, %10, %cst_92 {dimension_numbers = #tpu.dot_dimension_numbers<[1], [0], [0], [1], [0, 0, 1, 1], [], []>} : vector<8x128xbf16>, vector<128x128xbf16>, vector<8x128xf32> -> vector<8x128xf32>
    %169 = vector.broadcast %22 : vector<1x128xf32> to vector<8x128xf32>
    %170 = arith.addf %168, %169 : vector<8x128xf32>
    %171 = arith.addf %36, %170 : vector<8x128xf32>
    %cst_93 = arith.constant dense<0.000000e+00> : vector<8xf32>
    %172 = vector.multi_reduction <add>, %171, %cst_93 [1] : vector<8x128xf32> to vector<8xf32>
    %173 = vector.shape_cast %172 : vector<8xf32> to vector<8x1xf32>
    %cst_94 = arith.constant 1.280000e+02 : f32
    %174 = vector.broadcast %cst_94 : f32 to vector<8x1xf32>
    %175 = arith.divf %173, %174 : vector<8x1xf32>
    %176 = vector.broadcast %175 : vector<8x1xf32> to vector<8x128xf32>
    %177 = arith.subf %171, %176 : vector<8x128xf32>
    %178 = arith.mulf %177, %177 : vector<8x128xf32>
    %cst_95 = arith.constant dense<0.000000e+00> : vector<8xf32>
    %179 = vector.multi_reduction <add>, %178, %cst_95 [1] : vector<8x128xf32> to vector<8xf32>
    %180 = vector.shape_cast %179 : vector<8xf32> to vector<8x1xf32>
    %cst_96 = arith.constant 0.00787401571 : f32
    %181 = vector.broadcast %cst_96 : f32 to vector<8x1xf32>
    %182 = arith.mulf %180, %181 : vector<8x1xf32>
    %183 = math.sqrt %182 : vector<8x1xf32>
    %cst_97 = arith.constant 9.99999997E-7 : f32
    %184 = vector.broadcast %cst_97 : f32 to vector<8x1xf32>
    %185 = arith.addf %183, %184 : vector<8x1xf32>
    %cst_98 = arith.constant 1.000000e+00 : f32
    %186 = vector.broadcast %cst_98 : f32 to vector<8x1xf32>
    %187 = arith.divf %186, %185 : vector<8x1xf32>
    %188 = vector.broadcast %175 : vector<8x1xf32> to vector<8x128xf32>
    %189 = arith.subf %171, %188 : vector<8x128xf32>
    %190 = vector.broadcast %32 : vector<1x128xf32> to vector<8x128xf32>
    %191 = arith.mulf %190, %189 : vector<8x128xf32>
    %192 = vector.broadcast %187 : vector<8x1xf32> to vector<8x128xf32>
    %193 = arith.mulf %191, %192 : vector<8x128xf32>
    %194 = vector.broadcast %34 : vector<1x128xf32> to vector<8x128xf32>
    %195 = arith.addf %193, %194 : vector<8x128xf32>
    %196 = arith.truncf %195 : vector<8x128xf32> to vector<8x128xbf16>
    %cst_99 = arith.constant dense<0.000000e+00> : vector<8x256xf32>
    %197 = tpu.matmul %196, %12, %cst_99 {dimension_numbers = #tpu.dot_dimension_numbers<[1], [0], [0], [1], [0, 0, 1, 1], [], []>} : vector<8x128xbf16>, vector<128x256xbf16>, vector<8x256xf32> -> vector<8x256xf32>
    %198 = vector.broadcast %24 : vector<1x256xf32> to vector<8x256xf32>
    %199 = arith.addf %197, %198 : vector<8x256xf32>
    %cst_100 = arith.constant 0.000000e+00 : f32
    %200 = vector.broadcast %cst_100 : f32 to vector<8x256xf32>
    %201 = arith.maximumf %199, %200 : vector<8x256xf32>
    %202 = arith.truncf %201 : vector<8x256xf32> to vector<8x256xbf16>
    %cst_101 = arith.constant dense<0.000000e+00> : vector<8x128xf32>
    %203 = tpu.matmul %202, %14, %cst_101 {dimension_numbers = #tpu.dot_dimension_numbers<[1], [0], [0], [1], [0, 0, 1, 1], [], []>} : vector<8x256xbf16>, vector<256x128xbf16>, vector<8x128xf32> -> vector<8x128xf32>
    %204 = vector.broadcast %26 : vector<1x128xf32> to vector<8x128xf32>
    %205 = arith.addf %203, %204 : vector<8x128xf32>
    %206 = arith.addf %171, %205 : vector<8x128xf32>
    %c1_i32 = arith.constant 1 : i32
    %207 = arith.cmpi slt, %arg1, %c1_i32 : i32
    %208 = arith.extui %207 : i1 to i32
    %c0_i32_102 = arith.constant 0 : i32
    %209 = arith.cmpi ne, %208, %c0_i32_102 : i32
    scf.if %209 {
      %c0_166 = arith.constant 0 : index
      %c0_167 = arith.constant 0 : index
      %c0_168 = arith.constant 0 : index
      %391 = vector.load %arg22[%c0_166, %c0_167, %c0_168] : memref<2x8x128xf32, #tpu.memory_space<vmem>>, vector<1x8x128xf32>
      %392 = vector.shape_cast %391 : vector<1x8x128xf32> to vector<8x128xf32>
      %393 = vector.shape_cast %206 : vector<8x128xf32> to vector<1x8x128xf32>
      tpu.vector_store %arg22[%c0_166, %c0_167, %c0_168], %393 {strides = array<i32>} : memref<2x8x128xf32, #tpu.memory_space<vmem>>, vector<1x8x128xf32>,
    } else {
    }
    %c1_i32_103 = arith.constant 1 : i32
    %210 = arith.cmpi eq, %arg1, %c1_i32_103 : i32
    %211 = arith.extui %210 : i1 to i32
    %c0_i32_104 = arith.constant 0 : i32
    %212 = arith.cmpi ne, %211, %c0_i32_104 : i32
    scf.if %212 {
      %c0_166 = arith.constant 0 : index
      %c0_167 = arith.constant 0 : index
      %391 = vector.load %arg20[%c0_166, %c0_167] : memref<1x128xf32, #tpu.memory_space<vmem>>, vector<1x128xf32>
      %c0_168 = arith.constant 0 : index
      %c0_169 = arith.constant 0 : index
      %392 = vector.load %arg21[%c0_168, %c0_169] : memref<1x128xf32, #tpu.memory_space<vmem>>, vector<1x128xf32>
      %cst_170 = arith.constant dense<0.000000e+00> : vector<8xf32>
      %393 = vector.multi_reduction <add>, %206, %cst_170 [1] : vector<8x128xf32> to vector<8xf32>
      %394 = vector.shape_cast %393 : vector<8xf32> to vector<8x1xf32>
      %cst_171 = arith.constant 1.280000e+02 : f32
      %395 = vector.broadcast %cst_171 : f32 to vector<8x1xf32>
      %396 = arith.divf %394, %395 : vector<8x1xf32>
      %397 = vector.broadcast %396 : vector<8x1xf32> to vector<8x128xf32>
      %398 = arith.subf %206, %397 : vector<8x128xf32>
      %399 = arith.mulf %398, %398 : vector<8x128xf32>
      %cst_172 = arith.constant dense<0.000000e+00> : vector<8xf32>
      %400 = vector.multi_reduction <add>, %399, %cst_172 [1] : vector<8x128xf32> to vector<8xf32>
      %401 = vector.shape_cast %400 : vector<8xf32> to vector<8x1xf32>
      %cst_173 = arith.constant 0.00787401571 : f32
      %402 = vector.broadcast %cst_173 : f32 to vector<8x1xf32>
      %403 = arith.mulf %401, %402 : vector<8x1xf32>
      %404 = math.sqrt %403 : vector<8x1xf32>
      %cst_174 = arith.constant 9.99999997E-7 : f32
      %405 = vector.broadcast %cst_174 : f32 to vector<8x1xf32>
      %406 = arith.addf %404, %405 : vector<8x1xf32>
      %cst_175 = arith.constant 1.000000e+00 : f32
      %407 = vector.broadcast %cst_175 : f32 to vector<8x1xf32>
      %408 = arith.divf %407, %406 : vector<8x1xf32>
      %409 = vector.broadcast %396 : vector<8x1xf32> to vector<8x128xf32>
      %410 = arith.subf %206, %409 : vector<8x128xf32>
      %411 = vector.broadcast %391 : vector<1x128xf32> to vector<8x128xf32>
      %412 = arith.mulf %411, %410 : vector<8x128xf32>
      %413 = vector.broadcast %408 : vector<8x1xf32> to vector<8x128xf32>
      %414 = arith.mulf %412, %413 : vector<8x128xf32>
      %415 = vector.broadcast %392 : vector<1x128xf32> to vector<8x128xf32>
      %416 = arith.addf %414, %415 : vector<8x128xf32>
      %c0_176 = arith.constant 0 : index
      %c0_177 = arith.constant 0 : index
      %c0_178 = arith.constant 0 : index
      %417 = vector.load %arg22[%c0_176, %c0_177, %c0_178] : memref<2x8x128xf32, #tpu.memory_space<vmem>>, vector<1x8x128xf32>
      %418 = vector.shape_cast %417 : vector<1x8x128xf32> to vector<8x128xf32>
      %419 = vector.shape_cast %416 : vector<8x128xf32> to vector<1x8x128xf32>
      tpu.vector_store %arg22[%c0_176, %c0_177, %c0_178], %419 {strides = array<i32>} : memref<2x8x128xf32, #tpu.memory_space<vmem>>, vector<1x8x128xf32>,
    } else {
    }
    %c1 = arith.constant 1 : index
    %c0_105 = arith.constant 0 : index
    %c0_106 = arith.constant 0 : index
    %213 = vector.load %arg22[%c1, %c0_105, %c0_106] : memref<2x8x128xf32, #tpu.memory_space<vmem>>, vector<1x8x128xf32>
    %214 = vector.shape_cast %213 : vector<1x8x128xf32> to vector<8x128xf32>
    %c1_107 = arith.constant 1 : index
    %c0_108 = arith.constant 0 : index
    %c0_109 = arith.constant 0 : index
    %215 = vector.load %arg3[%c1_107, %c0_108, %c0_109] : memref<2x1x8xf32, #tpu.memory_space<vmem>>, vector<1x1x8xf32>
    %216 = vector.shape_cast %215 : vector<1x1x8xf32> to vector<1x8xf32>
    %cst_110 = arith.constant 0.000000e+00 : f32
    %217 = vector.broadcast %cst_110 : f32 to vector<1x8xf32>
    %218 = arith.cmpf oeq, %216, %217 : vector<1x8xf32>
    %cst_111 = arith.constant -1.000000e+09 : f32
    %cst_112 = arith.constant 0.000000e+00 : f32
    %219 = vector.broadcast %cst_111 : f32 to vector<1x8xf32>
    %220 = vector.broadcast %cst_112 : f32 to vector<1x8xf32>
    %221 = arith.select %218, %219, %220 : vector<1x8xi1>, vector<1x8xf32>
    %cst_113 = arith.constant dense<0.000000e+00> : vector<8xf32>
    %222 = vector.multi_reduction <add>, %214, %cst_113 [1] : vector<8x128xf32> to vector<8xf32>
    %223 = vector.shape_cast %222 : vector<8xf32> to vector<8x1xf32>
    %cst_114 = arith.constant 1.280000e+02 : f32
    %224 = vector.broadcast %cst_114 : f32 to vector<8x1xf32>
    %225 = arith.divf %223, %224 : vector<8x1xf32>
    %226 = vector.broadcast %225 : vector<8x1xf32> to vector<8x128xf32>
    %227 = arith.subf %214, %226 : vector<8x128xf32>
    %228 = arith.mulf %227, %227 : vector<8x128xf32>
    %cst_115 = arith.constant dense<0.000000e+00> : vector<8xf32>
    %229 = vector.multi_reduction <add>, %228, %cst_115 [1] : vector<8x128xf32> to vector<8xf32>
    %230 = vector.shape_cast %229 : vector<8xf32> to vector<8x1xf32>
    %cst_116 = arith.constant 0.00787401571 : f32
    %231 = vector.broadcast %cst_116 : f32 to vector<8x1xf32>
    %232 = arith.mulf %230, %231 : vector<8x1xf32>
    %233 = math.sqrt %232 : vector<8x1xf32>
    %cst_117 = arith.constant 9.99999997E-7 : f32
    %234 = vector.broadcast %cst_117 : f32 to vector<8x1xf32>
    %235 = arith.addf %233, %234 : vector<8x1xf32>
    %cst_118 = arith.constant 1.000000e+00 : f32
    %236 = vector.broadcast %cst_118 : f32 to vector<8x1xf32>
    %237 = arith.divf %236, %235 : vector<8x1xf32>
    %238 = vector.broadcast %225 : vector<8x1xf32> to vector<8x128xf32>
    %239 = arith.subf %214, %238 : vector<8x128xf32>
    %240 = vector.broadcast %28 : vector<1x128xf32> to vector<8x128xf32>
    %241 = arith.mulf %240, %239 : vector<8x128xf32>
    %242 = vector.broadcast %237 : vector<8x1xf32> to vector<8x128xf32>
    %243 = arith.mulf %241, %242 : vector<8x128xf32>
    %244 = vector.broadcast %30 : vector<1x128xf32> to vector<8x128xf32>
    %245 = arith.addf %243, %244 : vector<8x128xf32>
    %246 = arith.truncf %245 : vector<8x128xf32> to vector<8x128xbf16>
    %cst_119 = arith.constant dense<0.000000e+00> : vector<8x128xf32>
    %247 = tpu.matmul %246, %4, %cst_119 {dimension_numbers = #tpu.dot_dimension_numbers<[1], [0], [0], [1], [0, 0, 1, 1], [], []>} : vector<8x128xbf16>, vector<128x128xbf16>, vector<8x128xf32> -> vector<8x128xf32>
    %248 = vector.broadcast %16 : vector<1x128xf32> to vector<8x128xf32>
    %249 = arith.addf %247, %248 : vector<8x128xf32>
    %cst_120 = arith.constant dense<0.000000e+00> : vector<8x128xf32>
    %250 = tpu.matmul %246, %6, %cst_120 {dimension_numbers = #tpu.dot_dimension_numbers<[1], [0], [0], [1], [0, 0, 1, 1], [], []>} : vector<8x128xbf16>, vector<128x128xbf16>, vector<8x128xf32> -> vector<8x128xf32>
    %251 = vector.broadcast %18 : vector<1x128xf32> to vector<8x128xf32>
    %252 = arith.addf %250, %251 : vector<8x128xf32>
    %cst_121 = arith.constant dense<0.000000e+00> : vector<8x128xf32>
    %253 = tpu.matmul %246, %8, %cst_121 {dimension_numbers = #tpu.dot_dimension_numbers<[1], [0], [0], [1], [0, 0, 1, 1], [], []>} : vector<8x128xbf16>, vector<128x128xbf16>, vector<8x128xf32> -> vector<8x128xf32>
    %254 = vector.broadcast %20 : vector<1x128xf32> to vector<8x128xf32>
    %255 = arith.addf %253, %254 : vector<8x128xf32>
    %256 = arith.truncf %249 : vector<8x128xf32> to vector<8x128xbf16>
    %257 = arith.truncf %255 : vector<8x128xf32> to vector<8x128xbf16>
    %258 = arith.truncf %252 : vector<8x128xf32> to vector<8x128xbf16>
    %259 = tpu.transpose %258, [1, 0] : vector<8x128xbf16> -> vector<128x8xbf16>
    %260 = vector.extract_strided_slice %256 {offsets = [0, 0], sizes = [8, 32], strides = [1, 1]} : vector<8x128xbf16> to vector<8x32xbf16>
    %261 = vector.extract_strided_slice %259 {offsets = [0, 0], sizes = [32, 8], strides = [1, 1]} : vector<128x8xbf16> to vector<32x8xbf16>
    %cst_122 = arith.constant dense<0.000000e+00> : vector<8x8xf32>
    %262 = tpu.matmul %260, %261, %cst_122 {dimension_numbers = #tpu.dot_dimension_numbers<[1], [0], [0], [1], [0, 0, 1, 1], [], []>} : vector<8x32xbf16>, vector<32x8xbf16>, vector<8x8xf32> -> vector<8x8xf32>
    %cst_123 = arith.constant 0.176776692 : f32
    %263 = vector.broadcast %cst_123 : f32 to vector<8x8xf32>
    %264 = arith.mulf %262, %263 : vector<8x8xf32>
    %265 = vector.broadcast %221 : vector<1x8xf32> to vector<8x8xf32>
    %266 = arith.addf %264, %265 : vector<8x8xf32>
    %cst_124 = arith.constant dense<0xFF800000> : vector<8xf32>
    %267 = vector.multi_reduction <maximumf>, %266, %cst_124 [1] : vector<8x8xf32> to vector<8xf32>
    %268 = vector.shape_cast %267 : vector<8xf32> to vector<8x1xf32>
    %269 = vector.broadcast %268 : vector<8x1xf32> to vector<8x8xf32>
    %270 = arith.subf %266, %269 : vector<8x8xf32>
    %271 = math.exp %270 : vector<8x8xf32>
    %cst_125 = arith.constant dense<0.000000e+00> : vector<8xf32>
    %272 = vector.multi_reduction <add>, %271, %cst_125 [1] : vector<8x8xf32> to vector<8xf32>
    %273 = vector.shape_cast %272 : vector<8xf32> to vector<8x1xf32>
    %274 = tpu.reciprocal %273 {approx = true} : vector<8x1xf32> -> vector<8x1xf32>
    %275 = vector.broadcast %274 : vector<8x1xf32> to vector<8x8xf32>
    %276 = arith.mulf %271, %275 : vector<8x8xf32>
    %277 = arith.truncf %276 : vector<8x8xf32> to vector<8x8xbf16>
    %278 = vector.extract_strided_slice %257 {offsets = [0, 0], sizes = [8, 32], strides = [1, 1]} : vector<8x128xbf16> to vector<8x32xbf16>
    %cst_126 = arith.constant dense<0.000000e+00> : vector<8x32xf32>
    %279 = tpu.matmul %277, %278, %cst_126 {dimension_numbers = #tpu.dot_dimension_numbers<[1], [0], [0], [1], [0, 0, 1, 1], [], []>} : vector<8x8xbf16>, vector<8x32xbf16>, vector<8x32xf32> -> vector<8x32xf32>
    %c0_127 = arith.constant 0 : index
    %c0_128 = arith.constant 0 : index
    %280 = vector.load %arg23[%c0_127, %c0_128] : memref<8x128xf32, #tpu.memory_space<vmem>>, vector<8x32xf32>
    tpu.vector_store %arg23[%c0_127, %c0_128], %279 {strides = array<i32>} : memref<8x128xf32, #tpu.memory_space<vmem>>, vector<8x32xf32>,
    %281 = vector.extract_strided_slice %256 {offsets = [0, 32], sizes = [8, 32], strides = [1, 1]} : vector<8x128xbf16> to vector<8x32xbf16>
    %282 = vector.extract_strided_slice %259 {offsets = [32, 0], sizes = [32, 8], strides = [1, 1]} : vector<128x8xbf16> to vector<32x8xbf16>
    %cst_129 = arith.constant dense<0.000000e+00> : vector<8x8xf32>
    %283 = tpu.matmul %281, %282, %cst_129 {dimension_numbers = #tpu.dot_dimension_numbers<[1], [0], [0], [1], [0, 0, 1, 1], [], []>} : vector<8x32xbf16>, vector<32x8xbf16>, vector<8x8xf32> -> vector<8x8xf32>
    %cst_130 = arith.constant 0.176776692 : f32
    %284 = vector.broadcast %cst_130 : f32 to vector<8x8xf32>
    %285 = arith.mulf %283, %284 : vector<8x8xf32>
    %286 = vector.broadcast %221 : vector<1x8xf32> to vector<8x8xf32>
    %287 = arith.addf %285, %286 : vector<8x8xf32>
    %cst_131 = arith.constant dense<0xFF800000> : vector<8xf32>
    %288 = vector.multi_reduction <maximumf>, %287, %cst_131 [1] : vector<8x8xf32> to vector<8xf32>
    %289 = vector.shape_cast %288 : vector<8xf32> to vector<8x1xf32>
    %290 = vector.broadcast %289 : vector<8x1xf32> to vector<8x8xf32>
    %291 = arith.subf %287, %290 : vector<8x8xf32>
    %292 = math.exp %291 : vector<8x8xf32>
    %cst_132 = arith.constant dense<0.000000e+00> : vector<8xf32>
    %293 = vector.multi_reduction <add>, %292, %cst_132 [1] : vector<8x8xf32> to vector<8xf32>
    %294 = vector.shape_cast %293 : vector<8xf32> to vector<8x1xf32>
    %295 = tpu.reciprocal %294 {approx = true} : vector<8x1xf32> -> vector<8x1xf32>
    %296 = vector.broadcast %295 : vector<8x1xf32> to vector<8x8xf32>
    %297 = arith.mulf %292, %296 : vector<8x8xf32>
    %298 = arith.truncf %297 : vector<8x8xf32> to vector<8x8xbf16>
    %299 = vector.extract_strided_slice %257 {offsets = [0, 32], sizes = [8, 32], strides = [1, 1]} : vector<8x128xbf16> to vector<8x32xbf16>
    %cst_133 = arith.constant dense<0.000000e+00> : vector<8x32xf32>
    %300 = tpu.matmul %298, %299, %cst_133 {dimension_numbers = #tpu.dot_dimension_numbers<[1], [0], [0], [1], [0, 0, 1, 1], [], []>} : vector<8x8xbf16>, vector<8x32xbf16>, vector<8x32xf32> -> vector<8x32xf32>
    %c0_134 = arith.constant 0 : index
    %c32_135 = arith.constant 32 : index
    %301 = vector.load %arg23[%c0_134, %c32_135] : memref<8x128xf32, #tpu.memory_space<vmem>>, vector<8x32xf32>
    tpu.vector_store %arg23[%c0_134, %c32_135], %300 {strides = array<i32>} : memref<8x128xf32, #tpu.memory_space<vmem>>, vector<8x32xf32>,
    %302 = vector.extract_strided_slice %256 {offsets = [0, 64], sizes = [8, 32], strides = [1, 1]} : vector<8x128xbf16> to vector<8x32xbf16>
    %303 = vector.extract_strided_slice %259 {offsets = [64, 0], sizes = [32, 8], strides = [1, 1]} : vector<128x8xbf16> to vector<32x8xbf16>
    %cst_136 = arith.constant dense<0.000000e+00> : vector<8x8xf32>
    %304 = tpu.matmul %302, %303, %cst_136 {dimension_numbers = #tpu.dot_dimension_numbers<[1], [0], [0], [1], [0, 0, 1, 1], [], []>} : vector<8x32xbf16>, vector<32x8xbf16>, vector<8x8xf32> -> vector<8x8xf32>
    %cst_137 = arith.constant 0.176776692 : f32
    %305 = vector.broadcast %cst_137 : f32 to vector<8x8xf32>
    %306 = arith.mulf %304, %305 : vector<8x8xf32>
    %307 = vector.broadcast %221 : vector<1x8xf32> to vector<8x8xf32>
    %308 = arith.addf %306, %307 : vector<8x8xf32>
    %cst_138 = arith.constant dense<0xFF800000> : vector<8xf32>
    %309 = vector.multi_reduction <maximumf>, %308, %cst_138 [1] : vector<8x8xf32> to vector<8xf32>
    %310 = vector.shape_cast %309 : vector<8xf32> to vector<8x1xf32>
    %311 = vector.broadcast %310 : vector<8x1xf32> to vector<8x8xf32>
    %312 = arith.subf %308, %311 : vector<8x8xf32>
    %313 = math.exp %312 : vector<8x8xf32>
    %cst_139 = arith.constant dense<0.000000e+00> : vector<8xf32>
    %314 = vector.multi_reduction <add>, %313, %cst_139 [1] : vector<8x8xf32> to vector<8xf32>
    %315 = vector.shape_cast %314 : vector<8xf32> to vector<8x1xf32>
    %316 = tpu.reciprocal %315 {approx = true} : vector<8x1xf32> -> vector<8x1xf32>
    %317 = vector.broadcast %316 : vector<8x1xf32> to vector<8x8xf32>
    %318 = arith.mulf %313, %317 : vector<8x8xf32>
    %319 = arith.truncf %318 : vector<8x8xf32> to vector<8x8xbf16>
    %320 = vector.extract_strided_slice %257 {offsets = [0, 64], sizes = [8, 32], strides = [1, 1]} : vector<8x128xbf16> to vector<8x32xbf16>
    %cst_140 = arith.constant dense<0.000000e+00> : vector<8x32xf32>
    %321 = tpu.matmul %319, %320, %cst_140 {dimension_numbers = #tpu.dot_dimension_numbers<[1], [0], [0], [1], [0, 0, 1, 1], [], []>} : vector<8x8xbf16>, vector<8x32xbf16>, vector<8x32xf32> -> vector<8x32xf32>
    %c0_141 = arith.constant 0 : index
    %c64_142 = arith.constant 64 : index
    %322 = vector.load %arg23[%c0_141, %c64_142] : memref<8x128xf32, #tpu.memory_space<vmem>>, vector<8x32xf32>
    tpu.vector_store %arg23[%c0_141, %c64_142], %321 {strides = array<i32>} : memref<8x128xf32, #tpu.memory_space<vmem>>, vector<8x32xf32>,
    %323 = vector.extract_strided_slice %256 {offsets = [0, 96], sizes = [8, 32], strides = [1, 1]} : vector<8x128xbf16> to vector<8x32xbf16>
    %324 = vector.extract_strided_slice %259 {offsets = [96, 0], sizes = [32, 8], strides = [1, 1]} : vector<128x8xbf16> to vector<32x8xbf16>
    %cst_143 = arith.constant dense<0.000000e+00> : vector<8x8xf32>
    %325 = tpu.matmul %323, %324, %cst_143 {dimension_numbers = #tpu.dot_dimension_numbers<[1], [0], [0], [1], [0, 0, 1, 1], [], []>} : vector<8x32xbf16>, vector<32x8xbf16>, vector<8x8xf32> -> vector<8x8xf32>
    %cst_144 = arith.constant 0.176776692 : f32
    %326 = vector.broadcast %cst_144 : f32 to vector<8x8xf32>
    %327 = arith.mulf %325, %326 : vector<8x8xf32>
    %328 = vector.broadcast %221 : vector<1x8xf32> to vector<8x8xf32>
    %329 = arith.addf %327, %328 : vector<8x8xf32>
    %cst_145 = arith.constant dense<0xFF800000> : vector<8xf32>
    %330 = vector.multi_reduction <maximumf>, %329, %cst_145 [1] : vector<8x8xf32> to vector<8xf32>
    %331 = vector.shape_cast %330 : vector<8xf32> to vector<8x1xf32>
    %332 = vector.broadcast %331 : vector<8x1xf32> to vector<8x8xf32>
    %333 = arith.subf %329, %332 : vector<8x8xf32>
    %334 = math.exp %333 : vector<8x8xf32>
    %cst_146 = arith.constant dense<0.000000e+00> : vector<8xf32>
    %335 = vector.multi_reduction <add>, %334, %cst_146 [1] : vector<8x8xf32> to vector<8xf32>
    %336 = vector.shape_cast %335 : vector<8xf32> to vector<8x1xf32>
    %337 = tpu.reciprocal %336 {approx = true} : vector<8x1xf32> -> vector<8x1xf32>
    %338 = vector.broadcast %337 : vector<8x1xf32> to vector<8x8xf32>
    %339 = arith.mulf %334, %338 : vector<8x8xf32>
    %340 = arith.truncf %339 : vector<8x8xf32> to vector<8x8xbf16>
    %341 = vector.extract_strided_slice %257 {offsets = [0, 96], sizes = [8, 32], strides = [1, 1]} : vector<8x128xbf16> to vector<8x32xbf16>
    %cst_147 = arith.constant dense<0.000000e+00> : vector<8x32xf32>
    %342 = tpu.matmul %340, %341, %cst_147 {dimension_numbers = #tpu.dot_dimension_numbers<[1], [0], [0], [1], [0, 0, 1, 1], [], []>} : vector<8x8xbf16>, vector<8x32xbf16>, vector<8x32xf32> -> vector<8x32xf32>
    %c0_148 = arith.constant 0 : index
    %c96_149 = arith.constant 96 : index
    %343 = vector.load %arg23[%c0_148, %c96_149] : memref<8x128xf32, #tpu.memory_space<vmem>>, vector<8x32xf32>
    tpu.vector_store %arg23[%c0_148, %c96_149], %342 {strides = array<i32>} : memref<8x128xf32, #tpu.memory_space<vmem>>, vector<8x32xf32>,
    %c0_150 = arith.constant 0 : index
    %c0_151 = arith.constant 0 : index
    %344 = vector.load %arg23[%c0_150, %c0_151] : memref<8x128xf32, #tpu.memory_space<vmem>>, vector<8x128xf32>
    %345 = arith.truncf %344 : vector<8x128xf32> to vector<8x128xbf16>
    %cst_152 = arith.constant dense<0.000000e+00> : vector<8x128xf32>
    %346 = tpu.matmul %345, %10, %cst_152 {dimension_numbers = #tpu.dot_dimension_numbers<[1], [0], [0], [1], [0, 0, 1, 1], [], []>} : vector<8x128xbf16>, vector<128x128xbf16>, vector<8x128xf32> -> vector<8x128xf32>
    %347 = vector.broadcast %22 : vector<1x128xf32> to vector<8x128xf32>
    %348 = arith.addf %346, %347 : vector<8x128xf32>
    %349 = arith.addf %214, %348 : vector<8x128xf32>
    %cst_153 = arith.constant dense<0.000000e+00> : vector<8xf32>
    %350 = vector.multi_reduction <add>, %349, %cst_153 [1] : vector<8x128xf32> to vector<8xf32>
    %351 = vector.shape_cast %350 : vector<8xf32> to vector<8x1xf32>
    %cst_154 = arith.constant 1.280000e+02 : f32
    %352 = vector.broadcast %cst_154 : f32 to vector<8x1xf32>
    %353 = arith.divf %351, %352 : vector<8x1xf32>
    %354 = vector.broadcast %353 : vector<8x1xf32> to vector<8x128xf32>
    %355 = arith.subf %349, %354 : vector<8x128xf32>
    %356 = arith.mulf %355, %355 : vector<8x128xf32>
    %cst_155 = arith.constant dense<0.000000e+00> : vector<8xf32>
    %357 = vector.multi_reduction <add>, %356, %cst_155 [1] : vector<8x128xf32> to vector<8xf32>
    %358 = vector.shape_cast %357 : vector<8xf32> to vector<8x1xf32>
    %cst_156 = arith.constant 0.00787401571 : f32
    %359 = vector.broadcast %cst_156 : f32 to vector<8x1xf32>
    %360 = arith.mulf %358, %359 : vector<8x1xf32>
    %361 = math.sqrt %360 : vector<8x1xf32>
    %cst_157 = arith.constant 9.99999997E-7 : f32
    %362 = vector.broadcast %cst_157 : f32 to vector<8x1xf32>
    %363 = arith.addf %361, %362 : vector<8x1xf32>
    %cst_158 = arith.constant 1.000000e+00 : f32
    %364 = vector.broadcast %cst_158 : f32 to vector<8x1xf32>
    %365 = arith.divf %364, %363 : vector<8x1xf32>
    %366 = vector.broadcast %353 : vector<8x1xf32> to vector<8x128xf32>
    %367 = arith.subf %349, %366 : vector<8x128xf32>
    %368 = vector.broadcast %32 : vector<1x128xf32> to vector<8x128xf32>
    %369 = arith.mulf %368, %367 : vector<8x128xf32>
    %370 = vector.broadcast %365 : vector<8x1xf32> to vector<8x128xf32>
    %371 = arith.mulf %369, %370 : vector<8x128xf32>
    %372 = vector.broadcast %34 : vector<1x128xf32> to vector<8x128xf32>
    %373 = arith.addf %371, %372 : vector<8x128xf32>
    %374 = arith.truncf %373 : vector<8x128xf32> to vector<8x128xbf16>
    %cst_159 = arith.constant dense<0.000000e+00> : vector<8x256xf32>
    %375 = tpu.matmul %374, %12, %cst_159 {dimension_numbers = #tpu.dot_dimension_numbers<[1], [0], [0], [1], [0, 0, 1, 1], [], []>} : vector<8x128xbf16>, vector<128x256xbf16>, vector<8x256xf32> -> vector<8x256xf32>
    %376 = vector.broadcast %24 : vector<1x256xf32> to vector<8x256xf32>
    %377 = arith.addf %375, %376 : vector<8x256xf32>
    %cst_160 = arith.constant 0.000000e+00 : f32
    %378 = vector.broadcast %cst_160 : f32 to vector<8x256xf32>
    %379 = arith.maximumf %377, %378 : vector<8x256xf32>
    %380 = arith.truncf %379 : vector<8x256xf32> to vector<8x256xbf16>
    %cst_161 = arith.constant dense<0.000000e+00> : vector<8x128xf32>
    %381 = tpu.matmul %380, %14, %cst_161 {dimension_numbers = #tpu.dot_dimension_numbers<[1], [0], [0], [1], [0, 0, 1, 1], [], []>} : vector<8x256xbf16>, vector<256x128xbf16>, vector<8x128xf32> -> vector<8x128xf32>
    %382 = vector.broadcast %26 : vector<1x128xf32> to vector<8x128xf32>
    %383 = arith.addf %381, %382 : vector<8x128xf32>
    %384 = arith.addf %349, %383 : vector<8x128xf32>
    %c1_i32_162 = arith.constant 1 : i32
    %385 = arith.cmpi slt, %arg1, %c1_i32_162 : i32
    %386 = arith.extui %385 : i1 to i32
    %c0_i32_163 = arith.constant 0 : i32
    %387 = arith.cmpi ne, %386, %c0_i32_163 : i32
    scf.if %387 {
      %c1_166 = arith.constant 1 : index
      %c0_167 = arith.constant 0 : index
      %c0_168 = arith.constant 0 : index
      %391 = vector.load %arg22[%c1_166, %c0_167, %c0_168] : memref<2x8x128xf32, #tpu.memory_space<vmem>>, vector<1x8x128xf32>
      %392 = vector.shape_cast %391 : vector<1x8x128xf32> to vector<8x128xf32>
      %393 = vector.shape_cast %384 : vector<8x128xf32> to vector<1x8x128xf32>
      tpu.vector_store %arg22[%c1_166, %c0_167, %c0_168], %393 {strides = array<i32>} : memref<2x8x128xf32, #tpu.memory_space<vmem>>, vector<1x8x128xf32>,
    } else {
    }
    %c1_i32_164 = arith.constant 1 : i32
    %388 = arith.cmpi eq, %arg1, %c1_i32_164 : i32
    %389 = arith.extui %388 : i1 to i32
    %c0_i32_165 = arith.constant 0 : i32
    %390 = arith.cmpi ne, %389, %c0_i32_165 : i32
    scf.if %390 {
      %c0_166 = arith.constant 0 : index
      %c0_167 = arith.constant 0 : index
      %391 = vector.load %arg20[%c0_166, %c0_167] : memref<1x128xf32, #tpu.memory_space<vmem>>, vector<1x128xf32>
      %c0_168 = arith.constant 0 : index
      %c0_169 = arith.constant 0 : index
      %392 = vector.load %arg21[%c0_168, %c0_169] : memref<1x128xf32, #tpu.memory_space<vmem>>, vector<1x128xf32>
      %cst_170 = arith.constant dense<0.000000e+00> : vector<8xf32>
      %393 = vector.multi_reduction <add>, %384, %cst_170 [1] : vector<8x128xf32> to vector<8xf32>
      %394 = vector.shape_cast %393 : vector<8xf32> to vector<8x1xf32>
      %cst_171 = arith.constant 1.280000e+02 : f32
      %395 = vector.broadcast %cst_171 : f32 to vector<8x1xf32>
      %396 = arith.divf %394, %395 : vector<8x1xf32>
      %397 = vector.broadcast %396 : vector<8x1xf32> to vector<8x128xf32>
      %398 = arith.subf %384, %397 : vector<8x128xf32>
      %399 = arith.mulf %398, %398 : vector<8x128xf32>
      %cst_172 = arith.constant dense<0.000000e+00> : vector<8xf32>
      %400 = vector.multi_reduction <add>, %399, %cst_172 [1] : vector<8x128xf32> to vector<8xf32>
      %401 = vector.shape_cast %400 : vector<8xf32> to vector<8x1xf32>
      %cst_173 = arith.constant 0.00787401571 : f32
      %402 = vector.broadcast %cst_173 : f32 to vector<8x1xf32>
      %403 = arith.mulf %401, %402 : vector<8x1xf32>
      %404 = math.sqrt %403 : vector<8x1xf32>
      %cst_174 = arith.constant 9.99999997E-7 : f32
      %405 = vector.broadcast %cst_174 : f32 to vector<8x1xf32>
      %406 = arith.addf %404, %405 : vector<8x1xf32>
      %cst_175 = arith.constant 1.000000e+00 : f32
      %407 = vector.broadcast %cst_175 : f32 to vector<8x1xf32>
      %408 = arith.divf %407, %406 : vector<8x1xf32>
      %409 = vector.broadcast %396 : vector<8x1xf32> to vector<8x128xf32>
      %410 = arith.subf %384, %409 : vector<8x128xf32>
      %411 = vector.broadcast %391 : vector<1x128xf32> to vector<8x128xf32>
      %412 = arith.mulf %411, %410 : vector<8x128xf32>
      %413 = vector.broadcast %408 : vector<8x1xf32> to vector<8x128xf32>
      %414 = arith.mulf %412, %413 : vector<8x128xf32>
      %415 = vector.broadcast %392 : vector<1x128xf32> to vector<8x128xf32>
      %416 = arith.addf %414, %415 : vector<8x128xf32>
      %c1_176 = arith.constant 1 : index
      %c0_177 = arith.constant 0 : index
      %c0_178 = arith.constant 0 : index
      %417 = vector.load %arg22[%c1_176, %c0_177, %c0_178] : memref<2x8x128xf32, #tpu.memory_space<vmem>>, vector<1x8x128xf32>
      %418 = vector.shape_cast %417 : vector<1x8x128xf32> to vector<8x128xf32>
      %419 = vector.shape_cast %416 : vector<8x128xf32> to vector<1x8x128xf32>
      tpu.vector_store %arg22[%c1_176, %c0_177, %c0_178], %419 {strides = array<i32>} : memref<2x8x128xf32, #tpu.memory_space<vmem>>, vector<1x8x128xf32>,
    } else {
    }
    return
  }
  func.func @transform_0(%arg0: i32, %arg1: i32) -> (i32, i32, i32) {
    %c0_i32 = arith.constant 0 : i32
    %c0_i32_0 = arith.constant 0 : i32
    %c0_i32_1 = arith.constant 0 : i32
    return %arg0, %c0_i32, %c0_i32_0 : i32, i32, i32
  }
  func.func @transform_1(%arg0: i32, %arg1: i32) -> (i32, i32, i32) {
    %c0_i32 = arith.constant 0 : i32
    %c0_i32_0 = arith.constant 0 : i32
    %c0_i32_1 = arith.constant 0 : i32
    return %arg0, %c0_i32, %c0_i32_0 : i32, i32, i32
  }
  func.func @transform_2(%arg0: i32, %arg1: i32) -> (i32, i32, i32) {
    %c0_i32 = arith.constant 0 : i32
    %c0_i32_0 = arith.constant 0 : i32
    %c0_i32_1 = arith.constant 0 : i32
    return %arg1, %c0_i32, %c0_i32_0 : i32, i32, i32
  }
  func.func @transform_3(%arg0: i32, %arg1: i32) -> (i32, i32, i32) {
    %c0_i32 = arith.constant 0 : i32
    %c0_i32_0 = arith.constant 0 : i32
    %c0_i32_1 = arith.constant 0 : i32
    return %arg1, %c0_i32, %c0_i32_0 : i32, i32, i32
  }
  func.func @transform_4(%arg0: i32, %arg1: i32) -> (i32, i32, i32) {
    %c0_i32 = arith.constant 0 : i32
    %c0_i32_0 = arith.constant 0 : i32
    %c0_i32_1 = arith.constant 0 : i32
    return %arg1, %c0_i32, %c0_i32_0 : i32, i32, i32
  }
  func.func @transform_5(%arg0: i32, %arg1: i32) -> (i32, i32, i32) {
    %c0_i32 = arith.constant 0 : i32
    %c0_i32_0 = arith.constant 0 : i32
    %c0_i32_1 = arith.constant 0 : i32
    return %arg1, %c0_i32, %c0_i32_0 : i32, i32, i32
  }
  func.func @transform_6(%arg0: i32, %arg1: i32) -> (i32, i32, i32) {
    %c0_i32 = arith.constant 0 : i32
    %c0_i32_0 = arith.constant 0 : i32
    %c0_i32_1 = arith.constant 0 : i32
    return %arg1, %c0_i32, %c0_i32_0 : i32, i32, i32
  }
  func.func @transform_7(%arg0: i32, %arg1: i32) -> (i32, i32, i32) {
    %c0_i32 = arith.constant 0 : i32
    %c0_i32_0 = arith.constant 0 : i32
    %c0_i32_1 = arith.constant 0 : i32
    return %arg1, %c0_i32, %c0_i32_0 : i32, i32, i32
  }
  func.func @transform_8(%arg0: i32, %arg1: i32) -> (i32, i32, i32) {
    %c0_i32 = arith.constant 0 : i32
    %c0_i32_0 = arith.constant 0 : i32
    %c0_i32_1 = arith.constant 0 : i32
    return %arg1, %c0_i32, %c0_i32_0 : i32, i32, i32
  }
  func.func @transform_9(%arg0: i32, %arg1: i32) -> (i32, i32, i32) {
    %c0_i32 = arith.constant 0 : i32
    %c0_i32_0 = arith.constant 0 : i32
    %c0_i32_1 = arith.constant 0 : i32
    return %arg1, %c0_i32, %c0_i32_0 : i32, i32, i32
  }
  func.func @transform_10(%arg0: i32, %arg1: i32) -> (i32, i32, i32) {
    %c0_i32 = arith.constant 0 : i32
    %c0_i32_0 = arith.constant 0 : i32
    %c0_i32_1 = arith.constant 0 : i32
    return %arg1, %c0_i32, %c0_i32_0 : i32, i32, i32
  }
  func.func @transform_11(%arg0: i32, %arg1: i32) -> (i32, i32, i32) {
    %c0_i32 = arith.constant 0 : i32
    %c0_i32_0 = arith.constant 0 : i32
    %c0_i32_1 = arith.constant 0 : i32
    return %arg1, %c0_i32, %c0_i32_0 : i32, i32, i32
  }
  func.func @transform_12(%arg0: i32, %arg1: i32) -> (i32, i32, i32) {
    %c0_i32 = arith.constant 0 : i32
    %c0_i32_0 = arith.constant 0 : i32
    %c0_i32_1 = arith.constant 0 : i32
    return %arg1, %c0_i32, %c0_i32_0 : i32, i32, i32
  }
  func.func @transform_13(%arg0: i32, %arg1: i32) -> (i32, i32, i32) {
    %c0_i32 = arith.constant 0 : i32
    %c0_i32_0 = arith.constant 0 : i32
    %c0_i32_1 = arith.constant 0 : i32
    return %arg1, %c0_i32, %c0_i32_0 : i32, i32, i32
  }
  func.func @transform_14(%arg0: i32, %arg1: i32) -> (i32, i32, i32) {
    %c0_i32 = arith.constant 0 : i32
    %c0_i32_0 = arith.constant 0 : i32
    %c0_i32_1 = arith.constant 0 : i32
    return %arg1, %c0_i32, %c0_i32_0 : i32, i32, i32
  }
  func.func @transform_15(%arg0: i32, %arg1: i32) -> (i32, i32, i32) {
    %c0_i32 = arith.constant 0 : i32
    %c0_i32_0 = arith.constant 0 : i32
    %c0_i32_1 = arith.constant 0 : i32
    return %arg1, %c0_i32, %c0_i32_0 : i32, i32, i32
  }
  func.func @transform_16(%arg0: i32, %arg1: i32) -> (i32, i32, i32) {
    %c0_i32 = arith.constant 0 : i32
    %c0_i32_0 = arith.constant 0 : i32
    %c0_i32_1 = arith.constant 0 : i32
    return %arg1, %c0_i32, %c0_i32_0 : i32, i32, i32
  }
  func.func @transform_17(%arg0: i32, %arg1: i32) -> (i32, i32, i32) {
    %c0_i32 = arith.constant 0 : i32
    %c0_i32_0 = arith.constant 0 : i32
    %c0_i32_1 = arith.constant 0 : i32
    return %arg1, %c0_i32, %c0_i32_0 : i32, i32, i32
  }
  func.func @transform_18(%arg0: i32, %arg1: i32) -> (i32, i32) {
    %c0_i32 = arith.constant 0 : i32
    %c0_i32_0 = arith.constant 0 : i32
    %c0_i32_1 = arith.constant 0 : i32
    return %c0_i32, %c0_i32_0 : i32, i32
  }
  func.func @transform_19(%arg0: i32, %arg1: i32) -> (i32, i32) {
    %c0_i32 = arith.constant 0 : i32
    %c0_i32_0 = arith.constant 0 : i32
    %c0_i32_1 = arith.constant 0 : i32
    return %c0_i32, %c0_i32_0 : i32, i32
  }
  func.func @transform_20(%arg0: i32, %arg1: i32) -> (i32, i32, i32) {
    %c0_i32 = arith.constant 0 : i32
    %c0_i32_0 = arith.constant 0 : i32
    %c0_i32_1 = arith.constant 0 : i32
    return %arg0, %c0_i32, %c0_i32_0 : i32, i32, i32
  }
}

</mosaic_0001>

<bundles_post_ra>
// kernel: tpu_custom_call.1
= control target key start
LH: loop header
LB: loop body
LE: loop exit
PB: predicated region body
PF: predicated region fallthrough
CT: control target
= control target key end

     0   :  { %s5819_s0 = inlined_call_operand.hbm [shape: f32[2,8,128], index: 0, kind: input, shape index: {}]   ;;  %s5820_s1 = inlined_call_operand.hbm [shape: f32[2,1,8], index: 1, kind: input, shape index: {}]   ;;  %s5821_s2 = inlined_call_operand.vmem [shape: f32[2,1,128], index: 2, kind: input, shape index: {}]   ;;  %s5822_s3 = inlined_call_operand.hbm [shape: f32[2,1,128], index: 3, kind: input, shape index: {}]   ;;  %s5823_s4 = inlined_call_operand.hbm [shape: bf16[2,128,128], index: 4, kind: input, shape index: {}]   ;;  %s5824_s5 = inlined_call_operand.vmem [shape: f32[2,1,128], index: 5, kind: input, shape index: {}]   ;;  %s5825_s6 = inlined_call_operand.hbm [shape: bf16[2,128,128], index: 6, kind: input, shape index: {}]   ;;  %s5826_s7 = inlined_call_operand.vmem [shape: f32[2,1,128], index: 7, kind: input, shape index: {}]   ;;  %s5827_s8 = inlined_call_operand.hbm [shape: bf16[2,128,128], index: 8, kind: input, shape index: {}]   ;;  %s5828_s9 = inlined_call_operand.vmem [shape: f32[2,1,128], index: 9, kind: input, shape index: {}]   ;;  %s5829_s10 = inlined_call_operand.hbm [shape: bf16[2,128,128], index: 10, kind: input, shape index: {}]   ;;  %s5830_s11 = inlined_call_operand.vmem [shape: f32[2,1,128], index: 11, kind: input, shape index: {}]   ;;  %s5831_s12 = inlined_call_operand.vmem [shape: f32[2,1,128], index: 12, kind: input, shape index: {}]   ;;  %s5832_s13 = inlined_call_operand.vmem [shape: f32[2,1,128], index: 13, kind: input, shape index: {}]   ;;  %s5833_s14 = inlined_call_operand.hbm [shape: bf16[2,128,256], index: 14, kind: input, shape index: {}]   ;;  %s5834_s15 = inlined_call_operand.vmem [shape: f32[2,1,256], index: 15, kind: input, shape index: {}]   ;;  %s5835_s16 = inlined_call_operand.hbm [shape: bf16[2,256,128], index: 16, kind: input, shape index: {}]   ;;  %s5836_s17 = inlined_call_operand.vmem [shape: f32[2,1,128], index: 17, kind: input, shape index: {}]   ;;  %s5837_s18 = inlined_call_operand.vmem [shape: f32[1,128], index: 18, kind: input, shape index: {}]   ;;  %s5838_s19 = inlined_call_operand.vmem [shape: f32[1,128], index: 19, kind: input, shape index: {}]   ;;  %s5839_s20 = inlined_call_operand.hbm [shape: f32[2,8,128], index: 20, kind: output, shape index: {}]  }
   0x1   :  { %5877 = sst [smem:[#allocation50_spill]] %s5819_s0 }
   0x2   :  { %5878 = sst [smem:[#allocation51_spill]] %s5820_s1 }
   0x3   :  { %5879 = sst [smem:[#allocation52_spill]] %s5821_s2 }
   0x4   :  { %5880 = sst [smem:[#allocation53_spill]] %s5822_s3 }
   0x5   :  { %5881 = sst [smem:[#allocation54_spill]] %s5823_s4 }
   0x6   :  { %5882 = sst [smem:[#allocation55_spill]] %s5824_s5 }
   0x7   :  { %5883 = sst [smem:[#allocation56_spill]] %s5825_s6 }
   0x8   :  { %5884 = sst [smem:[#allocation57_spill]] %s5826_s7 }
   0x9   :  { %5885 = sst [smem:[#allocation58_spill]] %s5827_s8 }
   0xa   :  { %5886 = sst [smem:[#allocation59_spill]] %s5828_s9 }
   0xb   :  { %5887 = sst [smem:[#allocation60_spill]] %s5829_s10 }
   0xc   :  { %5888 = sst [smem:[#allocation61_spill]] %s5830_s11 }
   0xd   :  { %5889 = sst [smem:[#allocation62_spill]] %s5831_s12 }
   0xe   :  { %5890 = sst [smem:[#allocation63_spill]] %s5832_s13 }
   0xf   :  { %5891 = sst [smem:[#allocation64_spill]] %s5833_s14 }
  0x10   :  { %5892 = sst [smem:[#allocation65_spill]] %s5834_s15 }
  0x11   :  { %5893 = sst [smem:[#allocation66_spill]] %s5836_s17 }
  0x12   :  { %5894 = sst [smem:[#allocation67_spill]] %s5837_s18 }
  0x13   :  { %5895 = sst [smem:[#allocation68_spill]] %s5838_s19 }
  0x14   :  { %5896 = sst [smem:[#allocation69_spill]] %s5839_s20 }
  0x15   :  { %25 = vsyncpa [#allocation4], 0 }
  0x16   :  { %26 = vsyncpa [#allocation7], 0 }
  0x17   :  { %27 = vsyncpa [#allocation5], 0  ;;  %s4802_s1 = smov 0   ;;  %s4804_s22 = smov 0  }
  0x18   :  { %s4806_s23 = smov 0   ;;  %s4808_s24 = smov 0  }
  0x19   :  { %s4810_s2 = smov 0   ;;  %s4812_s25 = smov 0  }
  0x1a LB: > { %5897 = sst [smem:[#allocation20_spill]] %s4659_s23  ;;  %s4831_s3 = sadd.s32 4294967295, %s4671_s25   ;;  %s4671_s25 = sphi %s4812_s25, %s33_s25   ;;  %s4667_s2 = sphi %s4810_s2, %s6011_s2   ;;  %s4663_s24 = sphi %s4808_s24, %s6010_s24   ;;  %s4659_s23 = sphi %s4806_s23, %s6006_s23   ;;  %s4655_s22 = sphi %s4804_s22, %s6009_s22   ;;  %s4651_s1 = sphi %s4802_s1, %s6008_s1  }
  0x1b   : > { %5898 = sst [smem:[#allocation21_spill]] %s4671_s25  ;;  %p143_p0 = scmp.ne.s32.totalorder %s4655_s22, %s4651_s1 }
  0x1c   : > { %p5845_p1 = scmp.eq.s32.totalorder %s4831_s3, 0  ;;  %p3537_p2 = scmp.ge.s32.totalorder %s4671_s25, 1 }
  0x1d   : > { %p586_p3 = scmp.lt.s32.totalorder %s4671_s25, 3  ;;  %s4673_s28 = smov [#allocation3]  }
  0x1e   : > { %p4839_p4 = por %p5845_p1, %p143_p0  ;;  %s601_s4 = sshll.u32 %s4673_s28, 4  ;;  %s602_s4 = int_to_ptr.vmem [resolvable:$true] %s601_s4 }
  0x1f   : > { %p4843_p5 = pnand %p3537_p2, %p586_p3  ;;  %s42_s30 = sadd.s32 1, %s4667_s2 }
  0x20   : > { %s4348_s0 = scalar_lea.vmem %s602_s4, 256  ;;  %p4356_p12 = scmp.lt.s32.totalorder %s602_s4, %s602_s4 }
  0x21   : > { %p4108_p6 = pneg %p4843_p5  ;;  %p4349_p9 = scmp.ne.s32.totalorder %s602_s4, %s4348_s0 }
  0x22   : > { %p4357_p13 = scmp.lt.s32.totalorder %s4348_s0, %s4348_s0 }
  0x23   : > { %p4851_p7 = pnand %p4108_p6, %p5845_p1 }
  0x24   : > { %p4358_p0 = por %p4357_p13, %p4356_p12 }
  0x25   : > { %p4339_p8 = pneg %p4851_p7 }
  0x27   : > { %p4351_p10 = pnand %p4349_p9, %p4339_p8 }
  0x29   : > { %p4352_p11 = pneg %p4351_p10 }
  0x2b   : > { %p4359_p2 = pnand %p4358_p0, %p4352_p11 }
  0x2d   : > { %4362 = shalt.err (!%p4359_p2)
}
  0x2e   : > { %s5840_s21 = smov 128   ;;  %s5841_s1 = smov 8  }
  0x2f   : > { %s5902_s20 = sld [smem:[#allocation50_spill]]  ;;  %p43_p3 = scmp.ge.s32.totalorder %s42_s30, 2 }
  0x30   : > { %s130_s19 = sadd.s32 1, %s4659_s23  ;;  %p137_p6 = scmp.ne.s32.totalorder %s4659_s23, %s4655_s22 }
  0x31   : > { %p138_p9 = scmp.eq.s32.totalorder %s4671_s25, 0  ;;  %s6013_s30 = smov (%p43_p3, %s42_s30), 0 }
  0x32   : > { %5903 = sst [smem:[#allocation22_spill]] %s6013_s30  ;;  %p4139_p11 = scmp.lt.s32.totalorder %s4671_s25, 2 }
  0x33   : > { %p139_p10 = por %p138_p9, %p137_p6  ;;  %s127_s18 = ssub.s32 %s4667_s2, %s6013_s30 }
  0x34   : > { %s643_s17 = sand.u32 1, %s4671_s25   ;;  %p128_p12 = scmp.eq.s32.totalorder %s127_s18, 0 }
  0x35   : > { %4111 = dma.hbm_to_vmem [thread:$0]  (!%p4851_p7), %s5902_s20, 256, %s602_s4, [#allocation4], %s5840_s21, %s5840_s21, %s5841_s1  }
  0x36   : > { %s4880_s15 = sand.u32 1, %s4659_s23   ;;  %s3541_s13 = sshll.u32 %s4667_s2, 4 }
  0x37   : > { %s4884_s28 = scalar_select %p128_p12, %s4659_s23, %s130_s19  }
  0x38   : > { %s5905_s0 = sld [smem:[#allocation53_spill]]  ;;  %s646_s1 = scalar_lea.vmem [#allocation8], %s4880_s15 }
  0x39   : > { %5904 = sst [smem:[#allocation23_spill]] %s4884_s28  ;;  %s653_s12 = sshll.u32 %s646_s1, 4  ;;  %s654_s12 = int_to_ptr.vmem [resolvable:$true] %s653_s12 }
  0x3a   : > { %p4890_p13 = pnand %p4139_p11, %p139_p10  ;;  %s4895_s18 = sshll.u32 %s4880_s15, 6 }
  0x3b   : > { %s4898_s25 = scalar_lea.sflag [#allocation4], %s643_s17  ;;  %s4676_s1 = smov [#allocation8]  }
  0x3c   : > { %p4902_p0 = pneg %p4890_p13  ;;  %s4381_s20 = sshll.u32 %s4676_s1, 4  ;;  %s4382_s20 = int_to_ptr.vmem [resolvable:$false] %s4381_s20 }
  0x3d   : > { %s4383_s4 = scalar_lea.vmem %s4382_s20, 32  ;;  %p4384_p9 = scmp.lt.s32.totalorder %s654_s12, %s4382_s20 }
  0x3e   : > { %s651_s21 = scalar_lea.hbm %s5905_s0, %s3541_s13  ;;  %s4376_s13 = scalar_lea.vmem %s654_s12, 16 }
  0x3f   : > { %p4377_p2 = scmp.ne.s32.totalorder %s654_s12, %s4376_s13  ;;  %p4385_p10 = scmp.lt.s32.totalorder %s4383_s4, %s4376_s13 }
  0x41   : > { %p4379_p3 = pnand %p4377_p2, %p4902_p0  ;;  %p4386_p11 = por %p4385_p10, %p4384_p9 }
  0x43   : > { %p4380_p6 = pneg %p4379_p3 }
  0x45   : > { %p4387_p12 = pnand %p4386_p11, %p4380_p6 }
  0x47   : > { %4390 = shalt.err (!%p4387_p12)
}
  0x48   : > { %4118 = dma.hbm_to_vmem [thread:$0]  (!%p4890_p13), %s651_s21, 16, %s654_s12, %s4898_s25  }
  0x49   : > { %s4912_s17 = sshll.u32 %s4667_s2, 10  ;;  %s5908_s1 = sld [smem:[#allocation54_spill]] }
  0x4a   : > { %s664_s23 = scalar_lea.vmem [#allocation9], %s4895_s18  ;;  %s4677_s4 = smov [#allocation9]  }
  0x4b   : > { %s671_s20 = sshll.u32 %s664_s23, 4  ;;  %s4409_s9 = sshll.u32 %s4677_s4, 4  ;;  %s672_s20 = int_to_ptr.vmem [resolvable:$true] %s671_s20  ;;  %s4410_s9 = int_to_ptr.vmem [resolvable:$false] %s4409_s9 }
  0x4c   : > { %s4404_s13 = scalar_lea.vmem %s672_s20, 1024  ;;  %s4411_s7 = scalar_lea.vmem %s4410_s9, 2048 }
  0x4d   : > { %p4405_p2 = scmp.ne.s32.totalorder %s672_s20, %s4404_s13  ;;  %p4412_p9 = scmp.lt.s32.totalorder %s672_s20, %s4410_s9 }
  0x4e   : > { %p4413_p10 = scmp.lt.s32.totalorder %s4411_s7, %s4404_s13 }
  0x4f   : > { %s670_s28 = scalar_lea.hbm %s5908_s1, %s4912_s17  ;;  %p4407_p3 = pnand %p4405_p2, %p4902_p0 }
  0x50   : > { %p4414_p11 = por %p4413_p10, %p4412_p9 }
  0x51   : > { %p4408_p6 = pneg %p4407_p3 }
  0x53   : > { %p4415_p12 = pnand %p4414_p11, %p4408_p6 }
  0x55   : > { %4418 = shalt.err (!%p4415_p12)
}
  0x56   : > { %s5846_s12 = smov 64   ;;  %s5847_s23 = smov 4  }
  0x57   : > { %4121 = dma.hbm_to_vmem [thread:$0]  (!%p4890_p13), %s670_s28, 1024, %s672_s20, %s4898_s25, %s5846_s12, %s5846_s12, %s5847_s23  }
  0x58   : > { %s5909_s6 = sld [smem:[#allocation56_spill]]  ;;  %s691_s7 = scalar_lea.vmem [#allocation10], %s4895_s18 }
  0x59   : > { %s698_s0 = sshll.u32 %s691_s7, 4  ;;  %s4680_s13 = smov [#allocation10]   ;;  %s699_s0 = int_to_ptr.vmem [resolvable:$true] %s698_s0 }
  0x5a   : > { %s4432_s1 = scalar_lea.vmem %s699_s0, 1024  ;;  %s4437_s4 = sshll.u32 %s4680_s13, 4  ;;  %s4438_s4 = int_to_ptr.vmem [resolvable:$false] %s4437_s4 }
  0x5b   : > { %p4433_p2 = scmp.ne.s32.totalorder %s699_s0, %s4432_s1  ;;  %s4439_s5 = scalar_lea.vmem %s4438_s4, 2048 }
  0x5c   : > { %p4440_p9 = scmp.lt.s32.totalorder %s699_s0, %s4438_s4  ;;  %p4441_p10 = scmp.lt.s32.totalorder %s4439_s5, %s4432_s1 }
  0x5d   : > { %p4435_p3 = pnand %p4433_p2, %p4902_p0 }
  0x5e   : > { %s697_s9 = scalar_lea.hbm %s5909_s6, %s4912_s17  ;;  %p4442_p11 = por %p4441_p10, %p4440_p9 }
  0x5f   : > { %p4436_p6 = pneg %p4435_p3 }
  0x61   : > { %p4443_p12 = pnand %p4442_p11, %p4436_p6 }
  0x63   : > { %4446 = shalt.err (!%p4443_p12)
}
  0x64   : > { %4124 = dma.hbm_to_vmem [thread:$0]  (!%p4890_p13), %s697_s9, 1024, %s699_s0, %s4898_s25, %s5846_s12, %s5846_s12, %s5847_s23  }
  0x65   : > { %s5910_s8 = sld [smem:[#allocation58_spill]]  ;;  %s718_s21 = scalar_lea.vmem [#allocation11], %s4895_s18 }
  0x66   : > { %s725_s7 = sshll.u32 %s718_s21, 4  ;;  %s4681_s1 = smov [#allocation11]   ;;  %s726_s7 = int_to_ptr.vmem [resolvable:$true] %s725_s7 }
  0x67   : > { %s4460_s5 = scalar_lea.vmem %s726_s7, 1024  ;;  %s4465_s13 = sshll.u32 %s4681_s1, 4  ;;  %s4466_s13 = int_to_ptr.vmem [resolvable:$false] %s4465_s13 }
  0x68   : > { %p4461_p2 = scmp.ne.s32.totalorder %s726_s7, %s4460_s5  ;;  %s4467_s4 = scalar_lea.vmem %s4466_s13, 2048 }
  0x69   : > { %p4468_p9 = scmp.lt.s32.totalorder %s726_s7, %s4466_s13  ;;  %p4469_p10 = scmp.lt.s32.totalorder %s4467_s4, %s4460_s5 }
  0x6a   : > { %p4463_p3 = pnand %p4461_p2, %p4902_p0 }
  0x6b   : > { %s724_s30 = scalar_lea.hbm %s5910_s8, %s4912_s17  ;;  %p4470_p11 = por %p4469_p10, %p4468_p9 }
  0x6c   : > { %p4464_p6 = pneg %p4463_p3 }
  0x6e   : > { %p4471_p12 = pnand %p4470_p11, %p4464_p6 }
  0x70   : > { %4474 = shalt.err (!%p4471_p12)
}
  0x71   : > { %4127 = dma.hbm_to_vmem [thread:$0]  (!%p4890_p13), %s724_s30, 1024, %s726_s7, %s4898_s25, %s5846_s12, %s5846_s12, %s5847_s23  }
  0x72   : > { %s5911_s10 = sld [smem:[#allocation60_spill]]  ;;  %s745_s20 = scalar_lea.vmem [#allocation12], %s4895_s18 }
  0x73   : > { %s752_s21 = sshll.u32 %s745_s20, 4  ;;  %s3676_s5 = sshll.u32 %s4667_s2, 11  ;;  %s753_s21 = int_to_ptr.vmem [resolvable:$true] %s752_s21 }
  0x74   : > { %s4488_s1 = scalar_lea.vmem %s753_s21, 1024  ;;  %s4682_s13 = smov [#allocation12]  }
  0x75   : > { %p4489_p2 = scmp.ne.s32.totalorder %s753_s21, %s4488_s1  ;;  %s4493_s4 = sshll.u32 %s4682_s13, 4  ;;  %s4494_s4 = int_to_ptr.vmem [resolvable:$false] %s4493_s4 }
  0x76   : > { %s4495_s6 = scalar_lea.vmem %s4494_s4, 2048  ;;  %p4496_p9 = scmp.lt.s32.totalorder %s753_s21, %s4494_s4 }
  0x77   : > { %p4491_p3 = pnand %p4489_p2, %p4902_p0  ;;  %p4497_p10 = scmp.lt.s32.totalorder %s4495_s6, %s4488_s1 }
  0x78   : > { %s751_s28 = scalar_lea.hbm %s5911_s10, %s4912_s17 }
  0x79   : > { %p4492_p6 = pneg %p4491_p3  ;;  %p4498_p11 = por %p4497_p10, %p4496_p9 }
  0x7b   : > { %p4499_p12 = pnand %p4498_p11, %p4492_p6 }
  0x7d   : > { %4502 = shalt.err (!%p4499_p12)
}
  0x7e   : > { %4130 = dma.hbm_to_vmem [thread:$0]  (!%p4890_p13), %s751_s28, 1024, %s753_s21, %s4898_s25, %s5846_s12, %s5846_s12, %s5847_s23  }
  0x7f   : > { %s5912_s14 = sld [smem:[#allocation64_spill]]  ;;  %s5913_s7 = sshll.u32 %s4880_s15, 7 }
  0x80   : > { %s784_s6 = scalar_lea.vmem [#allocation13], %s5913_s7  ;;  %s4683_s20 = smov [#allocation13]  }
  0x81   : > { %s791_s9 = sshll.u32 %s784_s6, 4  ;;  %s4521_s1 = sshll.u32 %s4683_s20, 4  ;;  %s792_s9 = int_to_ptr.vmem [resolvable:$true] %s791_s9  ;;  %s4522_s1 = int_to_ptr.vmem [resolvable:$false] %s4521_s1 }
  0x82   : > { %s4516_s0 = scalar_lea.vmem %s792_s9, 2048  ;;  %s4523_s13 = scalar_lea.vmem %s4522_s1, 4096 }
  0x83   : > { %p4517_p2 = scmp.ne.s32.totalorder %s792_s9, %s4516_s0  ;;  %p4524_p9 = scmp.lt.s32.totalorder %s792_s9, %s4522_s1 }
  0x84   : > { %p4525_p10 = scmp.lt.s32.totalorder %s4523_s13, %s4516_s0 }
  0x85   : > { %s790_s30 = scalar_lea.hbm %s5912_s14, %s3676_s5  ;;  %p4519_p3 = pnand %p4517_p2, %p4902_p0 }
  0x86   : > { %p4526_p11 = por %p4525_p10, %p4524_p9 }
  0x87   : > { %p4520_p6 = pneg %p4519_p3 }
  0x89   : > { %p4527_p12 = pnand %p4526_p11, %p4520_p6 }
  0x8b   : > { %4530 = shalt.err (!%p4527_p12)
}
  0x8c   : > { %s5914_s28 = smov 8   ;;  %s5915_s21 = smov 128  }
  0x8d   : > { %4133 = dma.hbm_to_vmem [thread:$0]  (!%p4890_p13), %s790_s30, 2048, %s792_s9, %s4898_s25, %s5915_s21, %s5915_s21, %s5914_s28  }
  0x8e   : > { %s4684_s4 = smov [#allocation6]  }
  0x8f   : > { %s617_s18 = sshll.u32 %s4684_s4, 4  ;;  %s618_s18 = int_to_ptr.vmem [resolvable:$true] %s617_s18 }
  0x90   : > { %s4542_s17 = scalar_lea.vmem %s618_s18, 32  ;;  %p4550_p9 = scmp.lt.s32.totalorder %s618_s18, %s618_s18 }
  0x91   : > { %p4543_p2 = scmp.ne.s32.totalorder %s618_s18, %s4542_s17  ;;  %p4551_p6 = scmp.lt.s32.totalorder %s4542_s17, %s4542_s17 }
  0x93   : > { %p4545_p3 = pnand %p4543_p2, %p4339_p8  ;;  %p4552_p10 = por %p4551_p6, %p4550_p9 }
  0x95   : > { %p4546_p1 = pneg %p4545_p3 }
  0x97   : > { %p4553_p11 = pnand %p4552_p10, %p4546_p1 }
  0x99   : > { %4556 = shalt.err (!%p4553_p11)
}
  0x9a   : > { %s4685_s7 = smov 16   ;;  %s4686_s30 = smov 1  }
  0x9b   : > { %s5916_s0 = sld [smem:[#allocation51_spill]]  ;;  %s818_s13 = scalar_lea.hbm %s5835_s16, %s3676_s5 }
  0x9c   : > { %s5917_s28 = sshll.u32 %s4880_s15, 7  ;;  %s4687_s12 = smov [#allocation14]  }
  0x9d   : > { %s812_s21 = scalar_lea.vmem [#allocation14], %s5917_s28  ;;  %s4575_s29 = sshll.u32 %s4687_s12, 4  ;;  %s4576_s29 = int_to_ptr.vmem [resolvable:$false] %s4575_s29 }
  0x9e   : > { %s819_s4 = sshll.u32 %s812_s21, 4  ;;  %s4577_s23 = scalar_lea.vmem %s4576_s29, 4096  ;;  %s820_s4 = int_to_ptr.vmem [resolvable:$true] %s819_s4 }
  0x9f   : > { %s4570_s17 = scalar_lea.vmem %s820_s4, 2048  ;;  %p4578_p2 = scmp.lt.s32.totalorder %s820_s4, %s4576_s29 }
  0xa0   : > { %p4571_p1 = scmp.ne.s32.totalorder %s820_s4, %s4570_s17 }
  0xa1   : > { %4114 = dma.hbm_to_vmem [thread:$0]  (!%p4851_p7), %s5916_s0, 32, %s618_s18, [#allocation7], %s4685_s7, %s4685_s7, %s4686_s30  }
  0xa2   : > { %p4573_p8 = pnand %p4571_p1, %p4902_p0  ;;  %p4579_p7 = scmp.lt.s32.totalorder %s4577_s23, %s4570_s17 }
  0xa4   : > { %p4574_p12 = pneg %p4573_p8  ;;  %p4580_p3 = por %p4579_p7, %p4578_p2 }
  0xa6   : > { %p4581_p9 = pnand %p4580_p3, %p4574_p12 }
  0xa8   : > { %4584 = shalt.err (!%p4581_p9)
}
  0xa9   : > { %s5918_s15 = smov 4   ;;  %s5919_s5 = smov 64  }
  0xaa   : > { %4136 = dma.hbm_to_vmem [thread:$0]  (!%p4890_p13), %s818_s13, 2048, %s820_s4, %s4898_s25, %s5919_s5, %s5919_s5, %s5918_s15  }
  0xab   : > { %837 = sbr.rel (%p4843_p5) target bundleno = 7183 (0x1c0f), region = 100 }
  0xb0   : > { %p5920_p0 = scmp.eq.s32.totalorder %s4831_s3, 0 }
  0xb2   : > { %4634 = dma.done.wait (%p5920_p0), [#allocation4], 256   ;;  %p5921_p6 = pmov %p5920_p0 }
  0xb3   : > { %p5922_p10 = pmov %p5920_p0 }
  0xb4   : > { %4636 = vsyncadd (%p5921_p6), [#allocation4], 4294967040 }
  0xb5   : > { %4638 = dma.done.wait (%p5922_p10), [#allocation7], 32   ;;  %p5923_p11 = pmov %p5920_p0 }
  0xb6   : > { %s847_s11 = sand.u32 1, %s4831_s3   ;;  %s5017_s25 = sand.u32 1, %s4655_s22  }
  0xb7   : > { %4640 = vsyncadd (%p5923_p11), [#allocation7], 4294967264  ;;  %s848_s27 = scalar_lea.sflag [#allocation4], %s847_s11 }
  0xb8   : > { %4642 = dma.done.wait (%p4839_p4), %s848_s27, 8208  }
  0xb9   : > { %4644 = vsyncadd (%p4839_p4), %s848_s27, 4294959088  ;;  %s3563_s12 = sshll.u32 %s5017_s25, 6  ;;  %s3567_s23 = sshll.u32 %s5017_s25, 7 }
  0xba   : > { %p1015_p5 = scmp.lt.s32.totalorder %s4663_s24, 1  ;;  %s5926_s21 = sld [smem:[#allocation57_spill]] }
  0xbb   : > { %s5928_s7 = sld [smem:[#allocation61_spill]]  ;;  %s5068_s11 = scalar_lea.vmem [#allocation9], %s3563_s12 }
  0xbc   : > { %s5028_s18 = scalar_select %p1015_p5, %s4663_s24, 1 }
  0xbd   : > { %s5929_s10 = sld [smem:[#allocation62_spill]]  ;;  %s5070_s27 = scalar_lea.vmem [#allocation10], %s3563_s12 }
  0xbe   : > { %s5930_s9 = sld [smem:[#allocation63_spill]]  ;;  %s3569_s20 = sshll.u32 %s5028_s18, 1 }
  0xbf   : > { %s5931_s28 = sld [smem:[#allocation65_spill]]  ;;  %s5072_s8 = scalar_lea.vmem [#allocation11], %s3563_s12 }
  0xc0   : > { %s1023_s4 = scalar_lea.vmem %s5926_s21, %s5028_s18  ;;  %s5932_s15 = sld [smem:[#allocation66_spill]] }
  0xc1   : > { %s1029_s30 = scalar_lea.vmem %s5928_s7, %s5028_s18  ;;  %s5076_s14 = scalar_lea.vmem [#allocation13], %s3567_s23 }
  0xc2   : > { %s5078_s19 = scalar_lea.vmem [#allocation14], %s3567_s23  ;;  %p3570_p4 = scmp.ne.s32.totalorder %s4663_s24, 0 }
  0xc3   : > { %s1032_s6 = scalar_lea.vmem %s5929_s10, %s5028_s18  ;;  %s5074_s10 = scalar_lea.vmem [#allocation12], %s3563_s12 }
  0xc4   : > { %s1035_s0 = scalar_lea.vmem %s5930_s9, %s5028_s18  ;;  %1048 = sbr.rel (%p3570_p4) target bundleno = 203 (0xcb), region = 140 }
  0xc5   : > { %s5062_s21 = scalar_lea.vmem %s5931_s28, %s3569_s20 }
  0xc6   : > { %s1042_s5 = scalar_lea.vmem %s5932_s15, %s5028_s18 }
  0xc9   : > { %v1049_v0 = vld [vmem:[#allocation3] sm:$0xff]  ;;  %v1050_v1 = vld [vmem:[#allocation3 + $0x8] sm:$0xff] }
  0xca   : > { %1051 = vst [vmem:[#allocation15] sm:$0xff] %v1049_v0  ;;  %1052 = vst [vmem:[#allocation15 + $0x8] sm:$0xff] %v1050_v1 }
  0xcb PF: > { %v5090_v7 = vld [vmem:[%s5068_s11 + $0x38] sm:$0xff]   ;;  %v5849_v8 = vmov 0.0   ;;  %v5101_v10 = vld [vmem:[%s5068_s11 + $0x30] sm:$0xff]   ;;  %v5111_v12 = vld [vmem:[%s5068_s11 + $0x28] sm:$0xff]   ;;  %vm4689_vm0 = vmmov 0   ;;  %s5933_s26 = sld [smem:[#allocation52_spill]] }
  0xcc   : > { %3826 = vmatprep.subr.bf16.mxu0 %v5849_v8  ;;  %3846 = vmatprep.subr.bf16.mxu1 %v5849_v8  ;;  %v5095_v9 = vld [vmem:[%s5070_s27 + $0x38] sm:$0xff]   ;;  %v5105_v11 = vld [vmem:[%s5070_s27 + $0x30] sm:$0xff]   ;;  %v5115_v13 = vld [vmem:[%s5070_s27 + $0x28] sm:$0xff]   ;;  %s5935_s7 = scalar_lea.vmem [#allocation8], %s5017_s25  ;;  %vm1499_vm3 = vcmask 261120   ;;  %s5937_s17 = sld [smem:[#allocation55_spill]] }
  0xcd   : > { %3827 = vmatpush3.bf16.msra.mxu0 %v5090_v7  ;;  %3847 = vmatpush3.bf16.msra.mxu1 %v5095_v9  ;;  %v5121_v14 = vld [vmem:[%s5068_s11 + $0x20] sm:$0xff]   ;;  %v5133_v16 = vld [vmem:[%s5068_s11 + $0x18] sm:$0xff]   ;;  %v5143_v18 = vld [vmem:[%s5068_s11 + $0x10] sm:$0xff]   ;;  %vm1570_vm4 = vcmask 1043456   ;;  %vm1554_vm6 = vcmask 64512   ;;  %s4691_s12 = smov 64  }
  0xce   : > { %3828 = vmatprep.subr.bf16.mxu0 %v5849_v8  ;;  %3848 = vmatprep.subr.bf16.mxu1 %v5849_v8  ;;  %v5124_v15 = vld [vmem:[%s5070_s27 + $0x20] sm:$0xff]   ;;  %v5138_v17 = vld [vmem:[%s5070_s27 + $0x18] sm:$0xff]   ;;  %v5148_v19 = vld [vmem:[%s5070_s27 + $0x10] sm:$0xff]   ;;  %s4692_s23 = smov 32   ;;  %vm1734_vm7 = vcmask 523520   ;;  %vm1852_vm8 = vcmask 785920  }
  0xcf   : > { %3842 = vmatprep.mubr.msk.bf16.mxu0 %vm4689_vm0, %v5849_v8  ;;  %3862 = vmatprep.mubr.msk.bf16.mxu1 %vm4689_vm0, %v5849_v8  ;;  %v5153_v20 = vld [vmem:[%s5068_s11 + $0x8] sm:$0xff]   ;;  %v5163_v22 = vld [vmem:[%s5068_s11] sm:$0xff]   ;;  %v5190_v38 = vld [vmem:[%s5072_s8 + $0x38] sm:$0xff]   ;;  %vm1970_vm9 = vcmask 1048320   ;;  %p3652_p13 = scmp.ge.s32.totalorder %s4663_s24, 1 }
  0xd0   : > { %v5158_v21 = vld [vmem:[%s5070_s27 + $0x8] sm:$0xff]   ;;  %v5168_v23 = vld [vmem:[%s5070_s27] sm:$0xff]   ;;  %v5194_v40 = vld [vmem:[%s5072_s8 + $0x30] sm:$0xff]   ;;  %s5939_s27 = sld [smem:[#allocation59_spill]] }
  0xd1   : > { %v5081_v2 = vld [vmem:[#allocation15] sm:$0xff]  ;;  %3829 = vmatpush3.bf16.msra.mxu0 %v5101_v10  ;;  %3849 = vmatpush3.bf16.msra.mxu1 %v5105_v11  ;;  %s5934_s1 = scalar_lea.vmem %s5933_s26, %s5028_s18  ;;  %v5203_v41 = vld [vmem:[%s5072_s8 + $0x28] sm:$0xff]   ;;  %v5213_v43 = vld [vmem:[%s5072_s8 + $0x18] sm:$0xff]  }
  0xd2   : > { %1179 = vadd.xlane.f32.xlu0 %v5081_v2  ;;  %3830 = vmatprep.subr.bf16.mxu0 %v5849_v8  ;;  %v5180_v32 = vld [vmem:[%s5934_s1] ss:$0 sm:$0xff]  ;;  %v5218_v44 = vld [vmem:[%s5072_s8 + $0x10] sm:$0xff]   ;;  %v5223_v45 = vld [vmem:[%s5072_s8 + $0x8] sm:$0xff]   ;;  %s5938_s29 = scalar_lea.vmem %s5937_s17, %s5028_s18 }
  0xd3   : > { %3850 = vmatprep.subr.bf16.mxu1 %v5849_v8  ;;  %v5186_v35 = vld [vmem:[%s5935_s7] ss:$0 sm:$0xff] }
  0xd4   : > { %v5208_v42 = vld [vmem:[%s5072_s8 + $0x20] sm:$0xff]  }
  0xd5   : > { %3831 = vmatpush3.bf16.msra.mxu0 %v5111_v12  ;;  %3851 = vmatpush3.bf16.msra.mxu1 %v5115_v13  ;;  %v5228_v46 = vld [vmem:[%s5072_s8] sm:$0xff]  }
  0xd6   : > { %3832 = vmatprep.subr.bf16.mxu0 %v5849_v8  ;;  %3852 = vmatprep.subr.bf16.mxu1 %v5849_v8  ;;  %v5240_v47 = vld [vmem:[%s1023_s4] ss:$0 sm:$0xff]  ;;  %s4690_s4 = smov 96   ;;  %s5940_s8 = scalar_lea.vmem %s5939_s27, %s5028_s18 }
  0xd7   : > { %v5250_v54 = vld [vmem:[%s5938_s29] ss:$0 sm:$0xff] }
  0xd8   : > { %v5269_v62 = vld [vmem:[%s5940_s8] ss:$0 sm:$0xff] }
  0xd9   : > { %3833 = vmatpush3.bf16.msra.mxu0 %v5121_v14  ;;  %3853 = vmatpush3.bf16.msra.mxu1 %v5124_v15 }
  0xda   : > { %3834 = vmatprep.subr.bf16.mxu0 %v5849_v8  ;;  %3854 = vmatprep.subr.bf16.mxu1 %v5849_v8 }
  0xdd   : > { %3835 = vmatpush3.bf16.msra.mxu0 %v5133_v16  ;;  %3855 = vmatpush3.bf16.msra.mxu1 %v5138_v17 }
  0xde   : > { %3836 = vmatprep.subr.bf16.mxu0 %v5849_v8  ;;  %3856 = vmatprep.subr.bf16.mxu1 %v5849_v8 }
  0xe1   : > { %3837 = vmatpush3.bf16.msra.mxu0 %v5143_v18  ;;  %3857 = vmatpush3.bf16.msra.mxu1 %v5148_v19 }
  0xe2   : > { %3838 = vmatprep.subr.bf16.mxu0 %v5849_v8  ;;  %3858 = vmatprep.subr.bf16.mxu1 %v5849_v8 }
  0xe5   : > { %3839 = vmatpush3.bf16.msra.mxu0 %v5153_v20  ;;  %3859 = vmatpush3.bf16.msra.mxu1 %v5158_v21 }
  0xe6   : > { %3840 = vmatprep.subr.bf16.mxu0 %v5849_v8  ;;  %3860 = vmatprep.subr.bf16.mxu1 %v5849_v8 }
  0xe9   : > { %3841 = vmatpush3.bf16.msra.mxu0 %v5163_v22  ;;  %3861 = vmatpush3.bf16.msra.mxu1 %v5168_v23 }
  0xea   : > { %3866 = vmatprep.subr.bf16.mxu0 %v5849_v8  ;;  %3886 = vmatprep.subr.bf16.mxu1 %v5849_v8 }
 0x15b   : > { %v1180_v3 = vpop.xlane.xlu0 %1179 }
 0x15c   : > { %v1182_v4 = vmul.f32 0.0078125, %v1180_v3 }
 0x15e   : > { %v5085_v5 = vsub.f32 %v5081_v2, %v1182_v4 }
 0x160   : > { %v1184_v6 = vmul.f32 %v5085_v5, %v5085_v5  ;;  %v1204_v33 = vmul.f32 %v5180_v32, %v5085_v5 }
 0x162   : > { %1185 = vadd.xlane.f32.xlu0 %v1184_v6 }
 0x1eb   : > { %v1186_v24 = vpop.xlane.xlu0 %1185 }
 0x1ec   : > { %v1187_v25 = vmul.f32 0.007874016, %v1186_v24  ;;  %v1548_v24 = vlaneseq }
 0x1ee   : > { %4281 = vrsqrt.f32 %v1187_v25  ;;  %vm1190_vm1 = vcmp.eq.f32.partialorder %v1187_v25, inf  ;;  %v1193_v28 = vand.u32 2147483648, %v1187_v25  ;;  %vm1192_vm2 = vcmp.eq.f32.partialorder %v1187_v25, 0.0 }
 0x1fb   : > { %v4282_v26 = vpop.eup %4281 }
 0x1fc   : > { %v1189_v27 = vmul.f32 %v4282_v26, %v1187_v25  ;;  %v5277_v26 = vshrl.u32 %v1548_v24, 7 }
 0x1fe   : > { %v1191_v29 = vsel %vm1190_vm1, %v1187_v25, %v1189_v27  ;;  %v1176_v25 = vld [vmem:[#allocation6] sm:$0x1]  ;;  %v5280_v27 = vsub.s32 0, %v5277_v26 }
 0x1ff   : > { %v1194_v30 = vsel %vm1192_vm2, %v1193_v28, %v1191_v29  ;;  %vm1177_vm5 = vcmp.eq.f32.partialorder %v1176_v25, 0.0 }
 0x200   : > { %v1195_v31 = vadd.f32 1e-06, %v1194_v30  ;;  %v1178_v28 = vsel %vm1177_vm5, -1e+09, %v5849_v8 }
 0x201   : > { %v5284_v29 = vrot.slane %v1178_v28, %v5280_v27 }
 0x202   : > { %4283 = vrcp.f32 %v1195_v31 }
 0x20f   : > { %v4284_v34 = vpop.eup %4283 }
 0x210   : > { %v1205_v36 = vmul.f32 %v4284_v34, %v1204_v33 }
 0x212   : > { %v1212_v37 = vadd.f32 %v5186_v35, %v1205_v36 }
 0x214   : > { %v1213_v39 = vpack.c.bf16 %v1212_v37, %v1212_v37 }
 0x216   : > { %3843 = vmatmul.mubr.bf16.vlgmr.msra.gmra.mxu0 %v1213_v39  ;;  %3863 = vmatmul.mubr.bf16.vlgmr.msra.gmra.mxu1 %v1213_v39 }
 0x217   : > { %3867 = vmatpush3.bf16.msra.mxu0 %v5190_v38  ;;  %3882 = vmatprep.mubr.msk.bf16.mxu0 %vm4689_vm0, %v5849_v8 }
 0x218   : > { %3868 = vmatprep.subr.bf16.mxu0 %v5849_v8  ;;  %3888 = vmatprep.mubr.msk.bf16.mxu1 %vm4689_vm0, %v5849_v8 }
 0x21b   : > { %3869 = vmatpush3.bf16.msra.mxu0 %v5194_v40 }
 0x21c   : > { %3870 = vmatprep.subr.bf16.mxu0 %v5849_v8 }
 0x21f   : > { %3871 = vmatpush3.bf16.msra.mxu0 %v5203_v41 }
 0x220   : > { %3872 = vmatprep.subr.bf16.mxu0 %v5849_v8 }
 0x223   : > { %3873 = vmatpush3.bf16.msra.mxu0 %v5208_v42 }
 0x224   : > { %3874 = vmatprep.subr.bf16.mxu0 %v5849_v8 }
 0x227   : > { %3875 = vmatpush3.bf16.msra.mxu0 %v5213_v43 }
 0x228   : > { %3876 = vmatprep.subr.bf16.mxu0 %v5849_v8 }
 0x22b   : > { %3877 = vmatpush3.bf16.msra.mxu0 %v5218_v44 }
 0x22c   : > { %3878 = vmatprep.subr.bf16.mxu0 %v5849_v8 }
 0x22f   : > { %3879 = vmatpush3.bf16.msra.mxu0 %v5223_v45 }
 0x230   : > { %3880 = vmatprep.subr.bf16.mxu0 %v5849_v8 }
 0x233   : > { %3881 = vmatpush3.bf16.msra.mxu0 %v5228_v46 }
 0x234   : > { %3934 = vmatprep.subr.bf16.mxu0 %v5849_v8 }
 0x236   : > { %3883 = vmatmul.mubr.bf16.vlgmr.msra.gmra.mxu0 %v1213_v39 }
 0x237   : > { %3950 = vmatprep.mubr.msk.bf16.mxu0 %vm4689_vm0, %v5849_v8 }
 0x2d6   : > { %v1302_v48 = vpop.f32.mrf.mxu0  ;;  %v1396_v49 = vpop.f32.mrf.mxu1 }
 0x2d7   : > { %v1397_v50 = vadd.f32 %v5240_v47, %v1396_v49  ;;  %v1303_v60 = vadd.f32 %v5250_v54, %v1302_v48 }
 0x2d8   : > { %v3844_v51 = vpop.f32.mrf.mxu0  ;;  %v3864_v52 = vpop.f32.mrf.mxu1 }
 0x2d9   : > { %v5243_v53 = vpack.c.bf16 %v1397_v50, %v1397_v50  ;;  %v5258_v61 = vpack.c.bf16 %v1303_v60, %v1303_v60 }
 0x2da   : > { %v1305_v55 = vpop.f32.mrf.mxu0  ;;  %v1399_v56 = vpop.f32.mrf.mxu1 }
 0x2db   : > { %1619 = vrot.lane.b32.xlu0 %v5243_v53, %s4690_s4  ;;  %v1504_v57 = vsel %vm1499_vm3, %v5243_v53, 0 }
 0x2dc   : > { %v3845_v58 = vpop.f32.mrf.mxu0  ;;  %v3865_v59 = vpop.f32.mrf.mxu1  ;;  %3887 = vmatpush3.bf16.xpose.msra.mxu1 %v1504_v57 }
 0x2dd   : > { %3892 = vmatprep.subr.bf16.mxu1 %v5849_v8 }
 0x2e3   : > { %3889 = vmatmul.mubr.msk.bf16.vlgmr.msra.gmra.mxu1 %vm1499_vm3, %v5258_v61 }
 0x2e4   : > { %3894 = vmatprep.mubr.msk.bf16.mxu1 %vm4689_vm0, %v5849_v8 }
 0x2f6   : > { %v1490_v63 = vpop.f32.mrf.mxu0 }
 0x2f7   : > { %v1491_v0 = vadd.f32 %v5269_v62, %v1490_v63 }
 0x2f8   : > { %v3884_v1 = vpop.f32.mrf.mxu0 }
 0x2f9   : > { %v5272_v3 = vpack.c.bf16 %v1491_v0, %v1491_v0 }
 0x2fa   : > { %v1493_v4 = vpop.f32.mrf.mxu0 }
 0x2fb   : > { %v1572_v5 = vsel %vm1570_vm4, %v5272_v3, 0 }
 0x2fc   : > { %v3885_v6 = vpop.f32.mrf.mxu0  ;;  %3893 = vmatpush3.bf16.msra.mxu1 %v1572_v5 }
 0x2fd   : > { %3898 = vmatprep.subr.bf16.mxu1 %v5849_v8 }
 0x34d   : > { %v1620_v58 = vpop.permute.xlu0 %1619 }
 0x34e   : > { %v1625_v60 = vsel %vm1499_vm3, %v1620_v58, 0 }
 0x3a3   : > { %v1540_v30 = vpop.f32.mrf.mxu1 }
 0x3a4   : > { %v1546_v31 = vmul.f32 0.17677669, %v1540_v30 }
 0x3a5   : > { %v3890_v33 = vpop.f32.mrf.mxu1 }
 0x3a6   : > { %v1553_v34 = vadd.f32 %v5284_v29, %v1546_v31 }
 0x3a7   : > { %v1543_v36 = vpop.f32.mrf.mxu1 }
 0x3a8   : > { %v1555_v37 = vsel %vm1554_vm6, %v1553_v34, -inf }
 0x3a9   : > { %1556 = vmax.xlane.f32.xlu1 %v1555_v37  ;;  %v3891_v39 = vpop.f32.mrf.mxu1 }
 0x432   : > { %v1557_v48 = vpop.xlane.xlu1 %1556 }
 0x433   : > { %v1558_v49 = vsub.f32 %v1553_v34, %v1557_v48 }
 0x435   : > { %v1559_v50 = vmul.f32 1.442695, %v1558_v49 }
 0x437   : > { %4285 = vpow2.f32 %v1559_v50 }
 0x444   : > { %v4286_v51 = vpop.eup %4285 }
 0x445   : > { %v1561_v52 = vsel %vm1554_vm6, %v4286_v51, 0.0 }
 0x446   : > { %1562 = vadd.xlane.f32.xlu1 %v1561_v52 }
 0x457   : > { %1616 = vrot.lane.b32.xlu1 %v5258_v61, %s4690_s4 }
 0x4cf   : > { %v1563_v55 = vpop.xlane.xlu1 %1562 }
 0x4d0   : > { %4287 = vrcp.f32 %v1563_v55 }
 0x4d3   : > { %v1617_v63 = vpop.permute.xlu1 %1616 }
 0x4dd   : > { %v4288_v56 = vpop.eup %4287 }
 0x4de   : > { %v1565_v57 = vmul.f32 %v4288_v56, %v4286_v51 }
 0x4e0   : > { %v1566_v59 = vpack.c.bf16 %v1565_v57, %v1565_v57 }
 0x4e2   : > { %3895 = vmatmul.mubr.msk.bf16.vlgmr.msra.gmra.mxu1 %vm1554_vm6, %v1566_v59 }
 0x4e3   : > { %3899 = vmatpush3.bf16.xpose.msra.mxu1 %v1625_v60  ;;  %3900 = vmatprep.mubr.msk.bf16.mxu1 %vm4689_vm0, %v5849_v8 }
 0x4e4   : > { %3904 = vmatprep.subr.bf16.mxu1 %v5849_v8 }
 0x4ea   : > { %3901 = vmatmul.mubr.msk.bf16.vlgmr.msra.gmra.mxu1 %vm1499_vm3, %v1617_v63 }
 0x4eb   : > { %3906 = vmatprep.mubr.msk.bf16.mxu1 %vm4689_vm0, %v5849_v8 }
 0x5a2   : > { %v1608_v0 = vpop.f32.mrf.mxu1 }
 0x5a3   : > { %1614 = vst.msk [vmem:[#allocation2] sm:$0xff] %vm1499_vm3, %v1608_v0 }
 0x5a4   : > { %v3896_v1 = vpop.f32.mrf.mxu1 }
 0x5a6   : > { %v1611_v4 = vpop.f32.mrf.mxu1 }
 0x5a8   : > { %v3897_v5 = vpop.f32.mrf.mxu1 }
 0x5aa   : > { %v1661_v6 = vpop.f32.mrf.mxu1 }
 0x5ab   : > { %v1667_v24 = vmul.f32 0.17677669, %v1661_v6 }
 0x5ac   : > { %v3902_v25 = vpop.f32.mrf.mxu1 }
 0x5ad   : > { %v1668_v28 = vadd.f32 %v1667_v24, %v5284_v29 }
 0x5ae   : > { %v1664_v30 = vpop.f32.mrf.mxu1 }
 0x5af   : > { %v1669_v31 = vsel %vm1554_vm6, %v1668_v28, -inf }
 0x5b0   : > { %1670 = vmax.xlane.f32.xlu1 %v1669_v31  ;;  %v3903_v33 = vpop.f32.mrf.mxu1 }
 0x5c1   : > { %1738 = vrot.lane.b32.xlu1 %v5243_v53, %s4691_s12 }
 0x5c5   : > { %1736 = vrot.lane.b32.xlu1 %v5258_v61, %s4691_s12 }
 0x639   : > { %v1671_v34 = vpop.xlane.xlu1 %1670 }
 0x63a   : > { %v1672_v36 = vsub.f32 %v1668_v28, %v1671_v34 }
 0x63c   : > { %v1673_v37 = vmul.f32 1.442695, %v1672_v36 }
 0x63d   : > { %v1739_v56 = vpop.permute.xlu1 %1738 }
 0x63e   : > { %4289 = vpow2.f32 %v1673_v37  ;;  %v1744_v58 = vsel %vm1499_vm3, %v1739_v56, 0 }
 0x641   : > { %v1737_v59 = vpop.permute.xlu1 %1736 }
 0x64b   : > { %v4290_v39 = vpop.eup %4289 }
 0x64c   : > { %v1675_v48 = vsel %vm1554_vm6, %v4290_v39, 0.0 }
 0x64d   : > { %1676 = vadd.xlane.f32.xlu0 %v1675_v48 }
 0x663   : > { %1682 = vrot.lane.b32.xlu0 %v5272_v3, %s4690_s4 }
 0x6d6   : > { %v1677_v49 = vpop.xlane.xlu0 %1676 }
 0x6d7   : > { %4291 = vrcp.f32 %v1677_v49 }
 0x6da   : > { %v1683_v50 = vpop.permute.xlu0 %1682 }
 0x6db   : > { %v1688_v51 = vsel %vm1570_vm4, %v1683_v50, 0 }
 0x6dc   : > { %3905 = vmatpush3.bf16.msra.mxu1 %v1688_v51 }
 0x6dd   : > { %3910 = vmatprep.subr.bf16.mxu1 %v5849_v8 }
 0x6e4   : > { %v4292_v52 = vpop.eup %4291 }
 0x6e5   : > { %v1679_v55 = vmul.f32 %v4292_v52, %v4290_v39 }
 0x6e7   : > { %v1680_v57 = vpack.c.bf16 %v1679_v55, %v1679_v55 }
 0x6e9   : > { %3907 = vmatmul.mubr.msk.bf16.vlgmr.msra.gmra.mxu1 %vm1554_vm6, %v1680_v57 }
 0x6ea   : > { %3911 = vmatpush3.bf16.xpose.msra.mxu1 %v1744_v58  ;;  %3912 = vmatprep.mubr.msk.bf16.mxu1 %vm4689_vm0, %v5849_v8 }
 0x6eb   : > { %3916 = vmatprep.subr.bf16.mxu1 %v5849_v8 }
 0x6f1   : > { %3913 = vmatmul.mubr.msk.bf16.vlgmr.msra.gmra.mxu1 %vm1499_vm3, %v1737_v59 }
 0x6f2   : > { %3918 = vmatprep.mubr.msk.bf16.mxu1 %vm4689_vm0, %v5849_v8 }
 0x7a9   : > { %v5319_v60 = vpop.f32.mrf.mxu1 }
 0x7ab   : > { %v3908_v63 = vpop.f32.mrf.mxu1 }
 0x7ad   : > { %v1727_v0 = vpop.f32.mrf.mxu1 }
 0x7af   : > { %v3909_v1 = vpop.f32.mrf.mxu1 }
 0x7b1   : > { %v1780_v4 = vpop.f32.mrf.mxu1 }
 0x7b2   : > { %v1786_v5 = vmul.f32 0.17677669, %v1780_v4 }
 0x7b3   : > { %v3914_v6 = vpop.f32.mrf.mxu1 }
 0x7b4   : > { %v1787_v24 = vadd.f32 %v1786_v5, %v5284_v29 }
 0x7b5   : > { %v1783_v25 = vpop.f32.mrf.mxu1 }
 0x7b6   : > { %v1788_v28 = vsel %vm1554_vm6, %v1787_v24, -inf }
 0x7b7   : > { %1789 = vmax.xlane.f32.xlu1 %v1788_v28  ;;  %v3915_v30 = vpop.f32.mrf.mxu1 }
 0x7c8   : > { %1856 = vrot.lane.b32.xlu1 %v5243_v53, %s4692_s23 }
 0x7cc   : > { %1854 = vrot.lane.b32.xlu1 %v5258_v61, %s4692_s23 }
 0x840   : > { %v1790_v31 = vpop.xlane.xlu1 %1789 }
 0x841   : > { %v1791_v33 = vsub.f32 %v1787_v24, %v1790_v31 }
 0x843   : > { %v1792_v34 = vmul.f32 1.442695, %v1791_v33 }
 0x844   : > { %v1857_v50 = vpop.permute.xlu1 %1856 }
 0x845   : > { %4293 = vpow2.f32 %v1792_v34  ;;  %v1862_v52 = vsel %vm1499_vm3, %v1857_v50, 0  ;;  %v5367_v50 = vld [vmem:[%s5074_s10 + $0x20] sm:$0xff]  }
 0x848   : > { %v1855_v55 = vpop.permute.xlu1 %1854 }
 0x852   : > { %v4294_v36 = vpop.eup %4293 }
 0x853   : > { %v1794_v37 = vsel %vm1554_vm6, %v4294_v36, 0.0 }
 0x854   : > { %1795 = vadd.xlane.f32.xlu0 %v1794_v37 }
 0x86a   : > { %1800 = vrot.lane.b32.xlu0 %v5272_v3, %s4691_s12 }
 0x8dd   : > { %v1796_v39 = vpop.xlane.xlu0 %1795 }
 0x8de   : > { %4295 = vrcp.f32 %v1796_v39 }
 0x8e1   : > { %v1801_v48 = vpop.permute.xlu0 %1800 }
 0x8e2   : > { %v1806_v49 = vsel %vm1570_vm4, %v1801_v48, 0 }
 0x8e3   : > { %3917 = vmatpush3.bf16.msra.mxu1 %v1806_v49 }
 0x8e4   : > { %3922 = vmatprep.subr.bf16.mxu1 %v5849_v8 }
 0x8eb   : > { %v4296_v53 = vpop.eup %4295 }
 0x8ec   : > { %v1798_v61 = vmul.f32 %v4296_v53, %v4294_v36  ;;  %v5357_v53 = vld [vmem:[%s5074_s10 + $0x30] sm:$0xff]  }
 0x8ee   : > { %v1799_v51 = vpack.c.bf16 %v1798_v61, %v1798_v61  ;;  %v5362_v61 = vld [vmem:[%s5074_s10 + $0x28] sm:$0xff]  }
 0x8f0   : > { %3919 = vmatmul.mubr.msk.bf16.vlgmr.msra.gmra.mxu1 %vm1554_vm6, %v1799_v51  ;;  %v5372_v51 = vld [vmem:[%s5074_s10 + $0x18] sm:$0xff]  }
 0x8f1   : > { %3923 = vmatpush3.bf16.xpose.msra.mxu1 %v1862_v52  ;;  %3924 = vmatprep.mubr.msk.bf16.mxu1 %vm4689_vm0, %v5849_v8  ;;  %v5377_v52 = vld [vmem:[%s5074_s10 + $0x10] sm:$0xff]  }
 0x8f2   : > { %3928 = vmatprep.subr.bf16.mxu1 %v5849_v8 }
 0x8f8   : > { %3925 = vmatmul.mubr.msk.bf16.vlgmr.msra.gmra.mxu1 %vm1499_vm3, %v1855_v55  ;;  %v5383_v55 = vld [vmem:[%s5074_s10 + $0x8] sm:$0xff]  }
 0x8f9   : > { %3930 = vmatprep.mubr.msk.bf16.mxu1 %vm4689_vm0, %v5849_v8 }
 0x9b0   : > { %v1842_v56 = vpop.f32.mrf.mxu1 }
 0x9b2   : > { %v3920_v57 = vpop.f32.mrf.mxu1 }
 0x9b4   : > { %v1845_v58 = vpop.f32.mrf.mxu1 }
 0x9b6   : > { %v3921_v59 = vpop.f32.mrf.mxu1 }
 0x9b8   : > { %v1898_v63 = vpop.f32.mrf.mxu1 }
 0x9b9   : > { %v1904_v0 = vmul.f32 0.17677669, %v1898_v63 }
 0x9ba   : > { %v3926_v1 = vpop.f32.mrf.mxu1 }
 0x9bb   : > { %v1905_v4 = vadd.f32 %v1904_v0, %v5284_v29 }
 0x9bc   : > { %v1901_v5 = vpop.f32.mrf.mxu1 }
 0x9bd   : > { %v1906_v6 = vsel %vm1554_vm6, %v1905_v4, -inf  ;;  %v5398_v5 = vld [vmem:[%s1029_s30] ss:$0 sm:$0xff] }
 0x9be   : > { %1907 = vmax.xlane.f32.xlu0 %v1906_v6  ;;  %v3927_v24 = vpop.f32.mrf.mxu1  ;;  %5942 = vst [vmem:[#allocation24_spill] sm:$0xff] %v5398_v5 }
 0x9d4   : > { %1918 = vrot.lane.b32.xlu0 %v5272_v3, %s4692_s23 }
 0x9d8   : > { %1849 = vrot.lane.b32.xlu0 %v1842_v56, %s4691_s12  ;;  %v5387_v56 = vld [vmem:[%s5074_s10] sm:$0xff]  }
 0xa47   : > { %v1908_v25 = vpop.xlane.xlu0 %1907 }
 0xa48   : > { %v1909_v28 = vsub.f32 %v1905_v4, %v1908_v25 }
 0xa4a   : > { %v1910_v30 = vmul.f32 1.442695, %v1909_v28 }
 0xa4b   : > { %v1919_v31 = vpop.permute.xlu0 %1918 }
 0xa4c   : > { %4297 = vpow2.f32 %v1910_v30  ;;  %v1924_v33 = vsel %vm1570_vm4, %v1919_v31, 0 }
 0xa4d   : > { %3929 = vmatpush3.bf16.msra.mxu1 %v1924_v33 }
 0xa4f   : > { %v1850_v37 = vpop.permute.xlu0 %1849 }
 0xa59   : > { %v4298_v34 = vpop.eup %4297 }
 0xa5a   : > { %v1912_v29 = vsel %vm1554_vm6, %v4298_v34, 0.0 }
 0xa5b   : > { %1913 = vadd.xlane.f32.xlu1 %v1912_v29 }
 0xa6c   : > { %1731 = vrot.lane.b32.xlu1 %v5319_v60, %s4692_s23  ;;  %v5353_v60 = vld [vmem:[%s5074_s10 + $0x38] sm:$0xff]  }
 0xa6d   : > { %3935 = vmatpush3.bf16.msra.mxu0 %v5353_v60 }
 0xa6e   : > { %3936 = vmatprep.subr.bf16.mxu0 %v5849_v8 }
 0xa71   : > { %3937 = vmatpush3.bf16.msra.mxu0 %v5357_v53 }
 0xa72   : > { %3938 = vmatprep.subr.bf16.mxu0 %v5849_v8 }
 0xa75   : > { %3939 = vmatpush3.bf16.msra.mxu0 %v5362_v61 }
 0xa76   : > { %3940 = vmatprep.subr.bf16.mxu0 %v5849_v8 }
 0xa79   : > { %3941 = vmatpush3.bf16.msra.mxu0 %v5367_v50 }
 0xa7a   : > { %3942 = vmatprep.subr.bf16.mxu0 %v5849_v8 }
 0xa7d   : > { %3943 = vmatpush3.bf16.msra.mxu0 %v5372_v51 }
 0xa7e   : > { %3944 = vmatprep.subr.bf16.mxu0 %v5849_v8 }
 0xa81   : > { %3945 = vmatpush3.bf16.msra.mxu0 %v5377_v52 }
 0xa82   : > { %3946 = vmatprep.subr.bf16.mxu0 %v5849_v8 }
 0xa85   : > { %3947 = vmatpush3.bf16.msra.mxu0 %v5383_v55 }
 0xa86   : > { %3948 = vmatprep.subr.bf16.mxu0 %v5849_v8  ;;  %v5495_v8 = vld [vmem:[%s5078_s19 + $0x28] sm:$0xff]  }
 0xa87   : > { %5954 = vst [vmem:[#allocation36_spill] sm:$0xff] %v5495_v8 }
 0xa89   : > { %3949 = vmatpush3.bf16.msra.mxu0 %v5387_v56 }
 0xae4   : > { %v1914_v3 = vpop.xlane.xlu1 %1913 }
 0xae5   : > { %4299 = vrcp.f32 %v1914_v3 }
 0xae8   : > { %v1732_v36 = vpop.permute.xlu1 %1731 }
 0xae9   : > { %1735 = vst.msk [vmem:[#allocation2] sm:$0xff] %vm1734_vm7, %v1732_v36  ;;  %v5414_v36 = vld [vmem:[%s5076_s14 + $0x70] ss:$8 sps:$4 sm:$0xff]  }
 0xaea   : > { %1853 = vst.msk [vmem:[#allocation2] sm:$0xff] %vm1852_vm8, %v1850_v37  ;;  %v5419_v37 = vld [vmem:[%s5076_s14 + $0x64] ss:$8 sps:$4 sm:$0xff]  }
 0xaf2   : > { %v4300_v39 = vpop.eup %4299 }
 0xaf3   : > { %v1916_v48 = vmul.f32 %v4300_v39, %v4298_v34  ;;  %v5422_v39 = vld [vmem:[%s5076_s14 + $0x60] ss:$8 sps:$4 sm:$0xff]  }
 0xaf5   : > { %v1917_v49 = vpack.c.bf16 %v1916_v48, %v1916_v48  ;;  %v5427_v48 = vld [vmem:[%s5076_s14 + $0x54] ss:$8 sps:$4 sm:$0xff]  }
 0xaf7   : > { %3931 = vmatmul.mubr.msk.bf16.vlgmr.msra.gmra.mxu1 %vm1554_vm6, %v1917_v49  ;;  %v5430_v49 = vld [vmem:[%s5076_s14 + $0x50] ss:$8 sps:$4 sm:$0xff]  }
 0xbb7   : > { %v1960_v57 = vpop.f32.mrf.mxu1 }
 0xbb8   : > { %1967 = vrot.lane.b32.xlu1 %v1960_v57, %s4690_s4  ;;  %v5435_v57 = vld [vmem:[%s5076_s14 + $0x44] ss:$8 sps:$4 sm:$0xff]  }
 0xbb9   : > { %v3932_v58 = vpop.f32.mrf.mxu1 }
 0xbba   : > { %v5438_v58 = vld [vmem:[%s5076_s14 + $0x40] ss:$8 sps:$4 sm:$0xff]  }
 0xbbb   : > { %v1963_v59 = vpop.f32.mrf.mxu1 }
 0xbbc   : > { %v5441_v59 = vld [vmem:[%s5076_s14 + $0x34] ss:$8 sps:$4 sm:$0xff]  }
 0xbbd   : > { %v3933_v63 = vpop.f32.mrf.mxu1 }
 0xbbe   : > { %v5446_v63 = vld [vmem:[%s5076_s14 + $0x30] ss:$8 sps:$4 sm:$0xff]  }
 0xbbf   : > { %5943 = vst [vmem:[#allocation25_spill] sm:$0xff] %v5446_v63 }
 0xc2a   : > { %v1968_v0 = vpop.permute.xlu1 %1967 }
 0xc2b   : > { %1971 = vst.msk [vmem:[#allocation2] sm:$0xff] %vm1970_vm9, %v1968_v0  ;;  %v5450_v0 = vld [vmem:[%s5076_s14 + $0x24] ss:$8 sps:$4 sm:$0xff]  }
 0xc2c   : > { %5944 = vst [vmem:[#allocation26_spill] sm:$0xff] %v5450_v0 }
 0xc32   : > { %v1972_v1 = vld [vmem:[#allocation2] sm:$0xff] }
 0xc33   : > { %v1973_v4 = vpack.c.bf16 %v1972_v1, %v1972_v1  ;;  %v5848_v1 = vmov 0  }
 0xc34   : > { %2226 = vmatprep.mubr.bf16.mxu1 %v5848_v1  ;;  %v5491_v1 = vld [vmem:[%s5078_s19 + $0x68] sm:$0xff]  }
 0xc35   : > { %3951 = vmatmul.mubr.bf16.vlgmr.msra.gmra.mxu0 %v1973_v4  ;;  %v5455_v4 = vld [vmem:[%s5076_s14 + $0x20] ss:$8 sps:$4 sm:$0xff]   ;;  %5953 = vst [vmem:[#allocation35_spill] sm:$0xff] %v5491_v1 }
 0xc36   : > { %5945 = vst [vmem:[#allocation27_spill] sm:$0xff] %v5455_v4 }
 0xcf5   : > { %v2062_v6 = vpop.f32.mrf.mxu0 }
 0xcf6   : > { %v2063_v24 = vadd.f32 %v5398_v5, %v2062_v6  ;;  %v5459_v6 = vld [vmem:[%s5076_s14 + $0x14] ss:$8 sps:$4 sm:$0xff]   ;;  %v5499_v5 = vld [vmem:[%s5078_s19 + $0x60] sm:$0xff]  }
 0xcf7   : > { %v3952_v25 = vpop.f32.mrf.mxu0  ;;  %5946 = vst [vmem:[#allocation28_spill] sm:$0xff] %v5459_v6  ;;  %5955 = vst [vmem:[#allocation37_spill] sm:$0xff] %v5499_v5 }
 0xcf8   : > { %v5402_v28 = vadd.f32 %v2063_v24, %v5081_v2  ;;  %v5411_v2 = vld [vmem:[%s5076_s14 + $0x74] ss:$8 sps:$4 sm:$0xff]   ;;  %v5463_v24 = vld [vmem:[%s5076_s14 + $0x10] ss:$8 sps:$4 sm:$0xff]   ;;  %v5467_v25 = vld [vmem:[%s5076_s14 + $0x4] ss:$8 sps:$4 sm:$0xff]  }
 0xcf9   : > { %v2065_v30 = vpop.f32.mrf.mxu0  ;;  %2194 = vmatprep.subr.bf16.mxu1 %v5411_v2  ;;  %5947 = vst [vmem:[#allocation29_spill] sm:$0xff] %v5463_v24  ;;  %5948 = vst [vmem:[#allocation30_spill] sm:$0xff] %v5467_v25 }
 0xcfa   : > { %2069 = vadd.xlane.f32.xlu0 %v5402_v28  ;;  %2195 = vmatpush1.bf16.msra.mxu1 %v5414_v36  ;;  %v5471_v30 = vld [vmem:[%s5076_s14] ss:$8 sps:$4 sm:$0xff]  }
 0xcfb   : > { %v3953_v31 = vpop.f32.mrf.mxu0  ;;  %2196 = vmatprep.subr.bf16.mxu1 %v5419_v37  ;;  %5949 = vst [vmem:[#allocation31_spill] sm:$0xff] %v5471_v30 }
 0xcfc   : > { %v5476_v31 = vld [vmem:[%s5078_s19 + $0x78] sm:$0xff]  }
 0xcfd   : > { %3730 = vmatprep.subr.bf16.mxu0 %v5476_v31 }
 0xcfe   : > { %2197 = vmatpush1.bf16.msra.mxu1 %v5422_v39 }
 0xcff   : > { %2198 = vmatprep.subr.bf16.mxu1 %v5427_v48 }
 0xd02   : > { %2199 = vmatpush1.bf16.msra.mxu1 %v5430_v49 }
 0xd03   : > { %2200 = vmatprep.subr.bf16.mxu1 %v5435_v57 }
 0xd06   : > { %2201 = vmatpush1.bf16.msra.mxu1 %v5438_v58 }
 0xd07   : > { %2202 = vmatprep.subr.bf16.mxu1 %v5441_v59 }
 0xd0a   : > { %2203 = vmatpush1.bf16.msra.mxu1 %v5446_v63 }
 0xd0b   : > { %2204 = vmatprep.subr.bf16.mxu1 %v5450_v0 }
 0xd0e   : > { %2205 = vmatpush1.bf16.msra.mxu1 %v5455_v4 }
 0xd0f   : > { %2206 = vmatprep.subr.bf16.mxu1 %v5459_v6 }
 0xd12   : > { %2207 = vmatpush1.bf16.msra.mxu1 %v5463_v24 }
 0xd13   : > { %2208 = vmatprep.subr.bf16.mxu1 %v5467_v25 }
 0xd16   : > { %2209 = vmatpush1.bf16.msra.mxu1 %v5471_v30  ;;  %v5503_v30 = vld [vmem:[%s5078_s19 + $0x20] sm:$0xff]  }
 0xd17   : > { %5956 = vst [vmem:[#allocation38_spill] sm:$0xff] %v5503_v30 }
 0xd83   : > { %v2070_v33 = vpop.xlane.xlu0 %2069 }
 0xd84   : > { %v2071_v34 = vmul.f32 0.0078125, %v2070_v33  ;;  %v5479_v33 = vld [vmem:[%s5078_s19 + $0x38] sm:$0xff]  }
 0xd85   : > { %5950 = vst [vmem:[#allocation32_spill] sm:$0xff] %v5479_v33  ;;  %3731 = vmatpush3.bf16.msra.mxu0 %v5479_v33  ;;  %v5507_v33 = vld [vmem:[%s5078_s19 + $0x58] sm:$0xff]  }
 0xd86   : > { %v5406_v29 = vsub.f32 %v5402_v28, %v2071_v34  ;;  %v5482_v34 = vld [vmem:[%s5078_s19 + $0x70] sm:$0xff]   ;;  %5957 = vst [vmem:[#allocation39_spill] sm:$0xff] %v5507_v33 }
 0xd87   : > { %5951 = vst [vmem:[#allocation33_spill] sm:$0xff] %v5482_v34  ;;  %3732 = vmatprep.subr.bf16.mxu0 %v5482_v34  ;;  %v5511_v34 = vld [vmem:[%s5078_s19 + $0x18] sm:$0xff]  }
 0xd88   : > { %v2073_v3 = vmul.f32 %v5406_v29, %v5406_v29  ;;  %5958 = vst [vmem:[#allocation40_spill] sm:$0xff] %v5511_v34 }
 0xd8a   : > { %2074 = vadd.xlane.f32.xlu1 %v2073_v3  ;;  %v5487_v3 = vld [vmem:[%s5078_s19 + $0x30] sm:$0xff]  }
 0xd8b   : > { %5952 = vst [vmem:[#allocation34_spill] sm:$0xff] %v5487_v3  ;;  %3733 = vmatpush3.bf16.msra.mxu0 %v5487_v3  ;;  %v5515_v3 = vld [vmem:[%s5078_s19 + $0x50] sm:$0xff]  }
 0xd8c   : > { %3734 = vmatprep.subr.bf16.mxu0 %v5491_v1  ;;  %5959 = vst [vmem:[#allocation41_spill] sm:$0xff] %v5515_v3  ;;  %v5519_v1 = vld [vmem:[%s5078_s19 + $0x10] sm:$0xff]  }
 0xd8d   : > { %5960 = vst [vmem:[#allocation42_spill] sm:$0xff] %v5519_v1 }
 0xd8f   : > { %3735 = vmatpush3.bf16.msra.mxu0 %v5495_v8 }
 0xd90   : > { %3736 = vmatprep.subr.bf16.mxu0 %v5499_v5 }
 0xd93   : > { %3737 = vmatpush3.bf16.msra.mxu0 %v5503_v30 }
 0xd94   : > { %3738 = vmatprep.subr.bf16.mxu0 %v5507_v33 }
 0xd97   : > { %3739 = vmatpush3.bf16.msra.mxu0 %v5511_v34 }
 0xd98   : > { %3740 = vmatprep.subr.bf16.mxu0 %v5515_v3 }
 0xd9b   : > { %3741 = vmatpush3.bf16.msra.mxu0 %v5519_v1  ;;  %v5528_v1 = vld [vmem:[%s1032_s6] ss:$0 sm:$0xff] }
 0xd9c   : > { %5962 = vst [vmem:[#allocation43_spill] sm:$0xff] %v5528_v1 }
 0xe13   : > { %v2075_v5 = vpop.xlane.xlu1 %2074 }
 0xe14   : > { %v2076_v8 = vmul.f32 0.007874016, %v2075_v5  ;;  %v2093_v5 = vmul.f32 %v5528_v1, %v5406_v29  ;;  %v5549_v29 = vld [vmem:[%s5078_s19 + $0x40] sm:$0xff]  }
 0xe15   : > { %5967 = vst [vmem:[#allocation47_spill] sm:$0xff] %v5549_v29  ;;  %v5552_v1 = vld [vmem:[%s5078_s19] sm:$0xff]  }
 0xe16   : > { %4301 = vrsqrt.f32 %v2076_v8  ;;  %vm2079_vm10 = vcmp.eq.f32.partialorder %v2076_v8, inf  ;;  %v2082_v33 = vand.u32 2147483648, %v2076_v8  ;;  %vm2081_vm11 = vcmp.eq.f32.partialorder %v2076_v8, 0.0  ;;  %5968 = vst [vmem:[#allocation48_spill] sm:$0xff] %v5552_v1 }
 0xe23   : > { %v4302_v30 = vpop.eup %4301 }
 0xe24   : > { %v2078_v25 = vmul.f32 %v4302_v30, %v2076_v8 }
 0xe26   : > { %v2080_v24 = vsel %vm2079_vm10, %v2076_v8, %v2078_v25  ;;  %v5537_v8 = vld [vmem:[%s1035_s0] ss:$0 sm:$0xff] }
 0xe27   : > { %v2083_v34 = vsel %vm2081_vm11, %v2082_v33, %v2080_v24  ;;  %5964 = vst [vmem:[#allocation44_spill] sm:$0xff] %v5537_v8  ;;  %v5541_v33 = vld [vmem:[%s5078_s19 + $0x48] sm:$0xff]  }
 0xe28   : > { %v2084_v6 = vadd.f32 1e-06, %v2083_v34  ;;  %5965 = vst [vmem:[#allocation45_spill] sm:$0xff] %v5541_v33  ;;  %v5544_v34 = vld [vmem:[%s5078_s19 + $0x8] sm:$0xff]   ;;  %3742 = vmatprep.subr.bf16.mxu0 %v5541_v33 }
 0xe29   : > { %5966 = vst [vmem:[#allocation46_spill] sm:$0xff] %v5544_v34  ;;  %3743 = vmatpush3.bf16.msra.mxu0 %v5544_v34 }
 0xe2a   : > { %4303 = vrcp.f32 %v2084_v6  ;;  %3744 = vmatprep.subr.bf16.mxu0 %v5549_v29 }
 0xe2d   : > { %3745 = vmatpush3.bf16.msra.mxu0 %v5552_v1 }
 0xe37   : > { %v4304_v30 = vpop.eup %4303 }
 0xe38   : > { %v2094_v24 = vmul.f32 %v4304_v30, %v2093_v5  ;;  %v1169_v5 = vld [vmem:[%s5062_s21] sm:$0x3]  ;;  %v2110_v30 = vsub.s32 1, %v5277_v26 }
 0xe3a   : > { %v2101_v6 = vadd.f32 %v5537_v8, %v2094_v24  ;;  %v5559_v24 = vrot.slane %v1169_v5, %v5280_v27 }
 0xe3c   : > { %v2102_v25 = vpack.c.bf16 %v2101_v6, %v2101_v6  ;;  %5969 = vst [vmem:[#allocation49_spill] sm:$0xff] %v5559_v24  ;;  %v5561_v6 = vrot.slane %v1169_v5, %v2110_v30  ;;  %v5570_v5 = vld [vmem:[%s1042_s5] ss:$0 sm:$0xff] }
 0xe3e   : > { %2227 = vmatmul.mubr.bf16.vlgmr.msra.gmra.mxu1 %v2102_v25 }
 0xefe   : > { %v2228_v25 = vpop.f32.mrf.mxu1 }
 0xeff   : > { %v2229_v8 = vadd.f32 %v2228_v25, %v5559_v24 }
 0xf00   : > { %v2230_v34 = vpop.f32.mrf.mxu1 }
 0xf01   : > { %v2231_v33 = vadd.f32 %v2230_v34, %v5561_v6  ;;  %v2235_v3 = vmax.f32 %v2229_v8, 0.0 }
 0xf02   : > { %v2232_v4 = vpop.f32.mrf.mxu1 }
 0xf03   : > { %v2236_v29 = vmax.f32 %v2231_v33, 0.0  ;;  %v2237_v63 = vpack.c.bf16 %v2235_v3, %v2235_v3 }
 0xf04   : > { %v2233_v0 = vpop.f32.mrf.mxu1 }
 0xf05   : > { %v2238_v1 = vpack.c.bf16 %v2236_v29, %v2236_v29 }
 0xf07   : > { %2373 = vmatprep.mubr.bf16.mxu0 %v2238_v1 }
 0xf08   : > { %2374 = vmatmul.mubr.bf16.vlgmr.msra.gmra.mxu0 %v2237_v63 }
 0xfc8   : > { %v3746_v26 = vpop.f32.mrf.mxu0 }
 0xfca   : > { %v3747_v30 = vpop.f32.mrf.mxu0 }
 0xfcb   : > { %v3748_v25 = vadd.f32 %v3747_v30, %v3746_v26  ;;  %2385 = sbr.rel (%p3652_p13) target bundleno = 4050 (0xfd2), region = 144 }
 0xfcc   : > { %v3749_v24 = vpop.f32.mrf.mxu0 }
 0xfcd   : > { %v2376_v34 = vadd.f32 %v3748_v25, %v5570_v5 }
 0xfce   : > { %v3750_v8 = vpop.f32.mrf.mxu0 }
 0xfcf   : > { %v2381_v4 = vadd.f32 %v2376_v34, %v5402_v28 }
 0xfd1   : > { %2386 = vst [vmem:[#allocation15] sm:$0xff] %v2381_v4 }
 0xfd2 PF: > { %p3653_p1 = scmp.ne.s32.totalorder %s4663_s24, 1 }
 0xfd3   : > { %s5971_s19 = sld [smem:[#allocation67_spill]] (!%p3653_p1) }
 0xfd4   : > { %2390 = sbr.rel (%p3653_p1) target bundleno = 4380 (0x111c), region = 148  ;;  %s5972_s17 = sld [smem:[#allocation68_spill]] (!%p3653_p1) }
 0xfd9   : > { %2393 = vadd.xlane.f32.xlu0 %v2381_v4  ;;  %v3654_v8 = vld [vmem:[%s5971_s19] ss:$0 sm:$0xff] }
0x1062   : > { %v2394_v63 = vpop.xlane.xlu0 %2393 }
0x1063   : > { %v2395_v0 = vmul.f32 0.0078125, %v2394_v63 }
0x1065   : > { %v2396_v1 = vsub.f32 %v2381_v4, %v2395_v0  ;;  %v3655_v0 = vld [vmem:[%s5972_s17] ss:$0 sm:$0xff] }
0x1067   : > { %v2397_v3 = vmul.f32 %v2396_v1, %v2396_v1  ;;  %v2417_v63 = vmul.f32 %v3654_v8, %v2396_v1 }
0x1069   : > { %2398 = vadd.xlane.f32.xlu0 %v2397_v3 }
0x10f2   : > { %v2399_v33 = vpop.xlane.xlu0 %2398 }
0x10f3   : > { %v2400_v28 = vmul.f32 0.007874016, %v2399_v33 }
0x10f5   : > { %4305 = vrsqrt.f32 %v2400_v28  ;;  %vm2403_vm12 = vcmp.eq.f32.partialorder %v2400_v28, inf  ;;  %v2406_v26 = vand.u32 2147483648, %v2400_v28  ;;  %vm2405_vm13 = vcmp.eq.f32.partialorder %v2400_v28, 0.0 }
0x1102   : > { %v4306_v29 = vpop.eup %4305 }
0x1103   : > { %v2402_v24 = vmul.f32 %v4306_v29, %v2400_v28 }
0x1105   : > { %v2404_v30 = vsel %vm2403_vm12, %v2400_v28, %v2402_v24 }
0x1106   : > { %v2407_v25 = vsel %vm2405_vm13, %v2406_v26, %v2404_v30 }
0x1107   : > { %v2408_v34 = vadd.f32 1e-06, %v2407_v25 }
0x1109   : > { %4307 = vrcp.f32 %v2408_v34 }
0x1116   : > { %v4308_v4 = vpop.eup %4307 }
0x1117   : > { %v2418_v3 = vmul.f32 %v4308_v4, %v2417_v63 }
0x1119   : > { %v2425_v33 = vadd.f32 %v3655_v0, %v2418_v3 }
0x111b   : > { %2426 = vst [vmem:[#allocation15] sm:$0xff] %v2425_v33 }
0x111c PF: > { %v5586_v29 = vld [vmem:[#allocation15 + $0x8] sm:$0xff]  ;;  %v5973_v28 = vmov 0.0  }
0x111d   : > { %3954 = vmatprep.subr.bf16.mxu1 %v5973_v28  ;;  %3974 = vmatprep.subr.bf16.mxu0 %v5973_v28 }
0x111e   : > { %2433 = vadd.xlane.f32.xlu0 %v5586_v29  ;;  %3955 = vmatpush3.bf16.msra.mxu1 %v5090_v7 }
0x111f   : > { %3975 = vmatpush3.bf16.msra.mxu0 %v5095_v9  ;;  %3956 = vmatprep.subr.bf16.mxu1 %v5973_v28 }
0x1120   : > { %3976 = vmatprep.subr.bf16.mxu0 %v5973_v28  ;;  %3970 = vmatprep.mubr.msk.bf16.mxu1 %vm4689_vm0, %v5973_v28 }
0x1121   : > { %3990 = vmatprep.mubr.msk.bf16.mxu0 %vm4689_vm0, %v5973_v28 }
0x1122   : > { %3957 = vmatpush3.bf16.msra.mxu1 %v5101_v10 }
0x1123   : > { %3977 = vmatpush3.bf16.msra.mxu0 %v5105_v11  ;;  %3958 = vmatprep.subr.bf16.mxu1 %v5973_v28 }
0x1124   : > { %3978 = vmatprep.subr.bf16.mxu0 %v5973_v28 }
0x1126   : > { %3959 = vmatpush3.bf16.msra.mxu1 %v5111_v12 }
0x1127   : > { %3979 = vmatpush3.bf16.msra.mxu0 %v5115_v13  ;;  %3960 = vmatprep.subr.bf16.mxu1 %v5973_v28 }
0x1128   : > { %3980 = vmatprep.subr.bf16.mxu0 %v5973_v28 }
0x112a   : > { %3961 = vmatpush3.bf16.msra.mxu1 %v5121_v14 }
0x112b   : > { %3981 = vmatpush3.bf16.msra.mxu0 %v5124_v15  ;;  %3962 = vmatprep.subr.bf16.mxu1 %v5973_v28 }
0x112c   : > { %3982 = vmatprep.subr.bf16.mxu0 %v5973_v28 }
0x112e   : > { %3963 = vmatpush3.bf16.msra.mxu1 %v5133_v16 }
0x112f   : > { %3983 = vmatpush3.bf16.msra.mxu0 %v5138_v17  ;;  %3964 = vmatprep.subr.bf16.mxu1 %v5973_v28 }
0x1130   : > { %3984 = vmatprep.subr.bf16.mxu0 %v5973_v28 }
0x1132   : > { %3965 = vmatpush3.bf16.msra.mxu1 %v5143_v18 }
0x1133   : > { %3985 = vmatpush3.bf16.msra.mxu0 %v5148_v19  ;;  %3966 = vmatprep.subr.bf16.mxu1 %v5973_v28 }
0x1134   : > { %3986 = vmatprep.subr.bf16.mxu0 %v5973_v28 }
0x1136   : > { %3967 = vmatpush3.bf16.msra.mxu1 %v5153_v20 }
0x1137   : > { %3987 = vmatpush3.bf16.msra.mxu0 %v5158_v21  ;;  %3968 = vmatprep.subr.bf16.mxu1 %v5973_v28 }
0x1138   : > { %3988 = vmatprep.subr.bf16.mxu0 %v5973_v28 }
0x113a   : > { %3969 = vmatpush3.bf16.msra.mxu1 %v5163_v22 }
0x113b   : > { %3989 = vmatpush3.bf16.msra.mxu0 %v5168_v23  ;;  %3994 = vmatprep.subr.bf16.mxu1 %v5973_v28 }
0x113c   : > { %4014 = vmatprep.subr.bf16.mxu0 %v5973_v28 }
0x11a7   : > { %v2434_v7 = vpop.xlane.xlu0 %2433 }
0x11a8   : > { %v2435_v9 = vmul.f32 0.0078125, %v2434_v7 }
0x11aa   : > { %v2436_v10 = vsub.f32 %v5586_v29, %v2435_v9 }
0x11ac   : > { %v2437_v11 = vmul.f32 %v2436_v10, %v2436_v10  ;;  %v2451_v20 = vmul.f32 %v5180_v32, %v2436_v10 }
0x11ae   : > { %2438 = vadd.xlane.f32.xlu0 %v2437_v11 }
0x1237   : > { %v2439_v12 = vpop.xlane.xlu0 %2438 }
0x1238   : > { %v2440_v13 = vmul.f32 0.007874016, %v2439_v12 }
0x123a   : > { %4309 = vrsqrt.f32 %v2440_v13  ;;  %vm2443_vm14 = vcmp.eq.f32.partialorder %v2440_v13, inf  ;;  %v2446_v16 = vand.u32 2147483648, %v2440_v13  ;;  %vm2445_vm15 = vcmp.eq.f32.partialorder %v2440_v13, 0.0 }
0x1247   : > { %v4310_v14 = vpop.eup %4309 }
0x1248   : > { %v2442_v15 = vmul.f32 %v4310_v14, %v2440_v13 }
0x124a   : > { %v2444_v17 = vsel %vm2443_vm14, %v2440_v13, %v2442_v15 }
0x124b   : > { %v2447_v18 = vsel %vm2445_vm15, %v2446_v16, %v2444_v17 }
0x124c   : > { %v2448_v19 = vadd.f32 1e-06, %v2447_v18 }
0x124e   : > { %4311 = vrcp.f32 %v2448_v19 }
0x125b   : > { %v4312_v21 = vpop.eup %4311 }
0x125c   : > { %v2452_v22 = vmul.f32 %v4312_v21, %v2451_v20 }
0x125e   : > { %v2453_v23 = vadd.f32 %v5186_v35, %v2452_v22 }
0x1260   : > { %v2454_v1 = vpack.c.bf16 %v2453_v23, %v2453_v23 }
0x1262   : > { %3971 = vmatmul.mubr.bf16.vlgmr.msra.gmra.mxu1 %v2454_v1  ;;  %3991 = vmatmul.mubr.bf16.vlgmr.msra.gmra.mxu0 %v2454_v1 }
0x1263   : > { %3995 = vmatpush3.bf16.msra.mxu1 %v5190_v38  ;;  %4010 = vmatprep.mubr.msk.bf16.mxu1 %vm4689_vm0, %v5973_v28 }
0x1264   : > { %3996 = vmatprep.subr.bf16.mxu1 %v5973_v28  ;;  %4016 = vmatprep.mubr.msk.bf16.mxu0 %vm4689_vm0, %v5973_v28 }
0x1267   : > { %3997 = vmatpush3.bf16.msra.mxu1 %v5194_v40 }
0x1268   : > { %3998 = vmatprep.subr.bf16.mxu1 %v5973_v28 }
0x126b   : > { %3999 = vmatpush3.bf16.msra.mxu1 %v5203_v41 }
0x126c   : > { %4000 = vmatprep.subr.bf16.mxu1 %v5973_v28 }
0x126f   : > { %4001 = vmatpush3.bf16.msra.mxu1 %v5208_v42 }
0x1270   : > { %4002 = vmatprep.subr.bf16.mxu1 %v5973_v28 }
0x1273   : > { %4003 = vmatpush3.bf16.msra.mxu1 %v5213_v43 }
0x1274   : > { %4004 = vmatprep.subr.bf16.mxu1 %v5973_v28 }
0x1277   : > { %4005 = vmatpush3.bf16.msra.mxu1 %v5218_v44 }
0x1278   : > { %4006 = vmatprep.subr.bf16.mxu1 %v5973_v28 }
0x127b   : > { %4007 = vmatpush3.bf16.msra.mxu1 %v5223_v45 }
0x127c   : > { %4008 = vmatprep.subr.bf16.mxu1 %v5973_v28 }
0x127f   : > { %4009 = vmatpush3.bf16.msra.mxu1 %v5228_v46 }
0x1280   : > { %4020 = vmatprep.subr.bf16.mxu1 %v5973_v28 }
0x1282   : > { %4011 = vmatmul.mubr.bf16.vlgmr.msra.gmra.mxu1 %v2454_v1 }
0x1283   : > { %4022 = vmatprep.mubr.msk.bf16.mxu1 %vm4689_vm0, %v5973_v28 }
0x1322   : > { %v2489_v32 = vpop.f32.mrf.mxu1  ;;  %v2529_v35 = vpop.f32.mrf.mxu0 }
0x1323   : > { %v2530_v38 = vadd.f32 %v5240_v47, %v2529_v35  ;;  %v2490_v42 = vadd.f32 %v5250_v54, %v2489_v32 }
0x1324   : > { %v3972_v40 = vpop.f32.mrf.mxu1  ;;  %v3992_v41 = vpop.f32.mrf.mxu0 }
0x1325   : > { %v2577_v43 = vpack.c.bf16 %v2530_v38, %v2530_v38  ;;  %v2575_v30 = vpack.c.bf16 %v2490_v42, %v2490_v42 }
0x1326   : > { %v2492_v44 = vpop.f32.mrf.mxu1  ;;  %v2532_v45 = vpop.f32.mrf.mxu0 }
0x1327   : > { %2813 = vrot.lane.b32.xlu0 %v2577_v43, %s4691_s12  ;;  %2695 = vrot.lane.b32.xlu1 %v2577_v43, %s4690_s4  ;;  %v2582_v46 = vsel %vm1499_vm3, %v2577_v43, 0 }
0x1328   : > { %v3973_v24 = vpop.f32.mrf.mxu1  ;;  %v3993_v26 = vpop.f32.mrf.mxu0  ;;  %4015 = vmatpush3.bf16.xpose.msra.mxu0 %v2582_v46 }
0x1329   : > { %4026 = vmatprep.subr.bf16.mxu0 %v5973_v28 }
0x132b   : > { %2692 = vrot.lane.b32.xlu1 %v2575_v30, %s4690_s4 }
0x132f   : > { %2811 = vrot.lane.b32.xlu1 %v2575_v30, %s4691_s12  ;;  %4017 = vmatmul.mubr.msk.bf16.vlgmr.msra.gmra.mxu0 %vm1499_vm3, %v2575_v30 }
0x1330   : > { %4028 = vmatprep.mubr.msk.bf16.mxu0 %vm4689_vm0, %v5973_v28 }
0x1333   : > { %2930 = vrot.lane.b32.xlu1 %v2577_v43, %s4692_s23 }
0x1337   : > { %2928 = vrot.lane.b32.xlu1 %v2575_v30, %s4692_s23 }
0x1342   : > { %v2569_v47 = vpop.f32.mrf.mxu1 }
0x1343   : > { %v2570_v54 = vadd.f32 %v5269_v62, %v2569_v47 }
0x1344   : > { %v4012_v25 = vpop.f32.mrf.mxu1 }
0x1345   : > { %v5666_v34 = vpack.c.bf16 %v2570_v54, %v2570_v54 }
0x1346   : > { %v2572_v8 = vpop.f32.mrf.mxu1 }
0x1347   : > { %v2648_v63 = vsel %vm1570_vm4, %v5666_v34, 0 }
0x1348   : > { %v4013_v4 = vpop.f32.mrf.mxu1  ;;  %4021 = vmatpush3.bf16.msra.mxu1 %v2648_v63 }
0x1349   : > { %4032 = vmatprep.subr.bf16.mxu1 %v5973_v28 }
0x1399   : > { %v2696_v0 = vpop.permute.xlu1 %2695  ;;  %v2814_v7 = vpop.permute.xlu0 %2813 }
0x139a   : > { %v2701_v3 = vsel %vm1499_vm3, %v2696_v0, 0  ;;  %v2819_v9 = vsel %vm1499_vm3, %v2814_v7, 0 }
0x139b   : > { %4027 = vmatpush3.bf16.xpose.msra.mxu0 %v2701_v3 }
0x139c   : > { %4038 = vmatprep.subr.bf16.mxu0 %v5973_v28 }
0x139d   : > { %v2693_v33 = vpop.permute.xlu1 %2692 }
0x13a1   : > { %v2812_v62 = vpop.permute.xlu1 %2811 }
0x13a2   : > { %4029 = vmatmul.mubr.msk.bf16.vlgmr.msra.gmra.mxu0 %vm1499_vm3, %v2693_v33 }
0x13a3   : > { %4039 = vmatpush3.bf16.xpose.msra.mxu0 %v2819_v9  ;;  %4040 = vmatprep.mubr.msk.bf16.mxu0 %vm4689_vm0, %v5973_v28 }
0x13a4   : > { %4050 = vmatprep.subr.bf16.mxu0 %v5973_v28 }
0x13a5   : > { %v2931_v10 = vpop.permute.xlu1 %2930 }
0x13a6   : > { %v2936_v11 = vsel %vm1499_vm3, %v2931_v10, 0 }
0x13a9   : > { %v2929_v12 = vpop.permute.xlu1 %2928 }
0x13aa   : > { %4041 = vmatmul.mubr.msk.bf16.vlgmr.msra.gmra.mxu0 %vm1499_vm3, %v2812_v62 }
0x13ab   : > { %4051 = vmatpush3.bf16.xpose.msra.mxu0 %v2936_v11  ;;  %4052 = vmatprep.mubr.msk.bf16.mxu0 %vm4689_vm0, %v5973_v28 }
0x13ac   : > { %4062 = vmatprep.subr.bf16.mxu0 %v5973_v28 }
0x13b2   : > { %4053 = vmatmul.mubr.msk.bf16.vlgmr.msra.gmra.mxu0 %vm1499_vm3, %v2929_v12 }
0x13b3   : > { %4063 = vmatpush3.bf16.msra.mxu0 %v5353_v60  ;;  %4078 = vmatprep.mubr.msk.bf16.mxu0 %vm4689_vm0, %v5973_v28  ;;  %v2430_v60 = vld [vmem:[#allocation6 + $0x1] sm:$0x1] }
0x13b4   : > { %4064 = vmatprep.subr.bf16.mxu0 %v5973_v28  ;;  %vm2431_vm1 = vcmp.eq.f32.partialorder %v2430_v60, 0.0 }
0x13b7   : > { %4065 = vmatpush3.bf16.msra.mxu0 %v5357_v53  ;;  %v2432_v53 = vsel %vm2431_vm1, -1e+09, %v5973_v28 }
0x13b8   : > { %4066 = vmatprep.subr.bf16.mxu0 %v5973_v28 }
0x13bb   : > { %4067 = vmatpush3.bf16.msra.mxu0 %v5362_v61  ;;  %v2629_v61 = vrot.slane %v2432_v53, %v5280_v27 }
0x13bc   : > { %4068 = vmatprep.subr.bf16.mxu0 %v5973_v28 }
0x13bf   : > { %4069 = vmatpush3.bf16.msra.mxu0 %v5367_v50 }
0x13c0   : > { %4070 = vmatprep.subr.bf16.mxu0 %v5973_v28 }
0x13c3   : > { %4071 = vmatpush3.bf16.msra.mxu0 %v5372_v51 }
0x13c4   : > { %4072 = vmatprep.subr.bf16.mxu0 %v5973_v28 }
0x13c7   : > { %4073 = vmatpush3.bf16.msra.mxu0 %v5377_v52 }
0x13c8   : > { %4074 = vmatprep.subr.bf16.mxu0 %v5973_v28 }
0x13cb   : > { %4075 = vmatpush3.bf16.msra.mxu0 %v5383_v55 }
0x13cc   : > { %4076 = vmatprep.subr.bf16.mxu0 %v5973_v28 }
0x13cf   : > { %4077 = vmatpush3.bf16.msra.mxu0 %v5387_v56 }
0x13d0   : > { %3804 = vmatprep.subr.bf16.mxu0 %v5476_v31 }
0x13ef   : > { %v2618_v50 = vpop.f32.mrf.mxu0 }
0x13f0   : > { %v2624_v51 = vmul.f32 0.17677669, %v2618_v50 }
0x13f1   : > { %v4018_v13 = vpop.f32.mrf.mxu0 }
0x13f2   : > { %v2631_v52 = vadd.f32 %v2629_v61, %v2624_v51 }
0x13f3   : > { %v2621_v14 = vpop.f32.mrf.mxu0 }
0x13f4   : > { %v2632_v15 = vsel %vm1554_vm6, %v2631_v52, -inf }
0x13f5   : > { %2633 = vmax.xlane.f32.xlu1 %v2632_v15  ;;  %v4019_v55 = vpop.f32.mrf.mxu0 }
0x1462   : > { %v2737_v16 = vpop.f32.mrf.mxu0 }
0x1463   : > { %v2743_v17 = vmul.f32 0.17677669, %v2737_v16 }
0x1464   : > { %v4030_v56 = vpop.f32.mrf.mxu0 }
0x1465   : > { %v2744_v18 = vadd.f32 %v2743_v17, %v2629_v61 }
0x1466   : > { %v2740_v31 = vpop.f32.mrf.mxu0 }
0x1467   : > { %v2745_v19 = vsel %vm1554_vm6, %v2744_v18, -inf }
0x1468   : > { %2746 = vmax.xlane.f32.xlu0 %v2745_v19  ;;  %v4031_v20 = vpop.f32.mrf.mxu0 }
0x146a   : > { %v2855_v21 = vpop.f32.mrf.mxu0 }
0x146b   : > { %v2861_v27 = vmul.f32 0.17677669, %v2855_v21 }
0x146c   : > { %v4042_v22 = vpop.f32.mrf.mxu0 }
0x146d   : > { %v2862_v23 = vadd.f32 %v2861_v27, %v2629_v61 }
0x146e   : > { %v2858_v1 = vpop.f32.mrf.mxu0 }
0x146f   : > { %v2863_v32 = vsel %vm1554_vm6, %v2862_v23, -inf }
0x1470   : > { %2864 = vmax.xlane.f32.xlu1 %v2863_v32  ;;  %v4043_v35 = vpop.f32.mrf.mxu0  ;;  %v5974_v32 = vmov 0  }
0x1471   : > { %v5978_v35 = vld [vmem:[#allocation28_spill] sm:$0xff] }
0x1472   : > { %v2972_v38 = vpop.f32.mrf.mxu0 }
0x1473   : > { %v2978_v40 = vmul.f32 0.17677669, %v2972_v38 }
0x1474   : > { %v4054_v41 = vpop.f32.mrf.mxu0 }
0x1475   : > { %v2979_v42 = vadd.f32 %v2978_v40, %v2629_v61 }
0x1476   : > { %v2975_v43 = vpop.f32.mrf.mxu0 }
0x1477   : > { %v2980_v44 = vsel %vm1554_vm6, %v2979_v42, -inf }
0x1478   : > { %2981 = vmax.xlane.f32.xlu1 %v2980_v44  ;;  %v4055_v45 = vpop.f32.mrf.mxu0 }
0x147e   : > { %v2634_v46 = vpop.xlane.xlu1 %2633 }
0x147f   : > { %v2635_v24 = vsub.f32 %v2631_v52, %v2634_v46 }
0x1481   : > { %v2636_v26 = vmul.f32 1.442695, %v2635_v24 }
0x1483   : > { %4313 = vpow2.f32 %v2636_v26 }
0x1490   : > { %v4314_v30 = vpop.eup %4313 }
0x1491   : > { %v2638_v47 = vsel %vm1554_vm6, %v4314_v30, 0.0 }
0x1492   : > { %2639 = vadd.xlane.f32.xlu0 %v2638_v47 }
0x14f1   : > { %v2747_v54 = vpop.xlane.xlu0 %2746 }
0x14f2   : > { %v2748_v25 = vsub.f32 %v2744_v18, %v2747_v54 }
0x14f4   : > { %v2749_v8 = vmul.f32 1.442695, %v2748_v25 }
0x14f6   : > { %4315 = vpow2.f32 %v2749_v8 }
0x14f9   : > { %v2865_v63 = vpop.xlane.xlu1 %2864 }
0x14fa   : > { %v2866_v4 = vsub.f32 %v2862_v23, %v2865_v63 }
0x14fc   : > { %v2867_v0 = vmul.f32 1.442695, %v2866_v4 }
0x14fe   : > { %4317 = vpow2.f32 %v2867_v0  ;;  %v5982_v0 = vld [vmem:[#allocation32_spill] sm:$0xff] }
0x1501   : > { %v2982_v10 = vpop.xlane.xlu1 %2981 }
0x1502   : > { %v2983_v11 = vsub.f32 %v2979_v42, %v2982_v10  ;;  %v5988_v10 = vld [vmem:[#allocation38_spill] sm:$0xff] }
0x1503   : > { %v4316_v3 = vpop.eup %4315 }
0x1504   : > { %v2751_v33 = vsel %vm1554_vm6, %v4316_v3, 0.0  ;;  %v2984_v12 = vmul.f32 1.442695, %v2983_v11  ;;  %v5989_v11 = vld [vmem:[#allocation39_spill] sm:$0xff] }
0x1505   : > { %2752 = vadd.xlane.f32.xlu1 %v2751_v33  ;;  %v5984_v33 = vld [vmem:[#allocation34_spill] sm:$0xff] }
0x150b   : > { %v4318_v7 = vpop.eup %4317 }
0x150c   : > { %v2869_v62 = vsel %vm1554_vm6, %v4318_v7, 0.0 }
0x150d   : > { %2870 = vadd.xlane.f32.xlu0 %v2869_v62  ;;  %v5986_v62 = vld [vmem:[#allocation36_spill] sm:$0xff] }
0x1516   : > { %2875 = vrot.lane.b32.xlu1 %v5666_v34, %s4691_s12 }
0x151b   : > { %v2640_v9 = vpop.xlane.xlu0 %2639 }
0x151c   : > { %4319 = vrcp.f32 %v2640_v9  ;;  %v5987_v9 = vld [vmem:[#allocation37_spill] sm:$0xff] }
0x151d   : > { %4321 = vpow2.f32 %v2984_v12  ;;  %v5990_v12 = vld [vmem:[#allocation40_spill] sm:$0xff] }
0x1523   : > { %2758 = vrot.lane.b32.xlu0 %v5666_v34, %s4690_s4 }
0x1529   : > { %v4320_v60 = vpop.eup %4319 }
0x152a   : > { %v2642_v53 = vmul.f32 %v4320_v60, %v4314_v30  ;;  %v4322_v50 = vpop.eup %4321  ;;  %v5991_v60 = vld [vmem:[#allocation41_spill] sm:$0xff] }
0x152b   : > { %v2986_v51 = vsel %vm1554_vm6, %v4322_v50, 0.0 }
0x152c   : > { %v2643_v61 = vpack.c.bf16 %v2642_v53, %v2642_v53  ;;  %v5992_v53 = vld [vmem:[#allocation42_spill] sm:$0xff] }
0x152e   : > { %4023 = vmatmul.mubr.msk.bf16.vlgmr.msra.gmra.mxu1 %vm1554_vm6, %v2643_v61  ;;  %v5993_v61 = vld [vmem:[#allocation45_spill] sm:$0xff] }
0x152f   : > { %4034 = vmatprep.mubr.msk.bf16.mxu1 %vm4689_vm0, %v5973_v28 }
0x153a   : > { %2987 = vadd.xlane.f32.xlu1 %v2986_v51  ;;  %v5995_v51 = vld [vmem:[#allocation47_spill] sm:$0xff] }
0x154b   : > { %2992 = vrot.lane.b32.xlu1 %v5666_v34, %s4692_s23 }
0x158e   : > { %v2753_v13 = vpop.xlane.xlu1 %2752 }
0x158f   : > { %4323 = vrcp.f32 %v2753_v13  ;;  %v5996_v13 = vld [vmem:[#allocation48_spill] sm:$0xff] }
0x1592   : > { %v2876_v17 = vpop.permute.xlu1 %2875 }
0x1593   : > { %v2881_v18 = vsel %vm1570_vm4, %v2876_v17, 0 }
0x1596   : > { %v2871_v52 = vpop.xlane.xlu0 %2870 }
0x1597   : > { %4325 = vrcp.f32 %v2871_v52 }
0x159a   : > { %v2759_v14 = vpop.permute.xlu0 %2758 }
0x159b   : > { %v2764_v15 = vsel %vm1570_vm4, %v2759_v14, 0  ;;  %v5997_v14 = vld [vmem:[#allocation24_spill] sm:$0xff] }
0x159c   : > { %v4324_v55 = vpop.eup %4323  ;;  %4033 = vmatpush3.bf16.msra.mxu1 %v2764_v15 }
0x159d   : > { %4044 = vmatprep.subr.bf16.mxu1 %v5973_v28  ;;  %v2755_v16 = vmul.f32 %v4324_v55, %v4316_v3  ;;  %v5983_v3 = vld [vmem:[#allocation33_spill] sm:$0xff] }
0x159f   : > { %v2756_v56 = vpack.c.bf16 %v2755_v16, %v2755_v16 }
0x15a1   : > { %4035 = vmatmul.mubr.msk.bf16.vlgmr.msra.gmra.mxu1 %vm1554_vm6, %v2756_v56 }
0x15a2   : > { %4045 = vmatpush3.bf16.msra.mxu1 %v2881_v18  ;;  %4046 = vmatprep.mubr.msk.bf16.mxu1 %vm4689_vm0, %v5973_v28 }
0x15a3   : > { %4056 = vmatprep.subr.bf16.mxu1 %v5973_v28 }
0x15a4   : > { %v4326_v34 = vpop.eup %4325 }
0x15a5   : > { %v2873_v31 = vmul.f32 %v4326_v34, %v4318_v7  ;;  %v5985_v7 = vld [vmem:[#allocation35_spill] sm:$0xff] }
0x15a7   : > { %v2874_v19 = vpack.c.bf16 %v2873_v31, %v2873_v31 }
0x15a9   : > { %4047 = vmatmul.mubr.msk.bf16.vlgmr.msra.gmra.mxu1 %vm1554_vm6, %v2874_v19 }
0x15aa   : > { %4058 = vmatprep.mubr.msk.bf16.mxu1 %vm4689_vm0, %v5973_v28  ;;  %v5976_v28 = vld [vmem:[#allocation26_spill] sm:$0xff] }
0x15c3   : > { %v2988_v20 = vpop.xlane.xlu1 %2987 }
0x15c4   : > { %4327 = vrcp.f32 %v2988_v20 }
0x15c7   : > { %v2993_v21 = vpop.permute.xlu1 %2992 }
0x15c8   : > { %v2998_v27 = vsel %vm1570_vm4, %v2993_v21, 0 }
0x15c9   : > { %4057 = vmatpush3.bf16.msra.mxu1 %v2998_v27 }
0x15ca   : > { %3110 = vmatprep.subr.bf16.mxu1 %v5411_v2  ;;  %v5975_v2 = vld [vmem:[#allocation25_spill] sm:$0xff] }
0x15d1   : > { %v4328_v22 = vpop.eup %4327 }
0x15d2   : > { %v2990_v23 = vmul.f32 %v4328_v22, %v4322_v50  ;;  %v5994_v50 = vld [vmem:[#allocation46_spill] sm:$0xff] }
0x15d4   : > { %v2991_v1 = vpack.c.bf16 %v2990_v23, %v2990_v23 }
0x15d6   : > { %4059 = vmatmul.mubr.msk.bf16.vlgmr.msra.gmra.mxu1 %vm1554_vm6, %v2991_v1 }
0x15d7   : > { %3111 = vmatpush1.bf16.msra.mxu1 %v5414_v36  ;;  %3142 = vmatprep.mubr.bf16.mxu1 %v5974_v32  ;;  %v5977_v36 = vld [vmem:[#allocation27_spill] sm:$0xff] }
0x15d8   : > { %3112 = vmatprep.subr.bf16.mxu1 %v5419_v37 }
0x15db   : > { %3113 = vmatpush1.bf16.msra.mxu1 %v5422_v39  ;;  %v5979_v39 = vld [vmem:[#allocation29_spill] sm:$0xff] }
0x15dc   : > { %3114 = vmatprep.subr.bf16.mxu1 %v5427_v48 }
0x15df   : > { %3115 = vmatpush1.bf16.msra.mxu1 %v5430_v49  ;;  %v5980_v49 = vld [vmem:[#allocation30_spill] sm:$0xff] }
0x15e0   : > { %3116 = vmatprep.subr.bf16.mxu1 %v5435_v57 }
0x15e3   : > { %3117 = vmatpush1.bf16.msra.mxu1 %v5438_v58  ;;  %v5981_v58 = vld [vmem:[#allocation31_spill] sm:$0xff] }
0x15e4   : > { %3118 = vmatprep.subr.bf16.mxu1 %v5441_v59 }
0x15e7   : > { %3119 = vmatpush1.bf16.msra.mxu1 %v5975_v2 }
0x15e8   : > { %3120 = vmatprep.subr.bf16.mxu1 %v5976_v28 }
0x15eb   : > { %3121 = vmatpush1.bf16.msra.mxu1 %v5977_v36 }
0x15ec   : > { %3122 = vmatprep.subr.bf16.mxu1 %v5978_v35 }
0x15ee   : > { %v2684_v37 = vpop.f32.mrf.mxu1 }
0x15ef   : > { %2690 = vst.msk [vmem:[#allocation2] sm:$0xff] %vm1499_vm3, %v2684_v37  ;;  %3123 = vmatpush1.bf16.msra.mxu1 %v5979_v39  ;;  %v5999_v37 = vld [vmem:[#allocation44_spill] sm:$0xff] }
0x15f0   : > { %v4024_v48 = vpop.f32.mrf.mxu1  ;;  %3124 = vmatprep.subr.bf16.mxu1 %v5980_v49 }
0x15f2   : > { %v2687_v57 = vpop.f32.mrf.mxu1 }
0x15f3   : > { %3125 = vmatpush1.bf16.msra.mxu1 %v5981_v58  ;;  %v6000_v57 = vld [vmem:[#allocation49_spill] sm:$0xff] }
0x15f4   : > { %v4025_v59 = vpop.f32.mrf.mxu1 }
0x1661   : > { %v2800_v38 = vpop.f32.mrf.mxu1 }
0x1662   : > { %2807 = vrot.lane.b32.xlu0 %v2800_v38, %s4692_s23 }
0x1663   : > { %v4036_v40 = vpop.f32.mrf.mxu1 }
0x1665   : > { %v2803_v41 = vpop.f32.mrf.mxu1 }
0x1667   : > { %v4037_v42 = vpop.f32.mrf.mxu1 }
0x1669   : > { %v2917_v43 = vpop.f32.mrf.mxu1 }
0x166a   : > { %2924 = vrot.lane.b32.xlu1 %v2917_v43, %s4691_s12 }
0x166b   : > { %v4048_v44 = vpop.f32.mrf.mxu1 }
0x166d   : > { %v2920_v45 = vpop.f32.mrf.mxu1 }
0x166f   : > { %v4049_v46 = vpop.f32.mrf.mxu1 }
0x1696   : > { %v3034_v24 = vpop.f32.mrf.mxu1 }
0x1697   : > { %3041 = vrot.lane.b32.xlu0 %v3034_v24, %s4690_s4 }
0x1698   : > { %v4060_v26 = vpop.f32.mrf.mxu1 }
0x169a   : > { %v3037_v30 = vpop.f32.mrf.mxu1 }
0x169c   : > { %v4061_v47 = vpop.f32.mrf.mxu1 }
0x16d4   : > { %v2808_v54 = vpop.permute.xlu0 %2807 }
0x16d5   : > { %2810 = vst.msk [vmem:[#allocation2] sm:$0xff] %vm1734_vm7, %v2808_v54 }
0x16dc   : > { %v2925_v25 = vpop.permute.xlu1 %2924 }
0x16dd   : > { %2927 = vst.msk [vmem:[#allocation2] sm:$0xff] %vm1852_vm8, %v2925_v25 }
0x1709   : > { %v3042_v8 = vpop.permute.xlu0 %3041 }
0x170a   : > { %3044 = vst.msk [vmem:[#allocation2] sm:$0xff] %vm1970_vm9, %v3042_v8 }
0x1711   : > { %v3045_v63 = vld [vmem:[#allocation2] sm:$0xff] }
0x1712   : > { %v3046_v4 = vpack.c.bf16 %v3045_v63, %v3045_v63 }
0x1714   : > { %4079 = vmatmul.mubr.bf16.vlgmr.msra.gmra.mxu0 %v3046_v4 }
0x1715   : > { %3805 = vmatpush3.bf16.msra.mxu0 %v5982_v0 }
0x1716   : > { %3806 = vmatprep.subr.bf16.mxu0 %v5983_v3 }
0x1719   : > { %3807 = vmatpush3.bf16.msra.mxu0 %v5984_v33 }
0x171a   : > { %3808 = vmatprep.subr.bf16.mxu0 %v5985_v7 }
0x171d   : > { %3809 = vmatpush3.bf16.msra.mxu0 %v5986_v62 }
0x171e   : > { %3810 = vmatprep.subr.bf16.mxu0 %v5987_v9 }
0x1721   : > { %3811 = vmatpush3.bf16.msra.mxu0 %v5988_v10 }
0x1722   : > { %3812 = vmatprep.subr.bf16.mxu0 %v5989_v11 }
0x1725   : > { %3813 = vmatpush3.bf16.msra.mxu0 %v5990_v12 }
0x1726   : > { %3814 = vmatprep.subr.bf16.mxu0 %v5991_v60 }
0x1729   : > { %3815 = vmatpush3.bf16.msra.mxu0 %v5992_v53 }
0x172a   : > { %3816 = vmatprep.subr.bf16.mxu0 %v5993_v61 }
0x172d   : > { %3817 = vmatpush3.bf16.msra.mxu0 %v5994_v50 }
0x172e   : > { %3818 = vmatprep.subr.bf16.mxu0 %v5995_v51 }
0x1731   : > { %3819 = vmatpush3.bf16.msra.mxu0 %v5996_v13 }
0x17d4   : > { %v3081_v52 = vpop.f32.mrf.mxu0 }
0x17d5   : > { %v3082_v15 = vadd.f32 %v5997_v14, %v3081_v52 }
0x17d6   : > { %v4080_v55 = vpop.f32.mrf.mxu0 }
0x17d7   : > { %v3087_v16 = vadd.f32 %v3082_v15, %v5586_v29  ;;  %v5998_v29 = vld [vmem:[#allocation43_spill] sm:$0xff] }
0x17d8   : > { %v3084_v17 = vpop.f32.mrf.mxu0 }
0x17d9   : > { %3088 = vadd.xlane.f32.xlu1 %v3087_v16 }
0x17da   : > { %v4081_v56 = vpop.f32.mrf.mxu0 }
0x1862   : > { %v3089_v18 = vpop.xlane.xlu1 %3088 }
0x1863   : > { %v3090_v34 = vmul.f32 0.0078125, %v3089_v18 }
0x1865   : > { %v3091_v31 = vsub.f32 %v3087_v16, %v3090_v34 }
0x1867   : > { %v3092_v19 = vmul.f32 %v3091_v31, %v3091_v31  ;;  %v3106_v28 = vmul.f32 %v5998_v29, %v3091_v31 }
0x1869   : > { %3093 = vadd.xlane.f32.xlu0 %v3092_v19 }
0x18f2   : > { %v3094_v20 = vpop.xlane.xlu0 %3093 }
0x18f3   : > { %v3095_v21 = vmul.f32 0.007874016, %v3094_v20 }
0x18f5   : > { %4329 = vrsqrt.f32 %v3095_v21  ;;  %vm3098_vm0 = vcmp.eq.f32.partialorder %v3095_v21, inf  ;;  %v3101_v23 = vand.u32 2147483648, %v3095_v21  ;;  %vm3100_vm2 = vcmp.eq.f32.partialorder %v3095_v21, 0.0 }
0x1902   : > { %v4330_v27 = vpop.eup %4329 }
0x1903   : > { %v3097_v22 = vmul.f32 %v4330_v27, %v3095_v21 }
0x1905   : > { %v3099_v1 = vsel %vm3098_vm0, %v3095_v21, %v3097_v22 }
0x1906   : > { %v3102_v32 = vsel %vm3100_vm2, %v3101_v23, %v3099_v1 }
0x1907   : > { %v3103_v2 = vadd.f32 1e-06, %v3102_v32 }
0x1909   : > { %4331 = vrcp.f32 %v3103_v2 }
0x1916   : > { %v4332_v36 = vpop.eup %4331 }
0x1917   : > { %v3107_v35 = vmul.f32 %v4332_v36, %v3106_v28 }
0x1919   : > { %v3108_v39 = vadd.f32 %v5999_v37, %v3107_v35 }
0x191b   : > { %v3109_v48 = vpack.c.bf16 %v3108_v39, %v3108_v39 }
0x191d   : > { %3143 = vmatmul.mubr.bf16.vlgmr.msra.gmra.mxu1 %v3109_v48 }
0x19dd   : > { %v3144_v49 = vpop.f32.mrf.mxu1 }
0x19de   : > { %v3145_v58 = vadd.f32 %v3144_v49, %v6000_v57 }
0x19df   : > { %v3146_v59 = vpop.f32.mrf.mxu1 }
0x19e0   : > { %v3147_v38 = vadd.f32 %v3146_v59, %v5561_v6  ;;  %v3151_v40 = vmax.f32 %v3145_v58, 0.0 }
0x19e1   : > { %v3148_v41 = vpop.f32.mrf.mxu1 }
0x19e2   : > { %v3152_v42 = vmax.f32 %v3147_v38, 0.0  ;;  %v3153_v45 = vpack.c.bf16 %v3151_v40, %v3151_v40 }
0x19e3   : > { %v3149_v43 = vpop.f32.mrf.mxu1 }
0x19e4   : > { %v3154_v44 = vpack.c.bf16 %v3152_v42, %v3152_v42 }
0x19e6   : > { %3187 = vmatprep.mubr.bf16.mxu0 %v3154_v44 }
0x19e7   : > { %3188 = vmatmul.mubr.bf16.vlgmr.msra.gmra.mxu0 %v3153_v45 }
0x1aa7   : > { %v3820_v46 = vpop.f32.mrf.mxu0 }
0x1aa9   : > { %v3821_v24 = vpop.f32.mrf.mxu0 }
0x1aaa   : > { %v3822_v26 = vadd.f32 %v3821_v24, %v3820_v46  ;;  %3198 = sbr.rel (%p3652_p13) target bundleno = 6833 (0x1ab1), region = 152 }
0x1aab   : > { %v3823_v30 = vpop.f32.mrf.mxu0 }
0x1aac   : > { %v3190_v47 = vadd.f32 %v3822_v26, %v5570_v5 }
0x1aad   : > { %v3824_v54 = vpop.f32.mrf.mxu0 }
0x1aae   : > { %v3195_v25 = vadd.f32 %v3190_v47, %v3087_v16 }
0x1ab0   : > { %3199 = vst [vmem:[#allocation15 + $0x8] sm:$0xff] %v3195_v25 }
0x1ab1 PF: > { %3202 = sbr.rel (%p3653_p1) target bundleno = 7161 (0x1bf9), region = 156  ;;  %s6001_s4 = sld [smem:[#allocation67_spill]] (!%p3653_p1) }
0x1ab2   : > { %s6002_s27 = sld [smem:[#allocation68_spill]] (!%p3653_p1) }
0x1ab6   : > { %3205 = vadd.xlane.f32.xlu0 %v3195_v25 }
0x1ab7   : > { %v3666_v11 = vld [vmem:[%s6001_s4] ss:$0 sm:$0xff] }
0x1ab8   : > { %v3667_v53 = vld [vmem:[%s6002_s27] ss:$0 sm:$0xff] }
0x1b3f   : > { %v3206_v6 = vpop.xlane.xlu0 %3205 }
0x1b40   : > { %v3207_v8 = vmul.f32 0.0078125, %v3206_v6 }
0x1b42   : > { %v3208_v63 = vsub.f32 %v3195_v25, %v3207_v8 }
0x1b44   : > { %v3209_v4 = vmul.f32 %v3208_v63, %v3208_v63  ;;  %v3229_v12 = vmul.f32 %v3666_v11, %v3208_v63 }
0x1b46   : > { %3210 = vadd.xlane.f32.xlu0 %v3209_v4 }
0x1bcf   : > { %v3211_v0 = vpop.xlane.xlu0 %3210 }
0x1bd0   : > { %v3212_v3 = vmul.f32 0.007874016, %v3211_v0 }
0x1bd2   : > { %4333 = vrsqrt.f32 %v3212_v3  ;;  %vm3215_vm3 = vcmp.eq.f32.partialorder %v3212_v3, inf  ;;  %v3218_v7 = vand.u32 2147483648, %v3212_v3  ;;  %vm3217_vm4 = vcmp.eq.f32.partialorder %v3212_v3, 0.0 }
0x1bdf   : > { %v4334_v5 = vpop.eup %4333 }
0x1be0   : > { %v3214_v33 = vmul.f32 %v4334_v5, %v3212_v3 }
0x1be2   : > { %v3216_v62 = vsel %vm3215_vm3, %v3212_v3, %v3214_v33 }
0x1be3   : > { %v3219_v9 = vsel %vm3217_vm4, %v3218_v7, %v3216_v62 }
0x1be4   : > { %v3220_v10 = vadd.f32 1e-06, %v3219_v9 }
0x1be6   : > { %4335 = vrcp.f32 %v3220_v10 }
0x1bf3   : > { %v4336_v60 = vpop.eup %4335 }
0x1bf4   : > { %v3230_v61 = vmul.f32 %v4336_v60, %v3229_v12 }
0x1bf6   : > { %v3237_v50 = vadd.f32 %v3667_v53, %v3230_v61 }
0x1bf8   : > { %3238 = vst [vmem:[#allocation15 + $0x8] sm:$0xff] %v3237_v50 }
0x1bf9 PF: > { %p4142_p8 = scmp.eq.s32.totalorder %s4831_s3, 1  ;;  %s4694_s8 = smov [#allocation15]  }
0x1bfa   : > { %s3248_s12 = sshll.u32 %s4694_s8, 4  ;;  %s3249_s12 = int_to_ptr.vmem [resolvable:$true] %s3248_s12 }
0x1bfb   : > { %s4585_s23 = scalar_lea.vmem %s3249_s12, 256  ;;  %p4592_p3 = scmp.lt.s32.totalorder %s3249_s12, %s3249_s12 }
0x1bfc   : > { %p4586_p12 = scmp.ne.s32.totalorder %s3249_s12, %s4585_s23  ;;  %p4593_p9 = scmp.lt.s32.totalorder %s4585_s23, %s4585_s23 }
0x1bfe   : > { %p4587_p2 = pnand %p4586_p12, %p4142_p8  ;;  %p4594_p0 = por %p4593_p9, %p4592_p3 }
0x1c00   : > { %p4588_p7 = pneg %p4587_p2 }
0x1c02   : > { %p4595_p6 = pnand %p4594_p0, %p4588_p7 }
0x1c04   : > { %4598 = shalt.err (!%p4595_p6)
}
0x1c05   : > { %s4695_s10 = smov 128   ;;  %s4696_s26 = smov 8  }
0x1c06   : > { %s6003_s14 = sld [smem:[#allocation69_spill]] }
0x1c0c   : > { %4105 = dma.vmem_to_hbm [thread:$0]  (%p4142_p8), %s3249_s12, 256, %s6003_s14, [#allocation5], %s4695_s10, %s4695_s10, %s4696_s26  }
0x1c0d   : > { %4646 = dma.done.wait (%p4142_p8), [#allocation5], 256  }
0x1c0e   : > { %4648 = vsyncadd (%p4142_p8), [#allocation5], 4294967040 }
0x1c0f PF: > { %s6004_s7 = sld [smem:[#allocation21_spill]]  ;;  %s6008_s1 = smov %s4655_s22 }
0x1c10   : > { %s6005_s9 = sld [smem:[#allocation20_spill]]  ;;  %s6010_s24 = smov %s4667_s2 }
0x1c11   : > { %s6006_s23 = sld [smem:[#allocation23_spill]] }
0x1c12   : > { %s6007_s20 = sld [smem:[#allocation22_spill]] }
0x1c15   : > { %s33_s25 = sadd.s32 1, %s6004_s7  }
0x1c16   : > { %p30_p10 = scmp.ge.s32.totalorder %s33_s25, 4   ;;  %s6009_s22 = smov %s6005_s9 }
0x1c18   : > { %s6011_s2 = smov %s6007_s20  ;;  %32 = sbr.rel (!%p30_p10) target bundleno = 26 (0x1a), region = 262 }
0x1c1d   :  { %3264 = vsyncpa [#allocation4], 1 }
0x1c1e   :  { %3266 = vsyncpa [#allocation4 + $0x1], 1 }
0x1c1f   :  { %3267 = vsyncpa [#allocation7], 1 }
0x1c20   :  { %3268 = vsyncpa [#allocation5], 1 }
0x1c21   :  { %3270 = vsyncpa [#allocation5 + $0x1], 1 }

</bundles_post_ra>
